<compile_context>
chip_gen: v5e
topology: v5e:2x2
jax: 0.10.0
libtpu: 0.0.40
codegen_flags: <defaults>
</compile_context>

<pallas_src>
import functools
import math

import jax
import jax.numpy as jnp
from jax import lax
from jax.experimental import pallas as pl
from jax.experimental.pallas import tpu as pltpu

# ----------------------------- model config ---------------------------------
STATE_DIMS = 6          # student observation dims
ACT_DIMS = 3            # student action dims
TEACHER_DIMS = 6        # teacher frame dims
STACK = 5               # stack_size
T_TEACHER = 8           # max_teacher_length (teacher_traj seq length)
E = 32                  # state_embedding_hidden_sizes[-1] == GPT2 n_embd
N_LAYER = 2
N_HEAD = 2
HEAD_DIM = E // N_HEAD
N_INNER = 4 * E
L = T_TEACHER + 2 * STACK          # max_length (use_past_actions=True, no rtg)
DIN = TEACHER_DIMS + STATE_DIMS + ACT_DIMS
MAX_TIME_STEPS = 64
NEG = -1e9
LN_EPS = 1e-5


# ------------------------------ kernel ---------------------------------------
def _layernorm(x, g, b):
    mu = jnp.mean(x, axis=-1, keepdims=True)
    var = jnp.mean(jnp.square(x - mu), axis=-1, keepdims=True)
    return (x - mu) * lax.rsqrt(var + LN_EPS) * g + b


def _gelu_new(x):
    return 0.5 * x * (1.0 + jnp.tanh(
        math.sqrt(2.0 / math.pi) * (x + 0.044715 * x * x * x)))


def critic_kernel(x_ref, pos_ref, bias_ref,
                  wfull_ref, lne_g_ref, lne_b_ref, wpe_ref,
                  ln1_g_ref, ln1_b_ref,
                  qkvw_ref, qkvb_ref, pw_ref, pb_ref,
                  ln2_g_ref, ln2_b_ref,
                  fcw_ref, fcb_ref, fpw_ref, fpb_ref,
                  lnf_g_ref, lnf_b_ref,
                  hw_ref, hb_ref,
                  out_ref, *, tb):
    # ---- embeddings: one fused (TB*L, DIN) @ (DIN, E) matmul ----------------
    # pos_ref already contains timestep embeddings + per-modality linear bias.
    x = x_ref[0]                                              # (M, DIN), M = tb*L
    emb = jnp.dot(x, wfull_ref[...],
                  preferred_element_type=jnp.float32) + pos_ref[0]
    # embed LayerNorm, then GPT2 positional embeddings (pre-tiled to (M, E))
    h = _layernorm(emb, lne_g_ref[...], lne_b_ref[...]) + wpe_ref[...]

    bias = bias_ref[0]                                        # (tb, L, L), precomputed

    for layer in range(N_LAYER):
        a = _layernorm(h, ln1_g_ref[layer], ln1_b_ref[layer])            # (M, E)
        # fused QKV: (M, E) @ (E, 3E); 1/sqrt(head_dim) already folded into Q
        qkv = jnp.dot(a, qkvw_ref[layer],
                      preferred_element_type=jnp.float32) + qkvb_ref[layer]
        qkv3 = qkv.reshape(tb, L, 3 * E)
        head_outs = []
        for hh in range(N_HEAD):
            qh = qkv3[:, :, hh * HEAD_DIM:(hh + 1) * HEAD_DIM]
            kh = qkv3[:, :, E + hh * HEAD_DIM:E + (hh + 1) * HEAD_DIM]
            vh = qkv3[:, :, 2 * E + hh * HEAD_DIM:2 * E + (hh + 1) * HEAD_DIM]
            s = jnp.einsum('bqd,bkd->bqk', qh, kh,
                           preferred_element_type=jnp.float32) + bias
            s = s - jnp.max(s, axis=-1, keepdims=True)
            p = jnp.exp(s)
            p = p * pl.reciprocal(jnp.sum(p, axis=-1, keepdims=True), approx=True)
            head_outs.append(jnp.einsum('bqk,bkd->bqd', p, vh,
                                        preferred_element_type=jnp.float32))
        attn = jnp.concatenate(head_outs, axis=-1).reshape(tb * L, E)
        # single c_proj matmul over concatenated heads
        h = h + jnp.dot(attn, pw_ref[layer],
                        preferred_element_type=jnp.float32) + pb_ref[layer]

        a2 = _layernorm(h, ln2_g_ref[layer], ln2_b_ref[layer])
        ff = jnp.dot(a2, fcw_ref[layer],
                     preferred_element_type=jnp.float32) + fcb_ref[layer]
        ff = _gelu_new(ff)
        h = h + jnp.dot(ff, fpw_ref[layer],
                        preferred_element_type=jnp.float32) + fpb_ref[layer]

    h = _layernorm(h, lnf_g_ref[...], lnf_b_ref[...])
    # returns-to-go head only for the last student *state* token (row L-2 of
    # each batch element) -> tiny (tb, 1) store instead of a full (L, 1) slab.
    h_sel = h.reshape(tb, L, E)[:, L - 2, :]                  # (tb, E)
    rtg = jnp.dot(h_sel, hw_ref[...],
                  preferred_element_type=jnp.float32) + hb_ref[...]
    out_ref[0] = rtg


# ---------------------------- parameters -------------------------------------
def init_params(key):
    keys = jax.random.split(key, 24)
    it = iter(keys)

    def nrm(shape, scale=0.1):
        return (scale * jax.random.normal(next(it), shape)).astype(jnp.float32)

    p = {}
    # modality embedding linears (mlp([dims, 32]) == single Linear, no act)
    p['w_teacher'] = nrm((TEACHER_DIMS, E))
    p['b_teacher'] = nrm((E,), 0.02)
    p['w_sstate'] = nrm((STATE_DIMS, E))
    p['b_sstate'] = nrm((E,), 0.02)
    p['w_sact'] = nrm((ACT_DIMS, E))
    p['b_sact'] = nrm((E,), 0.02)
    # timestep embedding tables
    p['emb_teacher_ts'] = nrm((MAX_TIME_STEPS, E), 0.02)
    p['emb_student_ts'] = nrm((MAX_TIME_STEPS, E), 0.02)
    # embed LayerNorm
    p['lne_g'] = jnp.ones((1, E), jnp.float32)
    p['lne_b'] = jnp.zeros((1, E), jnp.float32)
    # GPT2 positional embeddings (n_positions == max_length == L)
    p['wpe'] = nrm((L, E), 0.02)
    # GPT2 blocks — fused QKV (columns [Q | K | V], head-major inside each)
    p['ln1_g'] = jnp.ones((N_LAYER, 1, E), jnp.float32)
    p['ln1_b'] = jnp.zeros((N_LAYER, 1, E), jnp.float32)
    qkvw = nrm((N_LAYER, E, 3 * E), 0.02)
    qkvb = nrm((N_LAYER, 1, 3 * E), 0.02)
    # fold attention scale 1/sqrt(head_dim) into Q weights/bias
    scale = 1.0 / math.sqrt(HEAD_DIM)
    p['qkvw'] = qkvw.at[:, :, :E].multiply(scale)
    p['qkvb'] = qkvb.at[:, :, :E].multiply(scale)
    p['pw'] = nrm((N_LAYER, E, E), 0.02)        # c_proj (concat heads -> E)
    p['pb'] = nrm((N_LAYER, 1, E), 0.02)
    p['ln2_g'] = jnp.ones((N_LAYER, 1, E), jnp.float32)
    p['ln2_b'] = jnp.zeros((N_LAYER, 1, E), jnp.float32)
    p['fcw'] = nrm((N_LAYER, E, N_INNER), 0.02)
    p['fcb'] = nrm((N_LAYER, 1, N_INNER), 0.02)
    p['fpw'] = nrm((N_LAYER, N_INNER, E), 0.02)
    p['fpb'] = nrm((N_LAYER, 1, E), 0.02)
    p['lnf_g'] = jnp.ones((1, E), jnp.float32)
    p['lnf_b'] = jnp.zeros((1, E), jnp.float32)
    # predict_returns_to_go head: Linear(E, 1)
    p['hw'] = nrm((E, 1), 0.1)
    p['hb'] = nrm((1, 1), 0.02)

    # fused block-diagonal embedding weight: rows [teacher | state | action]
    p['w_full'] = jnp.concatenate([p['w_teacher'], p['w_sstate'], p['w_sact']], axis=0)
    bias_student = jnp.tile(jnp.stack([p['b_sstate'], p['b_sact']], axis=0), (STACK, 1))
    p['bias_full'] = jnp.concatenate(
        [jnp.tile(p['b_teacher'][None], (T_TEACHER, 1)), bias_student], axis=0)   # (L, E)
    return p


# ----------------------------- glue (plain JAX) -------------------------------
def format_obs(obs):
    """Mirror of TranslationTransformerGPT2.format_obs (non-prestacked path)."""
    b = obs['observation'].shape[0]
    teacher_traj = obs['teacher_frames'].astype(jnp.float32)
    frames = jnp.zeros((b, STACK, STATE_DIMS + ACT_DIMS), jnp.float32)
    frames = frames.at[:, :, STATE_DIMS:].set(-10.0)
    frames = frames.at[:, -1, :STATE_DIMS].set(obs['observation'].astype(jnp.float32))
    teacher_mask = obs['teacher_attn_mask'].astype(jnp.float32)
    student_mask = jnp.zeros((b, STACK), jnp.float32).at[:, -1].set(1.0)
    teacher_ts = obs['teacher_time_steps'].astype(jnp.int32)
    student_ts = jnp.zeros((b, STACK), jnp.int32).at[:, -1].set(obs['step'].astype(jnp.int32))
    return teacher_traj, frames, teacher_mask, student_mask, teacher_ts, student_ts


def build_inputs(teacher_traj, frames, teacher_mask, student_mask,
                 teacher_ts, student_ts, params):
    b = teacher_traj.shape[0]
    student_obs = frames[:, :, :STATE_DIMS]
    student_act = frames[:, :, STATE_DIMS:]

    teacher_rows = jnp.concatenate(
        [teacher_traj, jnp.zeros((b, T_TEACHER, STATE_DIMS + ACT_DIMS), jnp.float32)], axis=-1)
    state_rows = jnp.concatenate(
        [jnp.zeros((b, STACK, TEACHER_DIMS), jnp.float32), student_obs,
         jnp.zeros((b, STACK, ACT_DIMS), jnp.float32)], axis=-1)
    act_rows = jnp.concatenate(
        [jnp.zeros((b, STACK, TEACHER_DIMS + STATE_DIMS), jnp.float32), student_act], axis=-1)
    interleaved = jnp.stack([state_rows, act_rows], axis=2).reshape(b, 2 * STACK, DIN)
    x_full = jnp.concatenate([teacher_rows, interleaved], axis=1)      # (B, L, DIN)

    t_pos = jnp.take(params['emb_teacher_ts'], teacher_ts, axis=0)     # (B, T, E)
    s_pos = jnp.take(params['emb_student_ts'], student_ts, axis=0)     # (B, S, E)
    pos_full = jnp.concatenate([t_pos, jnp.repeat(s_pos, 2, axis=1)], axis=1)  # (B, L, E)
    # fold per-modality linear bias (added before the embed LayerNorm) into pos
    pos_full = pos_full + params['bias_full'][None]

    s_mask2 = jnp.repeat(student_mask, 2, axis=1)
    key_mask = jnp.concatenate([teacher_mask, s_mask2], axis=1)        # (B, L)
    return x_full, pos_full, key_mask


# --------------------------- pallas wrapper -----------------------------------
def pallas_critic(x_full, pos_full, key_mask, params):
    batch = x_full.shape[0]
    tb = min(batch, 8)                          # batch tile folded into matmul M
    nb = -(-batch // tb)
    b_pad = nb * tb
    pad = b_pad - batch
    if pad:
        x_full = jnp.concatenate(
            [x_full, jnp.zeros((pad, L, DIN), jnp.float32)], axis=0)
        pos_full = jnp.concatenate(
            [pos_full, jnp.zeros((pad, L, E), jnp.float32)], axis=0)
        key_mask = jnp.concatenate(
            [key_mask, jnp.zeros((pad, L), jnp.float32)], axis=0)

    # precompute attention bias (causal + key padding) outside the kernel
    causal = jnp.tril(jnp.ones((L, L), bool))
    allowed = causal[None, :, :] & (key_mask[:, None, :] > 0.5)
    bias = jnp.where(allowed, 0.0, NEG).astype(jnp.float32)           # (B_pad, L, L)

    m = tb * L
    x_r = x_full.reshape(nb, m, DIN)
    pos_r = pos_full.reshape(nb, m, E)
    bias_r = bias.reshape(nb, tb, L, L)
    wpe_t = jnp.tile(params['wpe'], (tb, 1))                          # (M, E)

    weights = [
        params['w_full'], params['lne_g'], params['lne_b'], wpe_t,
        params['ln1_g'], params['ln1_b'],
        params['qkvw'], params['qkvb'], params['pw'], params['pb'],
        params['ln2_g'], params['ln2_b'],
        params['fcw'], params['fcb'], params['fpw'], params['fpb'],
        params['lnf_g'], params['lnf_b'],
        params['hw'], params['hb'],
    ]

    def tile_spec(arr):
        nz = arr.ndim - 1
        return pl.BlockSpec((1,) + arr.shape[1:],
                            lambda i, _nz=nz: (i,) + (0,) * _nz)

    def full_spec(arr):
        nd = arr.ndim
        return pl.BlockSpec(arr.shape, lambda i, _nd=nd: (0,) * _nd)

    in_specs = ([tile_spec(x_r), tile_spec(pos_r), tile_spec(bias_r)]
                + [full_spec(w) for w in weights])
    out_spec = pl.BlockSpec((1, tb, 1), lambda i: (i, 0, 0))

    out = pl.pallas_call(
        functools.partial(critic_kernel, tb=tb),
        out_shape=jax.ShapeDtypeStruct((nb, tb, 1), jnp.float32),
        grid_spec=pltpu.PrefetchScalarGridSpec(
            num_scalar_prefetch=0,
            grid=(nb,),
            in_specs=in_specs,
            out_specs=out_spec,
        ),
        compiler_params=pltpu.CompilerParams(dimension_semantics=("parallel",)),
    )(x_r, pos_r, bias_r, *weights)

    # critic value = returns-to-go prediction at the last student state token
    return out.reshape(b_pad)[:batch]


# --------------------------------- main ---------------------------------------
if __name__ == "__main__":
    key = jax.random.PRNGKey(0)
    kp, ko = jax.random.split(key)
    params = init_params(kp)

    B = 2
    k1, k2 = jax.random.split(ko)
    obs = {
        'observation': jax.random.normal(k1, (B, STATE_DIMS), jnp.float32),
        'teacher_frames': jax.random.normal(k2, (B, T_TEACHER, TEACHER_DIMS), jnp.float32),
        'teacher_attn_mask': (jnp.arange(T_TEACHER)[None, :]
                              < jnp.array([6, 8])[:, None]),
        'teacher_time_steps': jnp.tile(jnp.arange(T_TEACHER, dtype=jnp.int32)[None], (B, 1)),
        'step': jnp.array([3, 7], dtype=jnp.int32),
    }

    tt, frames, tmask, smask, tts, sts = format_obs(obs)
    x_full, pos_full, key_mask = build_inputs(tt, frames, tmask, smask, tts, sts, params)

    value = pallas_critic(x_full, pos_full, key_mask, params)
    value = jax.block_until_ready(value)

    assert value.shape == (B,)
    assert bool(jnp.all(jnp.isfinite(value)))
    print("KERNEL_OK")
</pallas_src>

<mosaic_0001>
module attributes {stable_mosaic.version = 11 : i64} {
  func.func @critic_kernel(%arg0: i32, %arg1: memref<1x36x15xf32, #tpu.memory_space<vmem>>, %arg2: memref<1x36x32xf32, #tpu.memory_space<vmem>>, %arg3: memref<1x2x18x18xf32, #tpu.memory_space<vmem>>, %arg4: memref<15x32xf32, #tpu.memory_space<vmem>>, %arg5: memref<1x32xf32, #tpu.memory_space<vmem>>, %arg6: memref<1x32xf32, #tpu.memory_space<vmem>>, %arg7: memref<36x32xf32, #tpu.memory_space<vmem>>, %arg8: memref<2x1x32xf32, #tpu.memory_space<vmem>>, %arg9: memref<2x1x32xf32, #tpu.memory_space<vmem>>, %arg10: memref<2x32x96xf32, #tpu.memory_space<vmem>>, %arg11: memref<2x1x96xf32, #tpu.memory_space<vmem>>, %arg12: memref<2x32x32xf32, #tpu.memory_space<vmem>>, %arg13: memref<2x1x32xf32, #tpu.memory_space<vmem>>, %arg14: memref<2x1x32xf32, #tpu.memory_space<vmem>>, %arg15: memref<2x1x32xf32, #tpu.memory_space<vmem>>, %arg16: memref<2x32x128xf32, #tpu.memory_space<vmem>>, %arg17: memref<2x1x128xf32, #tpu.memory_space<vmem>>, %arg18: memref<2x128x32xf32, #tpu.memory_space<vmem>>, %arg19: memref<2x1x32xf32, #tpu.memory_space<vmem>>, %arg20: memref<1x32xf32, #tpu.memory_space<vmem>>, %arg21: memref<1x32xf32, #tpu.memory_space<vmem>>, %arg22: memref<32x1xf32, #tpu.memory_space<vmem>>, %arg23: memref<1x1xf32, #tpu.memory_space<vmem>>, %arg24: memref<1x2x1xf32, #tpu.memory_space<vmem>>) attributes {dimension_semantics = [#tpu.dimension_semantics<parallel>], iteration_bounds = array<i64: 1>, scalar_prefetch = 0 : i64, scratch_operands = 0 : i64, tpu.core_type = #tpu.core_type<tc>, window_params = [{transform_indices = @transform_0, window_bounds = array<i64: 1, 36, 15>}, {transform_indices = @transform_1, window_bounds = array<i64: 1, 36, 32>}, {transform_indices = @transform_2, window_bounds = array<i64: 1, 2, 18, 18>}, {pipeline_mode = #tpu.pipeline_mode<synchronous>, transform_indices = @transform_3, window_bounds = array<i64: 15, 32>}, {pipeline_mode = #tpu.pipeline_mode<synchronous>, transform_indices = @transform_4, window_bounds = array<i64: 1, 32>}, {pipeline_mode = #tpu.pipeline_mode<synchronous>, transform_indices = @transform_5, window_bounds = array<i64: 1, 32>}, {pipeline_mode = #tpu.pipeline_mode<synchronous>, transform_indices = @transform_6, window_bounds = array<i64: 36, 32>}, {pipeline_mode = #tpu.pipeline_mode<synchronous>, transform_indices = @transform_7, window_bounds = array<i64: 2, 1, 32>}, {pipeline_mode = #tpu.pipeline_mode<synchronous>, transform_indices = @transform_8, window_bounds = array<i64: 2, 1, 32>}, {pipeline_mode = #tpu.pipeline_mode<synchronous>, transform_indices = @transform_9, window_bounds = array<i64: 2, 32, 96>}, {pipeline_mode = #tpu.pipeline_mode<synchronous>, transform_indices = @transform_10, window_bounds = array<i64: 2, 1, 96>}, {pipeline_mode = #tpu.pipeline_mode<synchronous>, transform_indices = @transform_11, window_bounds = array<i64: 2, 32, 32>}, {pipeline_mode = #tpu.pipeline_mode<synchronous>, transform_indices = @transform_12, window_bounds = array<i64: 2, 1, 32>}, {pipeline_mode = #tpu.pipeline_mode<synchronous>, transform_indices = @transform_13, window_bounds = array<i64: 2, 1, 32>}, {pipeline_mode = #tpu.pipeline_mode<synchronous>, transform_indices = @transform_14, window_bounds = array<i64: 2, 1, 32>}, {pipeline_mode = #tpu.pipeline_mode<synchronous>, transform_indices = @transform_15, window_bounds = array<i64: 2, 32, 128>}, {pipeline_mode = #tpu.pipeline_mode<synchronous>, transform_indices = @transform_16, window_bounds = array<i64: 2, 1, 128>}, {pipeline_mode = #tpu.pipeline_mode<synchronous>, transform_indices = @transform_17, window_bounds = array<i64: 2, 128, 32>}, {pipeline_mode = #tpu.pipeline_mode<synchronous>, transform_indices = @transform_18, window_bounds = array<i64: 2, 1, 32>}, {pipeline_mode = #tpu.pipeline_mode<synchronous>, transform_indices = @transform_19, window_bounds = array<i64: 1, 32>}, {pipeline_mode = #tpu.pipeline_mode<synchronous>, transform_indices = @transform_20, window_bounds = array<i64: 1, 32>}, {pipeline_mode = #tpu.pipeline_mode<synchronous>, transform_indices = @transform_21, window_bounds = array<i64: 32, 1>}, {pipeline_mode = #tpu.pipeline_mode<synchronous>, transform_indices = @transform_22, window_bounds = array<i64: 1, 1>}, {transform_indices = @transform_23, window_bounds = array<i64: 1, 2, 1>}]} {
    %c0 = arith.constant 0 : index
    %c0_0 = arith.constant 0 : index
    %c0_1 = arith.constant 0 : index
    %0 = vector.load %arg1[%c0, %c0_0, %c0_1] : memref<1x36x15xf32, #tpu.memory_space<vmem>>, vector<1x36x15xf32>
    %1 = vector.shape_cast %0 : vector<1x36x15xf32> to vector<36x15xf32>
    %c0_2 = arith.constant 0 : index
    %c0_3 = arith.constant 0 : index
    %2 = vector.load %arg4[%c0_2, %c0_3] : memref<15x32xf32, #tpu.memory_space<vmem>>, vector<15x32xf32>
    %cst = arith.constant dense<0.000000e+00> : vector<36x32xf32>
    %3 = tpu.matmul %1, %2, %cst {dimension_numbers = #tpu.dot_dimension_numbers<[1], [0], [0], [1], [0, 0, 1, 1], [], []>} : vector<36x15xf32>, vector<15x32xf32>, vector<36x32xf32> -> vector<36x32xf32>
    %c0_4 = arith.constant 0 : index
    %c0_5 = arith.constant 0 : index
    %c0_6 = arith.constant 0 : index
    %4 = vector.load %arg2[%c0_4, %c0_5, %c0_6] : memref<1x36x32xf32, #tpu.memory_space<vmem>>, vector<1x36x32xf32>
    %5 = vector.shape_cast %4 : vector<1x36x32xf32> to vector<36x32xf32>
    %6 = arith.addf %3, %5 : vector<36x32xf32>
    %c0_7 = arith.constant 0 : index
    %c0_8 = arith.constant 0 : index
    %7 = vector.load %arg5[%c0_7, %c0_8] : memref<1x32xf32, #tpu.memory_space<vmem>>, vector<1x32xf32>
    %c0_9 = arith.constant 0 : index
    %c0_10 = arith.constant 0 : index
    %8 = vector.load %arg6[%c0_9, %c0_10] : memref<1x32xf32, #tpu.memory_space<vmem>>, vector<1x32xf32>
    %cst_11 = arith.constant dense<0.000000e+00> : vector<36xf32>
    %9 = vector.multi_reduction <add>, %6, %cst_11 [1] : vector<36x32xf32> to vector<36xf32>
    %10 = vector.shape_cast %9 : vector<36xf32> to vector<36x1xf32>
    %cst_12 = arith.constant 3.200000e+01 : f32
    %11 = vector.broadcast %cst_12 : f32 to vector<36x1xf32>
    %12 = arith.divf %10, %11 : vector<36x1xf32>
    %13 = vector.broadcast %12 : vector<36x1xf32> to vector<36x32xf32>
    %14 = arith.subf %6, %13 : vector<36x32xf32>
    %15 = arith.mulf %14, %14 : vector<36x32xf32>
    %cst_13 = arith.constant dense<0.000000e+00> : vector<36xf32>
    %16 = vector.multi_reduction <add>, %15, %cst_13 [1] : vector<36x32xf32> to vector<36xf32>
    %17 = vector.shape_cast %16 : vector<36xf32> to vector<36x1xf32>
    %cst_14 = arith.constant 3.200000e+01 : f32
    %18 = vector.broadcast %cst_14 : f32 to vector<36x1xf32>
    %19 = arith.divf %17, %18 : vector<36x1xf32>
    %20 = vector.broadcast %12 : vector<36x1xf32> to vector<36x32xf32>
    %21 = arith.subf %6, %20 : vector<36x32xf32>
    %cst_15 = arith.constant 9.99999974E-6 : f32
    %22 = vector.broadcast %cst_15 : f32 to vector<36x1xf32>
    %23 = arith.addf %19, %22 : vector<36x1xf32>
    %24 = math.rsqrt %23 : vector<36x1xf32>
    %25 = vector.broadcast %24 : vector<36x1xf32> to vector<36x32xf32>
    %26 = arith.mulf %21, %25 : vector<36x32xf32>
    %27 = vector.broadcast %7 : vector<1x32xf32> to vector<36x32xf32>
    %28 = arith.mulf %26, %27 : vector<36x32xf32>
    %29 = vector.broadcast %8 : vector<1x32xf32> to vector<36x32xf32>
    %30 = arith.addf %28, %29 : vector<36x32xf32>
    %c0_16 = arith.constant 0 : index
    %c0_17 = arith.constant 0 : index
    %31 = vector.load %arg7[%c0_16, %c0_17] : memref<36x32xf32, #tpu.memory_space<vmem>>, vector<36x32xf32>
    %32 = arith.addf %30, %31 : vector<36x32xf32>
    %c0_18 = arith.constant 0 : index
    %c0_19 = arith.constant 0 : index
    %c0_20 = arith.constant 0 : index
    %c0_21 = arith.constant 0 : index
    %33 = vector.load %arg3[%c0_18, %c0_19, %c0_20, %c0_21] : memref<1x2x18x18xf32, #tpu.memory_space<vmem>>, vector<1x2x18x18xf32>
    %34 = vector.shape_cast %33 : vector<1x2x18x18xf32> to vector<2x18x18xf32>
    %c0_22 = arith.constant 0 : index
    %c0_23 = arith.constant 0 : index
    %c0_24 = arith.constant 0 : index
    %35 = vector.load %arg8[%c0_22, %c0_23, %c0_24] : memref<2x1x32xf32, #tpu.memory_space<vmem>>, vector<1x1x32xf32>
    %36 = vector.shape_cast %35 : vector<1x1x32xf32> to vector<1x32xf32>
    %c0_25 = arith.constant 0 : index
    %c0_26 = arith.constant 0 : index
    %c0_27 = arith.constant 0 : index
    %37 = vector.load %arg9[%c0_25, %c0_26, %c0_27] : memref<2x1x32xf32, #tpu.memory_space<vmem>>, vector<1x1x32xf32>
    %38 = vector.shape_cast %37 : vector<1x1x32xf32> to vector<1x32xf32>
    %cst_28 = arith.constant dense<0.000000e+00> : vector<36xf32>
    %39 = vector.multi_reduction <add>, %32, %cst_28 [1] : vector<36x32xf32> to vector<36xf32>
    %40 = vector.shape_cast %39 : vector<36xf32> to vector<36x1xf32>
    %cst_29 = arith.constant 3.200000e+01 : f32
    %41 = vector.broadcast %cst_29 : f32 to vector<36x1xf32>
    %42 = arith.divf %40, %41 : vector<36x1xf32>
    %43 = vector.broadcast %42 : vector<36x1xf32> to vector<36x32xf32>
    %44 = arith.subf %32, %43 : vector<36x32xf32>
    %45 = arith.mulf %44, %44 : vector<36x32xf32>
    %cst_30 = arith.constant dense<0.000000e+00> : vector<36xf32>
    %46 = vector.multi_reduction <add>, %45, %cst_30 [1] : vector<36x32xf32> to vector<36xf32>
    %47 = vector.shape_cast %46 : vector<36xf32> to vector<36x1xf32>
    %cst_31 = arith.constant 3.200000e+01 : f32
    %48 = vector.broadcast %cst_31 : f32 to vector<36x1xf32>
    %49 = arith.divf %47, %48 : vector<36x1xf32>
    %50 = vector.broadcast %42 : vector<36x1xf32> to vector<36x32xf32>
    %51 = arith.subf %32, %50 : vector<36x32xf32>
    %cst_32 = arith.constant 9.99999974E-6 : f32
    %52 = vector.broadcast %cst_32 : f32 to vector<36x1xf32>
    %53 = arith.addf %49, %52 : vector<36x1xf32>
    %54 = math.rsqrt %53 : vector<36x1xf32>
    %55 = vector.broadcast %54 : vector<36x1xf32> to vector<36x32xf32>
    %56 = arith.mulf %51, %55 : vector<36x32xf32>
    %57 = vector.broadcast %36 : vector<1x32xf32> to vector<36x32xf32>
    %58 = arith.mulf %56, %57 : vector<36x32xf32>
    %59 = vector.broadcast %38 : vector<1x32xf32> to vector<36x32xf32>
    %60 = arith.addf %58, %59 : vector<36x32xf32>
    %c0_33 = arith.constant 0 : index
    %c0_34 = arith.constant 0 : index
    %c0_35 = arith.constant 0 : index
    %61 = vector.load %arg10[%c0_33, %c0_34, %c0_35] : memref<2x32x96xf32, #tpu.memory_space<vmem>>, vector<1x32x96xf32>
    %62 = vector.shape_cast %61 : vector<1x32x96xf32> to vector<32x96xf32>
    %cst_36 = arith.constant dense<0.000000e+00> : vector<36x96xf32>
    %63 = tpu.matmul %60, %62, %cst_36 {dimension_numbers = #tpu.dot_dimension_numbers<[1], [0], [0], [1], [0, 0, 1, 1], [], []>} : vector<36x32xf32>, vector<32x96xf32>, vector<36x96xf32> -> vector<36x96xf32>
    %c0_37 = arith.constant 0 : index
    %c0_38 = arith.constant 0 : index
    %c0_39 = arith.constant 0 : index
    %64 = vector.load %arg11[%c0_37, %c0_38, %c0_39] : memref<2x1x96xf32, #tpu.memory_space<vmem>>, vector<1x1x96xf32>
    %65 = vector.shape_cast %64 : vector<1x1x96xf32> to vector<1x96xf32>
    %66 = vector.broadcast %65 : vector<1x96xf32> to vector<36x96xf32>
    %67 = arith.addf %63, %66 : vector<36x96xf32>
    %68 = vector.shape_cast %67 : vector<36x96xf32> to vector<2x18x96xf32>
    %69 = vector.extract_strided_slice %68 {offsets = [0, 0, 0], sizes = [2, 18, 16], strides = [1, 1, 1]} : vector<2x18x96xf32> to vector<2x18x16xf32>
    %70 = vector.extract_strided_slice %68 {offsets = [0, 0, 32], sizes = [2, 18, 16], strides = [1, 1, 1]} : vector<2x18x96xf32> to vector<2x18x16xf32>
    %71 = vector.extract_strided_slice %68 {offsets = [0, 0, 64], sizes = [2, 18, 16], strides = [1, 1, 1]} : vector<2x18x96xf32> to vector<2x18x16xf32>
    "tpu.trace_start"() <{level = 10 : i32, message = "bqd,bkd->bqk"}> : () -> ()
    %cst_40 = arith.constant dense<0.000000e+00> : vector<2x18x18xf32>
    %72 = tpu.matmul %69, %70, %cst_40 {dimension_numbers = #tpu.dot_dimension_numbers<[2], [2], [1], [1], [0, 0, 0, 1, 1, 1], [0], [0]>} : vector<2x18x16xf32>, vector<2x18x16xf32>, vector<2x18x18xf32> -> vector<2x18x18xf32>
    "tpu.trace_stop"() : () -> ()
    %73 = arith.addf %72, %34 : vector<2x18x18xf32>
    %cst_41 = arith.constant dense<0xFF800000> : vector<2x18xf32>
    %74 = vector.multi_reduction <maximumf>, %73, %cst_41 [2] : vector<2x18x18xf32> to vector<2x18xf32>
    %75 = vector.shape_cast %74 : vector<2x18xf32> to vector<2x18x1xf32>
    %76 = vector.broadcast %75 : vector<2x18x1xf32> to vector<2x18x18xf32>
    %77 = arith.subf %73, %76 : vector<2x18x18xf32>
    %78 = math.exp %77 : vector<2x18x18xf32>
    %cst_42 = arith.constant dense<0.000000e+00> : vector<2x18xf32>
    %79 = vector.multi_reduction <add>, %78, %cst_42 [2] : vector<2x18x18xf32> to vector<2x18xf32>
    %80 = vector.shape_cast %79 : vector<2x18xf32> to vector<2x18x1xf32>
    %81 = tpu.reciprocal %80 {approx = true} : vector<2x18x1xf32> -> vector<2x18x1xf32>
    %82 = vector.broadcast %81 : vector<2x18x1xf32> to vector<2x18x18xf32>
    %83 = arith.mulf %78, %82 : vector<2x18x18xf32>
    "tpu.trace_start"() <{level = 10 : i32, message = "bqk,bkd->bqd"}> : () -> ()
    %cst_43 = arith.constant dense<0.000000e+00> : vector<2x18x16xf32>
    %84 = tpu.matmul %83, %71, %cst_43 {dimension_numbers = #tpu.dot_dimension_numbers<[2], [1], [1], [2], [0, 0, 0, 1, 1, 2], [0], [0]>} : vector<2x18x18xf32>, vector<2x18x16xf32>, vector<2x18x16xf32> -> vector<2x18x16xf32>
    "tpu.trace_stop"() : () -> ()
    %85 = vector.extract_strided_slice %68 {offsets = [0, 0, 16], sizes = [2, 18, 16], strides = [1, 1, 1]} : vector<2x18x96xf32> to vector<2x18x16xf32>
    %86 = vector.extract_strided_slice %68 {offsets = [0, 0, 48], sizes = [2, 18, 16], strides = [1, 1, 1]} : vector<2x18x96xf32> to vector<2x18x16xf32>
    %87 = vector.extract_strided_slice %68 {offsets = [0, 0, 80], sizes = [2, 18, 16], strides = [1, 1, 1]} : vector<2x18x96xf32> to vector<2x18x16xf32>
    "tpu.trace_start"() <{level = 10 : i32, message = "bqd,bkd->bqk"}> : () -> ()
    %cst_44 = arith.constant dense<0.000000e+00> : vector<2x18x18xf32>
    %88 = tpu.matmul %85, %86, %cst_44 {dimension_numbers = #tpu.dot_dimension_numbers<[2], [2], [1], [1], [0, 0, 0, 1, 1, 1], [0], [0]>} : vector<2x18x16xf32>, vector<2x18x16xf32>, vector<2x18x18xf32> -> vector<2x18x18xf32>
    "tpu.trace_stop"() : () -> ()
    %89 = arith.addf %88, %34 : vector<2x18x18xf32>
    %cst_45 = arith.constant dense<0xFF800000> : vector<2x18xf32>
    %90 = vector.multi_reduction <maximumf>, %89, %cst_45 [2] : vector<2x18x18xf32> to vector<2x18xf32>
    %91 = vector.shape_cast %90 : vector<2x18xf32> to vector<2x18x1xf32>
    %92 = vector.broadcast %91 : vector<2x18x1xf32> to vector<2x18x18xf32>
    %93 = arith.subf %89, %92 : vector<2x18x18xf32>
    %94 = math.exp %93 : vector<2x18x18xf32>
    %cst_46 = arith.constant dense<0.000000e+00> : vector<2x18xf32>
    %95 = vector.multi_reduction <add>, %94, %cst_46 [2] : vector<2x18x18xf32> to vector<2x18xf32>
    %96 = vector.shape_cast %95 : vector<2x18xf32> to vector<2x18x1xf32>
    %97 = tpu.reciprocal %96 {approx = true} : vector<2x18x1xf32> -> vector<2x18x1xf32>
    %98 = vector.broadcast %97 : vector<2x18x1xf32> to vector<2x18x18xf32>
    %99 = arith.mulf %94, %98 : vector<2x18x18xf32>
    "tpu.trace_start"() <{level = 10 : i32, message = "bqk,bkd->bqd"}> : () -> ()
    %cst_47 = arith.constant dense<0.000000e+00> : vector<2x18x16xf32>
    %100 = tpu.matmul %99, %87, %cst_47 {dimension_numbers = #tpu.dot_dimension_numbers<[2], [1], [1], [2], [0, 0, 0, 1, 1, 2], [0], [0]>} : vector<2x18x18xf32>, vector<2x18x16xf32>, vector<2x18x16xf32> -> vector<2x18x16xf32>
    "tpu.trace_stop"() : () -> ()
    %101 = tpu.concatenate %84, %100 in 2 : vector<2x18x16xf32>, vector<2x18x16xf32> -> vector<2x18x32xf32>
    %102 = vector.shape_cast %101 : vector<2x18x32xf32> to vector<36x32xf32>
    %c0_48 = arith.constant 0 : index
    %c0_49 = arith.constant 0 : index
    %c0_50 = arith.constant 0 : index
    %103 = vector.load %arg12[%c0_48, %c0_49, %c0_50] : memref<2x32x32xf32, #tpu.memory_space<vmem>>, vector<1x32x32xf32>
    %104 = vector.shape_cast %103 : vector<1x32x32xf32> to vector<32x32xf32>
    %cst_51 = arith.constant dense<0.000000e+00> : vector<36x32xf32>
    %105 = tpu.matmul %102, %104, %cst_51 {dimension_numbers = #tpu.dot_dimension_numbers<[1], [0], [0], [1], [0, 0, 1, 1], [], []>} : vector<36x32xf32>, vector<32x32xf32>, vector<36x32xf32> -> vector<36x32xf32>
    %106 = arith.addf %32, %105 : vector<36x32xf32>
    %c0_52 = arith.constant 0 : index
    %c0_53 = arith.constant 0 : index
    %c0_54 = arith.constant 0 : index
    %107 = vector.load %arg13[%c0_52, %c0_53, %c0_54] : memref<2x1x32xf32, #tpu.memory_space<vmem>>, vector<1x1x32xf32>
    %108 = vector.shape_cast %107 : vector<1x1x32xf32> to vector<1x32xf32>
    %109 = vector.broadcast %108 : vector<1x32xf32> to vector<36x32xf32>
    %110 = arith.addf %106, %109 : vector<36x32xf32>
    %c0_55 = arith.constant 0 : index
    %c0_56 = arith.constant 0 : index
    %c0_57 = arith.constant 0 : index
    %111 = vector.load %arg14[%c0_55, %c0_56, %c0_57] : memref<2x1x32xf32, #tpu.memory_space<vmem>>, vector<1x1x32xf32>
    %112 = vector.shape_cast %111 : vector<1x1x32xf32> to vector<1x32xf32>
    %c0_58 = arith.constant 0 : index
    %c0_59 = arith.constant 0 : index
    %c0_60 = arith.constant 0 : index
    %113 = vector.load %arg15[%c0_58, %c0_59, %c0_60] : memref<2x1x32xf32, #tpu.memory_space<vmem>>, vector<1x1x32xf32>
    %114 = vector.shape_cast %113 : vector<1x1x32xf32> to vector<1x32xf32>
    %cst_61 = arith.constant dense<0.000000e+00> : vector<36xf32>
    %115 = vector.multi_reduction <add>, %110, %cst_61 [1] : vector<36x32xf32> to vector<36xf32>
    %116 = vector.shape_cast %115 : vector<36xf32> to vector<36x1xf32>
    %cst_62 = arith.constant 3.200000e+01 : f32
    %117 = vector.broadcast %cst_62 : f32 to vector<36x1xf32>
    %118 = arith.divf %116, %117 : vector<36x1xf32>
    %119 = vector.broadcast %118 : vector<36x1xf32> to vector<36x32xf32>
    %120 = arith.subf %110, %119 : vector<36x32xf32>
    %121 = arith.mulf %120, %120 : vector<36x32xf32>
    %cst_63 = arith.constant dense<0.000000e+00> : vector<36xf32>
    %122 = vector.multi_reduction <add>, %121, %cst_63 [1] : vector<36x32xf32> to vector<36xf32>
    %123 = vector.shape_cast %122 : vector<36xf32> to vector<36x1xf32>
    %cst_64 = arith.constant 3.200000e+01 : f32
    %124 = vector.broadcast %cst_64 : f32 to vector<36x1xf32>
    %125 = arith.divf %123, %124 : vector<36x1xf32>
    %126 = vector.broadcast %118 : vector<36x1xf32> to vector<36x32xf32>
    %127 = arith.subf %110, %126 : vector<36x32xf32>
    %cst_65 = arith.constant 9.99999974E-6 : f32
    %128 = vector.broadcast %cst_65 : f32 to vector<36x1xf32>
    %129 = arith.addf %125, %128 : vector<36x1xf32>
    %130 = math.rsqrt %129 : vector<36x1xf32>
    %131 = vector.broadcast %130 : vector<36x1xf32> to vector<36x32xf32>
    %132 = arith.mulf %127, %131 : vector<36x32xf32>
    %133 = vector.broadcast %112 : vector<1x32xf32> to vector<36x32xf32>
    %134 = arith.mulf %132, %133 : vector<36x32xf32>
    %135 = vector.broadcast %114 : vector<1x32xf32> to vector<36x32xf32>
    %136 = arith.addf %134, %135 : vector<36x32xf32>
    %c0_66 = arith.constant 0 : index
    %c0_67 = arith.constant 0 : index
    %c0_68 = arith.constant 0 : index
    %137 = vector.load %arg16[%c0_66, %c0_67, %c0_68] : memref<2x32x128xf32, #tpu.memory_space<vmem>>, vector<1x32x128xf32>
    %138 = vector.shape_cast %137 : vector<1x32x128xf32> to vector<32x128xf32>
    %cst_69 = arith.constant dense<0.000000e+00> : vector<36x128xf32>
    %139 = tpu.matmul %136, %138, %cst_69 {dimension_numbers = #tpu.dot_dimension_numbers<[1], [0], [0], [1], [0, 0, 1, 1], [], []>} : vector<36x32xf32>, vector<32x128xf32>, vector<36x128xf32> -> vector<36x128xf32>
    %c0_70 = arith.constant 0 : index
    %c0_71 = arith.constant 0 : index
    %c0_72 = arith.constant 0 : index
    %140 = vector.load %arg17[%c0_70, %c0_71, %c0_72] : memref<2x1x128xf32, #tpu.memory_space<vmem>>, vector<1x1x128xf32>
    %141 = vector.shape_cast %140 : vector<1x1x128xf32> to vector<1x128xf32>
    %142 = vector.broadcast %141 : vector<1x128xf32> to vector<36x128xf32>
    %143 = arith.addf %139, %142 : vector<36x128xf32>
    %cst_73 = arith.constant 5.000000e-01 : f32
    %144 = vector.broadcast %cst_73 : f32 to vector<36x128xf32>
    %145 = arith.mulf %144, %143 : vector<36x128xf32>
    %cst_74 = arith.constant 4.471500e-02 : f32
    %146 = vector.broadcast %cst_74 : f32 to vector<36x128xf32>
    %147 = arith.mulf %146, %143 : vector<36x128xf32>
    %148 = arith.mulf %147, %143 : vector<36x128xf32>
    %149 = arith.mulf %148, %143 : vector<36x128xf32>
    %150 = arith.addf %143, %149 : vector<36x128xf32>
    %cst_75 = arith.constant 0.797884583 : f32
    %151 = vector.broadcast %cst_75 : f32 to vector<36x128xf32>
    %152 = arith.mulf %151, %150 : vector<36x128xf32>
    %153 = math.tanh %152 : vector<36x128xf32>
    %cst_76 = arith.constant 1.000000e+00 : f32
    %154 = vector.broadcast %cst_76 : f32 to vector<36x128xf32>
    %155 = arith.addf %154, %153 : vector<36x128xf32>
    %156 = arith.mulf %145, %155 : vector<36x128xf32>
    %c0_77 = arith.constant 0 : index
    %c0_78 = arith.constant 0 : index
    %c0_79 = arith.constant 0 : index
    %157 = vector.load %arg18[%c0_77, %c0_78, %c0_79] : memref<2x128x32xf32, #tpu.memory_space<vmem>>, vector<1x128x32xf32>
    %158 = vector.shape_cast %157 : vector<1x128x32xf32> to vector<128x32xf32>
    %cst_80 = arith.constant dense<0.000000e+00> : vector<36x32xf32>
    %159 = tpu.matmul %156, %158, %cst_80 {dimension_numbers = #tpu.dot_dimension_numbers<[1], [0], [0], [1], [0, 0, 1, 1], [], []>} : vector<36x128xf32>, vector<128x32xf32>, vector<36x32xf32> -> vector<36x32xf32>
    %160 = arith.addf %110, %159 : vector<36x32xf32>
    %c0_81 = arith.constant 0 : index
    %c0_82 = arith.constant 0 : index
    %c0_83 = arith.constant 0 : index
    %161 = vector.load %arg19[%c0_81, %c0_82, %c0_83] : memref<2x1x32xf32, #tpu.memory_space<vmem>>, vector<1x1x32xf32>
    %162 = vector.shape_cast %161 : vector<1x1x32xf32> to vector<1x32xf32>
    %163 = vector.broadcast %162 : vector<1x32xf32> to vector<36x32xf32>
    %164 = arith.addf %160, %163 : vector<36x32xf32>
    %c1 = arith.constant 1 : index
    %c0_84 = arith.constant 0 : index
    %c0_85 = arith.constant 0 : index
    %165 = vector.load %arg8[%c1, %c0_84, %c0_85] : memref<2x1x32xf32, #tpu.memory_space<vmem>>, vector<1x1x32xf32>
    %166 = vector.shape_cast %165 : vector<1x1x32xf32> to vector<1x32xf32>
    %c1_86 = arith.constant 1 : index
    %c0_87 = arith.constant 0 : index
    %c0_88 = arith.constant 0 : index
    %167 = vector.load %arg9[%c1_86, %c0_87, %c0_88] : memref<2x1x32xf32, #tpu.memory_space<vmem>>, vector<1x1x32xf32>
    %168 = vector.shape_cast %167 : vector<1x1x32xf32> to vector<1x32xf32>
    %cst_89 = arith.constant dense<0.000000e+00> : vector<36xf32>
    %169 = vector.multi_reduction <add>, %164, %cst_89 [1] : vector<36x32xf32> to vector<36xf32>
    %170 = vector.shape_cast %169 : vector<36xf32> to vector<36x1xf32>
    %cst_90 = arith.constant 3.200000e+01 : f32
    %171 = vector.broadcast %cst_90 : f32 to vector<36x1xf32>
    %172 = arith.divf %170, %171 : vector<36x1xf32>
    %173 = vector.broadcast %172 : vector<36x1xf32> to vector<36x32xf32>
    %174 = arith.subf %164, %173 : vector<36x32xf32>
    %175 = arith.mulf %174, %174 : vector<36x32xf32>
    %cst_91 = arith.constant dense<0.000000e+00> : vector<36xf32>
    %176 = vector.multi_reduction <add>, %175, %cst_91 [1] : vector<36x32xf32> to vector<36xf32>
    %177 = vector.shape_cast %176 : vector<36xf32> to vector<36x1xf32>
    %cst_92 = arith.constant 3.200000e+01 : f32
    %178 = vector.broadcast %cst_92 : f32 to vector<36x1xf32>
    %179 = arith.divf %177, %178 : vector<36x1xf32>
    %180 = vector.broadcast %172 : vector<36x1xf32> to vector<36x32xf32>
    %181 = arith.subf %164, %180 : vector<36x32xf32>
    %cst_93 = arith.constant 9.99999974E-6 : f32
    %182 = vector.broadcast %cst_93 : f32 to vector<36x1xf32>
    %183 = arith.addf %179, %182 : vector<36x1xf32>
    %184 = math.rsqrt %183 : vector<36x1xf32>
    %185 = vector.broadcast %184 : vector<36x1xf32> to vector<36x32xf32>
    %186 = arith.mulf %181, %185 : vector<36x32xf32>
    %187 = vector.broadcast %166 : vector<1x32xf32> to vector<36x32xf32>
    %188 = arith.mulf %186, %187 : vector<36x32xf32>
    %189 = vector.broadcast %168 : vector<1x32xf32> to vector<36x32xf32>
    %190 = arith.addf %188, %189 : vector<36x32xf32>
    %c1_94 = arith.constant 1 : index
    %c0_95 = arith.constant 0 : index
    %c0_96 = arith.constant 0 : index
    %191 = vector.load %arg10[%c1_94, %c0_95, %c0_96] : memref<2x32x96xf32, #tpu.memory_space<vmem>>, vector<1x32x96xf32>
    %192 = vector.shape_cast %191 : vector<1x32x96xf32> to vector<32x96xf32>
    %cst_97 = arith.constant dense<0.000000e+00> : vector<36x96xf32>
    %193 = tpu.matmul %190, %192, %cst_97 {dimension_numbers = #tpu.dot_dimension_numbers<[1], [0], [0], [1], [0, 0, 1, 1], [], []>} : vector<36x32xf32>, vector<32x96xf32>, vector<36x96xf32> -> vector<36x96xf32>
    %c1_98 = arith.constant 1 : index
    %c0_99 = arith.constant 0 : index
    %c0_100 = arith.constant 0 : index
    %194 = vector.load %arg11[%c1_98, %c0_99, %c0_100] : memref<2x1x96xf32, #tpu.memory_space<vmem>>, vector<1x1x96xf32>
    %195 = vector.shape_cast %194 : vector<1x1x96xf32> to vector<1x96xf32>
    %196 = vector.broadcast %195 : vector<1x96xf32> to vector<36x96xf32>
    %197 = arith.addf %193, %196 : vector<36x96xf32>
    %198 = vector.shape_cast %197 : vector<36x96xf32> to vector<2x18x96xf32>
    %199 = vector.extract_strided_slice %198 {offsets = [0, 0, 0], sizes = [2, 18, 16], strides = [1, 1, 1]} : vector<2x18x96xf32> to vector<2x18x16xf32>
    %200 = vector.extract_strided_slice %198 {offsets = [0, 0, 32], sizes = [2, 18, 16], strides = [1, 1, 1]} : vector<2x18x96xf32> to vector<2x18x16xf32>
    %201 = vector.extract_strided_slice %198 {offsets = [0, 0, 64], sizes = [2, 18, 16], strides = [1, 1, 1]} : vector<2x18x96xf32> to vector<2x18x16xf32>
    "tpu.trace_start"() <{level = 10 : i32, message = "bqd,bkd->bqk"}> : () -> ()
    %cst_101 = arith.constant dense<0.000000e+00> : vector<2x18x18xf32>
    %202 = tpu.matmul %199, %200, %cst_101 {dimension_numbers = #tpu.dot_dimension_numbers<[2], [2], [1], [1], [0, 0, 0, 1, 1, 1], [0], [0]>} : vector<2x18x16xf32>, vector<2x18x16xf32>, vector<2x18x18xf32> -> vector<2x18x18xf32>
    "tpu.trace_stop"() : () -> ()
    %203 = arith.addf %202, %34 : vector<2x18x18xf32>
    %cst_102 = arith.constant dense<0xFF800000> : vector<2x18xf32>
    %204 = vector.multi_reduction <maximumf>, %203, %cst_102 [2] : vector<2x18x18xf32> to vector<2x18xf32>
    %205 = vector.shape_cast %204 : vector<2x18xf32> to vector<2x18x1xf32>
    %206 = vector.broadcast %205 : vector<2x18x1xf32> to vector<2x18x18xf32>
    %207 = arith.subf %203, %206 : vector<2x18x18xf32>
    %208 = math.exp %207 : vector<2x18x18xf32>
    %cst_103 = arith.constant dense<0.000000e+00> : vector<2x18xf32>
    %209 = vector.multi_reduction <add>, %208, %cst_103 [2] : vector<2x18x18xf32> to vector<2x18xf32>
    %210 = vector.shape_cast %209 : vector<2x18xf32> to vector<2x18x1xf32>
    %211 = tpu.reciprocal %210 {approx = true} : vector<2x18x1xf32> -> vector<2x18x1xf32>
    %212 = vector.broadcast %211 : vector<2x18x1xf32> to vector<2x18x18xf32>
    %213 = arith.mulf %208, %212 : vector<2x18x18xf32>
    "tpu.trace_start"() <{level = 10 : i32, message = "bqk,bkd->bqd"}> : () -> ()
    %cst_104 = arith.constant dense<0.000000e+00> : vector<2x18x16xf32>
    %214 = tpu.matmul %213, %201, %cst_104 {dimension_numbers = #tpu.dot_dimension_numbers<[2], [1], [1], [2], [0, 0, 0, 1, 1, 2], [0], [0]>} : vector<2x18x18xf32>, vector<2x18x16xf32>, vector<2x18x16xf32> -> vector<2x18x16xf32>
    "tpu.trace_stop"() : () -> ()
    %215 = vector.extract_strided_slice %198 {offsets = [0, 0, 16], sizes = [2, 18, 16], strides = [1, 1, 1]} : vector<2x18x96xf32> to vector<2x18x16xf32>
    %216 = vector.extract_strided_slice %198 {offsets = [0, 0, 48], sizes = [2, 18, 16], strides = [1, 1, 1]} : vector<2x18x96xf32> to vector<2x18x16xf32>
    %217 = vector.extract_strided_slice %198 {offsets = [0, 0, 80], sizes = [2, 18, 16], strides = [1, 1, 1]} : vector<2x18x96xf32> to vector<2x18x16xf32>
    "tpu.trace_start"() <{level = 10 : i32, message = "bqd,bkd->bqk"}> : () -> ()
    %cst_105 = arith.constant dense<0.000000e+00> : vector<2x18x18xf32>
    %218 = tpu.matmul %215, %216, %cst_105 {dimension_numbers = #tpu.dot_dimension_numbers<[2], [2], [1], [1], [0, 0, 0, 1, 1, 1], [0], [0]>} : vector<2x18x16xf32>, vector<2x18x16xf32>, vector<2x18x18xf32> -> vector<2x18x18xf32>
    "tpu.trace_stop"() : () -> ()
    %219 = arith.addf %218, %34 : vector<2x18x18xf32>
    %cst_106 = arith.constant dense<0xFF800000> : vector<2x18xf32>
    %220 = vector.multi_reduction <maximumf>, %219, %cst_106 [2] : vector<2x18x18xf32> to vector<2x18xf32>
    %221 = vector.shape_cast %220 : vector<2x18xf32> to vector<2x18x1xf32>
    %222 = vector.broadcast %221 : vector<2x18x1xf32> to vector<2x18x18xf32>
    %223 = arith.subf %219, %222 : vector<2x18x18xf32>
    %224 = math.exp %223 : vector<2x18x18xf32>
    %cst_107 = arith.constant dense<0.000000e+00> : vector<2x18xf32>
    %225 = vector.multi_reduction <add>, %224, %cst_107 [2] : vector<2x18x18xf32> to vector<2x18xf32>
    %226 = vector.shape_cast %225 : vector<2x18xf32> to vector<2x18x1xf32>
    %227 = tpu.reciprocal %226 {approx = true} : vector<2x18x1xf32> -> vector<2x18x1xf32>
    %228 = vector.broadcast %227 : vector<2x18x1xf32> to vector<2x18x18xf32>
    %229 = arith.mulf %224, %228 : vector<2x18x18xf32>
    "tpu.trace_start"() <{level = 10 : i32, message = "bqk,bkd->bqd"}> : () -> ()
    %cst_108 = arith.constant dense<0.000000e+00> : vector<2x18x16xf32>
    %230 = tpu.matmul %229, %217, %cst_108 {dimension_numbers = #tpu.dot_dimension_numbers<[2], [1], [1], [2], [0, 0, 0, 1, 1, 2], [0], [0]>} : vector<2x18x18xf32>, vector<2x18x16xf32>, vector<2x18x16xf32> -> vector<2x18x16xf32>
    "tpu.trace_stop"() : () -> ()
    %231 = tpu.concatenate %214, %230 in 2 : vector<2x18x16xf32>, vector<2x18x16xf32> -> vector<2x18x32xf32>
    %232 = vector.shape_cast %231 : vector<2x18x32xf32> to vector<36x32xf32>
    %c1_109 = arith.constant 1 : index
    %c0_110 = arith.constant 0 : index
    %c0_111 = arith.constant 0 : index
    %233 = vector.load %arg12[%c1_109, %c0_110, %c0_111] : memref<2x32x32xf32, #tpu.memory_space<vmem>>, vector<1x32x32xf32>
    %234 = vector.shape_cast %233 : vector<1x32x32xf32> to vector<32x32xf32>
    %cst_112 = arith.constant dense<0.000000e+00> : vector<36x32xf32>
    %235 = tpu.matmul %232, %234, %cst_112 {dimension_numbers = #tpu.dot_dimension_numbers<[1], [0], [0], [1], [0, 0, 1, 1], [], []>} : vector<36x32xf32>, vector<32x32xf32>, vector<36x32xf32> -> vector<36x32xf32>
    %236 = arith.addf %164, %235 : vector<36x32xf32>
    %c1_113 = arith.constant 1 : index
    %c0_114 = arith.constant 0 : index
    %c0_115 = arith.constant 0 : index
    %237 = vector.load %arg13[%c1_113, %c0_114, %c0_115] : memref<2x1x32xf32, #tpu.memory_space<vmem>>, vector<1x1x32xf32>
    %238 = vector.shape_cast %237 : vector<1x1x32xf32> to vector<1x32xf32>
    %239 = vector.broadcast %238 : vector<1x32xf32> to vector<36x32xf32>
    %240 = arith.addf %236, %239 : vector<36x32xf32>
    %c1_116 = arith.constant 1 : index
    %c0_117 = arith.constant 0 : index
    %c0_118 = arith.constant 0 : index
    %241 = vector.load %arg14[%c1_116, %c0_117, %c0_118] : memref<2x1x32xf32, #tpu.memory_space<vmem>>, vector<1x1x32xf32>
    %242 = vector.shape_cast %241 : vector<1x1x32xf32> to vector<1x32xf32>
    %c1_119 = arith.constant 1 : index
    %c0_120 = arith.constant 0 : index
    %c0_121 = arith.constant 0 : index
    %243 = vector.load %arg15[%c1_119, %c0_120, %c0_121] : memref<2x1x32xf32, #tpu.memory_space<vmem>>, vector<1x1x32xf32>
    %244 = vector.shape_cast %243 : vector<1x1x32xf32> to vector<1x32xf32>
    %cst_122 = arith.constant dense<0.000000e+00> : vector<36xf32>
    %245 = vector.multi_reduction <add>, %240, %cst_122 [1] : vector<36x32xf32> to vector<36xf32>
    %246 = vector.shape_cast %245 : vector<36xf32> to vector<36x1xf32>
    %cst_123 = arith.constant 3.200000e+01 : f32
    %247 = vector.broadcast %cst_123 : f32 to vector<36x1xf32>
    %248 = arith.divf %246, %247 : vector<36x1xf32>
    %249 = vector.broadcast %248 : vector<36x1xf32> to vector<36x32xf32>
    %250 = arith.subf %240, %249 : vector<36x32xf32>
    %251 = arith.mulf %250, %250 : vector<36x32xf32>
    %cst_124 = arith.constant dense<0.000000e+00> : vector<36xf32>
    %252 = vector.multi_reduction <add>, %251, %cst_124 [1] : vector<36x32xf32> to vector<36xf32>
    %253 = vector.shape_cast %252 : vector<36xf32> to vector<36x1xf32>
    %cst_125 = arith.constant 3.200000e+01 : f32
    %254 = vector.broadcast %cst_125 : f32 to vector<36x1xf32>
    %255 = arith.divf %253, %254 : vector<36x1xf32>
    %256 = vector.broadcast %248 : vector<36x1xf32> to vector<36x32xf32>
    %257 = arith.subf %240, %256 : vector<36x32xf32>
    %cst_126 = arith.constant 9.99999974E-6 : f32
    %258 = vector.broadcast %cst_126 : f32 to vector<36x1xf32>
    %259 = arith.addf %255, %258 : vector<36x1xf32>
    %260 = math.rsqrt %259 : vector<36x1xf32>
    %261 = vector.broadcast %260 : vector<36x1xf32> to vector<36x32xf32>
    %262 = arith.mulf %257, %261 : vector<36x32xf32>
    %263 = vector.broadcast %242 : vector<1x32xf32> to vector<36x32xf32>
    %264 = arith.mulf %262, %263 : vector<36x32xf32>
    %265 = vector.broadcast %244 : vector<1x32xf32> to vector<36x32xf32>
    %266 = arith.addf %264, %265 : vector<36x32xf32>
    %c1_127 = arith.constant 1 : index
    %c0_128 = arith.constant 0 : index
    %c0_129 = arith.constant 0 : index
    %267 = vector.load %arg16[%c1_127, %c0_128, %c0_129] : memref<2x32x128xf32, #tpu.memory_space<vmem>>, vector<1x32x128xf32>
    %268 = vector.shape_cast %267 : vector<1x32x128xf32> to vector<32x128xf32>
    %cst_130 = arith.constant dense<0.000000e+00> : vector<36x128xf32>
    %269 = tpu.matmul %266, %268, %cst_130 {dimension_numbers = #tpu.dot_dimension_numbers<[1], [0], [0], [1], [0, 0, 1, 1], [], []>} : vector<36x32xf32>, vector<32x128xf32>, vector<36x128xf32> -> vector<36x128xf32>
    %c1_131 = arith.constant 1 : index
    %c0_132 = arith.constant 0 : index
    %c0_133 = arith.constant 0 : index
    %270 = vector.load %arg17[%c1_131, %c0_132, %c0_133] : memref<2x1x128xf32, #tpu.memory_space<vmem>>, vector<1x1x128xf32>
    %271 = vector.shape_cast %270 : vector<1x1x128xf32> to vector<1x128xf32>
    %272 = vector.broadcast %271 : vector<1x128xf32> to vector<36x128xf32>
    %273 = arith.addf %269, %272 : vector<36x128xf32>
    %cst_134 = arith.constant 5.000000e-01 : f32
    %274 = vector.broadcast %cst_134 : f32 to vector<36x128xf32>
    %275 = arith.mulf %274, %273 : vector<36x128xf32>
    %cst_135 = arith.constant 4.471500e-02 : f32
    %276 = vector.broadcast %cst_135 : f32 to vector<36x128xf32>
    %277 = arith.mulf %276, %273 : vector<36x128xf32>
    %278 = arith.mulf %277, %273 : vector<36x128xf32>
    %279 = arith.mulf %278, %273 : vector<36x128xf32>
    %280 = arith.addf %273, %279 : vector<36x128xf32>
    %cst_136 = arith.constant 0.797884583 : f32
    %281 = vector.broadcast %cst_136 : f32 to vector<36x128xf32>
    %282 = arith.mulf %281, %280 : vector<36x128xf32>
    %283 = math.tanh %282 : vector<36x128xf32>
    %cst_137 = arith.constant 1.000000e+00 : f32
    %284 = vector.broadcast %cst_137 : f32 to vector<36x128xf32>
    %285 = arith.addf %284, %283 : vector<36x128xf32>
    %286 = arith.mulf %275, %285 : vector<36x128xf32>
    %c1_138 = arith.constant 1 : index
    %c0_139 = arith.constant 0 : index
    %c0_140 = arith.constant 0 : index
    %287 = vector.load %arg18[%c1_138, %c0_139, %c0_140] : memref<2x128x32xf32, #tpu.memory_space<vmem>>, vector<1x128x32xf32>
    %288 = vector.shape_cast %287 : vector<1x128x32xf32> to vector<128x32xf32>
    %cst_141 = arith.constant dense<0.000000e+00> : vector<36x32xf32>
    %289 = tpu.matmul %286, %288, %cst_141 {dimension_numbers = #tpu.dot_dimension_numbers<[1], [0], [0], [1], [0, 0, 1, 1], [], []>} : vector<36x128xf32>, vector<128x32xf32>, vector<36x32xf32> -> vector<36x32xf32>
    %290 = arith.addf %240, %289 : vector<36x32xf32>
    %c1_142 = arith.constant 1 : index
    %c0_143 = arith.constant 0 : index
    %c0_144 = arith.constant 0 : index
    %291 = vector.load %arg19[%c1_142, %c0_143, %c0_144] : memref<2x1x32xf32, #tpu.memory_space<vmem>>, vector<1x1x32xf32>
    %292 = vector.shape_cast %291 : vector<1x1x32xf32> to vector<1x32xf32>
    %293 = vector.broadcast %292 : vector<1x32xf32> to vector<36x32xf32>
    %294 = arith.addf %290, %293 : vector<36x32xf32>
    %c0_145 = arith.constant 0 : index
    %c0_146 = arith.constant 0 : index
    %295 = vector.load %arg20[%c0_145, %c0_146] : memref<1x32xf32, #tpu.memory_space<vmem>>, vector<1x32xf32>
    %c0_147 = arith.constant 0 : index
    %c0_148 = arith.constant 0 : index
    %296 = vector.load %arg21[%c0_147, %c0_148] : memref<1x32xf32, #tpu.memory_space<vmem>>, vector<1x32xf32>
    %cst_149 = arith.constant dense<0.000000e+00> : vector<36xf32>
    %297 = vector.multi_reduction <add>, %294, %cst_149 [1] : vector<36x32xf32> to vector<36xf32>
    %298 = vector.shape_cast %297 : vector<36xf32> to vector<36x1xf32>
    %cst_150 = arith.constant 3.200000e+01 : f32
    %299 = vector.broadcast %cst_150 : f32 to vector<36x1xf32>
    %300 = arith.divf %298, %299 : vector<36x1xf32>
    %301 = vector.broadcast %300 : vector<36x1xf32> to vector<36x32xf32>
    %302 = arith.subf %294, %301 : vector<36x32xf32>
    %303 = arith.mulf %302, %302 : vector<36x32xf32>
    %cst_151 = arith.constant dense<0.000000e+00> : vector<36xf32>
    %304 = vector.multi_reduction <add>, %303, %cst_151 [1] : vector<36x32xf32> to vector<36xf32>
    %305 = vector.shape_cast %304 : vector<36xf32> to vector<36x1xf32>
    %cst_152 = arith.constant 3.200000e+01 : f32
    %306 = vector.broadcast %cst_152 : f32 to vector<36x1xf32>
    %307 = arith.divf %305, %306 : vector<36x1xf32>
    %308 = vector.broadcast %300 : vector<36x1xf32> to vector<36x32xf32>
    %309 = arith.subf %294, %308 : vector<36x32xf32>
    %cst_153 = arith.constant 9.99999974E-6 : f32
    %310 = vector.broadcast %cst_153 : f32 to vector<36x1xf32>
    %311 = arith.addf %307, %310 : vector<36x1xf32>
    %312 = math.rsqrt %311 : vector<36x1xf32>
    %313 = vector.broadcast %312 : vector<36x1xf32> to vector<36x32xf32>
    %314 = arith.mulf %309, %313 : vector<36x32xf32>
    %315 = vector.broadcast %295 : vector<1x32xf32> to vector<36x32xf32>
    %316 = arith.mulf %314, %315 : vector<36x32xf32>
    %317 = vector.broadcast %296 : vector<1x32xf32> to vector<36x32xf32>
    %318 = arith.addf %316, %317 : vector<36x32xf32>
    %319 = vector.shape_cast %318 : vector<36x32xf32> to vector<2x18x32xf32>
    %320 = vector.extract_strided_slice %319 {offsets = [0, 16, 0], sizes = [2, 1, 32], strides = [1, 1, 1]} : vector<2x18x32xf32> to vector<2x1x32xf32>
    %321 = vector.shape_cast %320 : vector<2x1x32xf32> to vector<2x32xf32>
    %c0_154 = arith.constant 0 : index
    %c0_155 = arith.constant 0 : index
    %322 = vector.load %arg22[%c0_154, %c0_155] : memref<32x1xf32, #tpu.memory_space<vmem>>, vector<32x1xf32>
    %cst_156 = arith.constant dense<0.000000e+00> : vector<2x1xf32>
    %323 = tpu.matmul %321, %322, %cst_156 {dimension_numbers = #tpu.dot_dimension_numbers<[1], [0], [0], [1], [0, 0, 1, 1], [], []>} : vector<2x32xf32>, vector<32x1xf32>, vector<2x1xf32> -> vector<2x1xf32>
    %c0_157 = arith.constant 0 : index
    %c0_158 = arith.constant 0 : index
    %324 = vector.load %arg23[%c0_157, %c0_158] : memref<1x1xf32, #tpu.memory_space<vmem>>, vector<1x1xf32>
    %325 = vector.broadcast %324 : vector<1x1xf32> to vector<2x1xf32>
    %326 = arith.addf %323, %325 : vector<2x1xf32>
    %c0_159 = arith.constant 0 : index
    %c0_160 = arith.constant 0 : index
    %c0_161 = arith.constant 0 : index
    %327 = vector.load %arg24[%c0_159, %c0_160, %c0_161] : memref<1x2x1xf32, #tpu.memory_space<vmem>>, vector<1x2x1xf32>
    %328 = vector.shape_cast %327 : vector<1x2x1xf32> to vector<2x1xf32>
    %329 = vector.shape_cast %326 : vector<2x1xf32> to vector<1x2x1xf32>
    tpu.vector_store %arg24[%c0_159, %c0_160, %c0_161], %329 {strides = array<i32>} : memref<1x2x1xf32, #tpu.memory_space<vmem>>, vector<1x2x1xf32>,
    return
  }
  func.func @transform_0(%arg0: i32) -> (i32, i32, i32) {
    %c0_i32 = arith.constant 0 : i32
    %c0_i32_0 = arith.constant 0 : i32
    %c0_i32_1 = arith.constant 0 : i32
    return %arg0, %c0_i32, %c0_i32_0 : i32, i32, i32
  }
  func.func @transform_1(%arg0: i32) -> (i32, i32, i32) {
    %c0_i32 = arith.constant 0 : i32
    %c0_i32_0 = arith.constant 0 : i32
    %c0_i32_1 = arith.constant 0 : i32
    return %arg0, %c0_i32, %c0_i32_0 : i32, i32, i32
  }
  func.func @transform_2(%arg0: i32) -> (i32, i32, i32, i32) {
    %c0_i32 = arith.constant 0 : i32
    %c0_i32_0 = arith.constant 0 : i32
    %c0_i32_1 = arith.constant 0 : i32
    %c0_i32_2 = arith.constant 0 : i32
    return %arg0, %c0_i32, %c0_i32_0, %c0_i32_1 : i32, i32, i32, i32
  }
  func.func @transform_3(%arg0: i32) -> (i32, i32) {
    %c0_i32 = arith.constant 0 : i32
    %c0_i32_0 = arith.constant 0 : i32
    %c0_i32_1 = arith.constant 0 : i32
    return %c0_i32, %c0_i32_0 : i32, i32
  }
  func.func @transform_4(%arg0: i32) -> (i32, i32) {
    %c0_i32 = arith.constant 0 : i32
    %c0_i32_0 = arith.constant 0 : i32
    %c0_i32_1 = arith.constant 0 : i32
    return %c0_i32, %c0_i32_0 : i32, i32
  }
  func.func @transform_5(%arg0: i32) -> (i32, i32) {
    %c0_i32 = arith.constant 0 : i32
    %c0_i32_0 = arith.constant 0 : i32
    %c0_i32_1 = arith.constant 0 : i32
    return %c0_i32, %c0_i32_0 : i32, i32
  }
  func.func @transform_6(%arg0: i32) -> (i32, i32) {
    %c0_i32 = arith.constant 0 : i32
    %c0_i32_0 = arith.constant 0 : i32
    %c0_i32_1 = arith.constant 0 : i32
    return %c0_i32, %c0_i32_0 : i32, i32
  }
  func.func @transform_7(%arg0: i32) -> (i32, i32, i32) {
    %c0_i32 = arith.constant 0 : i32
    %c0_i32_0 = arith.constant 0 : i32
    %c0_i32_1 = arith.constant 0 : i32
    %c0_i32_2 = arith.constant 0 : i32
    return %c0_i32, %c0_i32_0, %c0_i32_1 : i32, i32, i32
  }
  func.func @transform_8(%arg0: i32) -> (i32, i32, i32) {
    %c0_i32 = arith.constant 0 : i32
    %c0_i32_0 = arith.constant 0 : i32
    %c0_i32_1 = arith.constant 0 : i32
    %c0_i32_2 = arith.constant 0 : i32
    return %c0_i32, %c0_i32_0, %c0_i32_1 : i32, i32, i32
  }
  func.func @transform_9(%arg0: i32) -> (i32, i32, i32) {
    %c0_i32 = arith.constant 0 : i32
    %c0_i32_0 = arith.constant 0 : i32
    %c0_i32_1 = arith.constant 0 : i32
    %c0_i32_2 = arith.constant 0 : i32
    return %c0_i32, %c0_i32_0, %c0_i32_1 : i32, i32, i32
  }
  func.func @transform_10(%arg0: i32) -> (i32, i32, i32) {
    %c0_i32 = arith.constant 0 : i32
    %c0_i32_0 = arith.constant 0 : i32
    %c0_i32_1 = arith.constant 0 : i32
    %c0_i32_2 = arith.constant 0 : i32
    return %c0_i32, %c0_i32_0, %c0_i32_1 : i32, i32, i32
  }
  func.func @transform_11(%arg0: i32) -> (i32, i32, i32) {
    %c0_i32 = arith.constant 0 : i32
    %c0_i32_0 = arith.constant 0 : i32
    %c0_i32_1 = arith.constant 0 : i32
    %c0_i32_2 = arith.constant 0 : i32
    return %c0_i32, %c0_i32_0, %c0_i32_1 : i32, i32, i32
  }
  func.func @transform_12(%arg0: i32) -> (i32, i32, i32) {
    %c0_i32 = arith.constant 0 : i32
    %c0_i32_0 = arith.constant 0 : i32
    %c0_i32_1 = arith.constant 0 : i32
    %c0_i32_2 = arith.constant 0 : i32
    return %c0_i32, %c0_i32_0, %c0_i32_1 : i32, i32, i32
  }
  func.func @transform_13(%arg0: i32) -> (i32, i32, i32) {
    %c0_i32 = arith.constant 0 : i32
    %c0_i32_0 = arith.constant 0 : i32
    %c0_i32_1 = arith.constant 0 : i32
    %c0_i32_2 = arith.constant 0 : i32
    return %c0_i32, %c0_i32_0, %c0_i32_1 : i32, i32, i32
  }
  func.func @transform_14(%arg0: i32) -> (i32, i32, i32) {
    %c0_i32 = arith.constant 0 : i32
    %c0_i32_0 = arith.constant 0 : i32
    %c0_i32_1 = arith.constant 0 : i32
    %c0_i32_2 = arith.constant 0 : i32
    return %c0_i32, %c0_i32_0, %c0_i32_1 : i32, i32, i32
  }
  func.func @transform_15(%arg0: i32) -> (i32, i32, i32) {
    %c0_i32 = arith.constant 0 : i32
    %c0_i32_0 = arith.constant 0 : i32
    %c0_i32_1 = arith.constant 0 : i32
    %c0_i32_2 = arith.constant 0 : i32
    return %c0_i32, %c0_i32_0, %c0_i32_1 : i32, i32, i32
  }
  func.func @transform_16(%arg0: i32) -> (i32, i32, i32) {
    %c0_i32 = arith.constant 0 : i32
    %c0_i32_0 = arith.constant 0 : i32
    %c0_i32_1 = arith.constant 0 : i32
    %c0_i32_2 = arith.constant 0 : i32
    return %c0_i32, %c0_i32_0, %c0_i32_1 : i32, i32, i32
  }
  func.func @transform_17(%arg0: i32) -> (i32, i32, i32) {
    %c0_i32 = arith.constant 0 : i32
    %c0_i32_0 = arith.constant 0 : i32
    %c0_i32_1 = arith.constant 0 : i32
    %c0_i32_2 = arith.constant 0 : i32
    return %c0_i32, %c0_i32_0, %c0_i32_1 : i32, i32, i32
  }
  func.func @transform_18(%arg0: i32) -> (i32, i32, i32) {
    %c0_i32 = arith.constant 0 : i32
    %c0_i32_0 = arith.constant 0 : i32
    %c0_i32_1 = arith.constant 0 : i32
    %c0_i32_2 = arith.constant 0 : i32
    return %c0_i32, %c0_i32_0, %c0_i32_1 : i32, i32, i32
  }
  func.func @transform_19(%arg0: i32) -> (i32, i32) {
    %c0_i32 = arith.constant 0 : i32
    %c0_i32_0 = arith.constant 0 : i32
    %c0_i32_1 = arith.constant 0 : i32
    return %c0_i32, %c0_i32_0 : i32, i32
  }
  func.func @transform_20(%arg0: i32) -> (i32, i32) {
    %c0_i32 = arith.constant 0 : i32
    %c0_i32_0 = arith.constant 0 : i32
    %c0_i32_1 = arith.constant 0 : i32
    return %c0_i32, %c0_i32_0 : i32, i32
  }
  func.func @transform_21(%arg0: i32) -> (i32, i32) {
    %c0_i32 = arith.constant 0 : i32
    %c0_i32_0 = arith.constant 0 : i32
    %c0_i32_1 = arith.constant 0 : i32
    return %c0_i32, %c0_i32_0 : i32, i32
  }
  func.func @transform_22(%arg0: i32) -> (i32, i32) {
    %c0_i32 = arith.constant 0 : i32
    %c0_i32_0 = arith.constant 0 : i32
    %c0_i32_1 = arith.constant 0 : i32
    return %c0_i32, %c0_i32_0 : i32, i32
  }
  func.func @transform_23(%arg0: i32) -> (i32, i32, i32) {
    %c0_i32 = arith.constant 0 : i32
    %c0_i32_0 = arith.constant 0 : i32
    %c0_i32_1 = arith.constant 0 : i32
    return %arg0, %c0_i32, %c0_i32_0 : i32, i32, i32
  }
}

</mosaic_0001>

<bundles_post_ra>
// kernel: tpu_custom_call.1
= control target key start
LH: loop header
LB: loop body
LE: loop exit
PB: predicated region body
PF: predicated region fallthrough
CT: control target
= control target key end

     0   :  { %vm104_vm0 = vcmask 1046528   ;;  %vm88_vm1 = vcmask 121856   ;;  %vm142_vm2 = vcmask 261120   ;;  %vm155_vm3 = vcmask 257024   ;;  %s3517_s30 = smov 80   ;;  %s5172_s3 = inlined_call_operand.vmem [shape: f32[15,32], index: 3, kind: input, shape index: {}]   ;;  %s5173_s0 = inlined_call_operand.vmem [shape: f32[1,36,15], index: 0, kind: input, shape index: {}]   ;;  %s5174_s1 = inlined_call_operand.vmem [shape: f32[1,36,32], index: 1, kind: input, shape index: {}]   ;;  %s5175_s4 = inlined_call_operand.vmem [shape: f32[1,32], index: 4, kind: input, shape index: {}]   ;;  %s5176_s5 = inlined_call_operand.vmem [shape: f32[1,32], index: 5, kind: input, shape index: {}]   ;;  %s5177_s6 = inlined_call_operand.vmem [shape: f32[36,32], index: 6, kind: input, shape index: {}]   ;;  %s5178_s7 = inlined_call_operand.vmem [shape: f32[2,1,32], index: 7, kind: input, shape index: {}]   ;;  %s5179_s8 = inlined_call_operand.vmem [shape: f32[2,1,32], index: 8, kind: input, shape index: {}]   ;;  %s5180_s10 = inlined_call_operand.vmem [shape: f32[2,1,96], index: 10, kind: input, shape index: {}]   ;;  %s5181_s9 = inlined_call_operand.vmem [shape: f32[2,32,96], index: 9, kind: input, shape index: {}]   ;;  %s5182_s2 = inlined_call_operand.vmem [shape: f32[1,2,18,18], index: 2, kind: input, shape index: {}]   ;;  %s5183_s12 = inlined_call_operand.vmem [shape: f32[2,1,32], index: 12, kind: input, shape index: {}]   ;;  %s5184_s11 = inlined_call_operand.vmem [shape: f32[2,32,32], index: 11, kind: input, shape index: {}]   ;;  %s5185_s13 = inlined_call_operand.vmem [shape: f32[2,1,32], index: 13, kind: input, shape index: {}]   ;;  %s5186_s14 = inlined_call_operand.vmem [shape: f32[2,1,32], index: 14, kind: input, shape index: {}]   ;;  %s5187_s16 = inlined_call_operand.vmem [shape: f32[2,1,128], index: 16, kind: input, shape index: {}]   ;;  %s5188_s15 = inlined_call_operand.vmem [shape: f32[2,32,128], index: 15, kind: input, shape index: {}]   ;;  %s5189_s17 = inlined_call_operand.vmem [shape: f32[2,128,32], index: 17, kind: input, shape index: {}]   ;;  %s5190_s18 = inlined_call_operand.vmem [shape: f32[2,1,32], index: 18, kind: input, shape index: {}]   ;;  %s5191_s19 = inlined_call_operand.vmem [shape: f32[1,32], index: 19, kind: input, shape index: {}]   ;;  %s5192_s20 = inlined_call_operand.vmem [shape: f32[1,32], index: 20, kind: input, shape index: {}]   ;;  %s5193_s21 = inlined_call_operand.vmem [shape: f32[32,1], index: 21, kind: input, shape index: {}]   ;;  %s5194_s22 = inlined_call_operand.<no memory space> [shape: f32[1,1], index: 22, kind: input, shape index: {}]   ;;  %s5195_s23 = inlined_call_operand.vmem [shape: f32[1,2,1], index: 23, kind: output, shape index: {}]  }
   0x1   :  { %5208 = sst [smem:[#allocation3_spill]] %s5172_s3  ;;  %v3515_v27 = vmov 32.0  }
   0x2   :  { %5209 = sst [smem:[#allocation4_spill]] %s5173_s0  ;;  %3337 = vrcp.f32 %v3515_v27 }
   0x3   :  { %5210 = sst [smem:[#allocation5_spill]] %s5174_s1 }
   0x4   :  { %5211 = sst [smem:[#allocation6_spill]] %s5175_s4 }
   0x5   :  { %5212 = sst [smem:[#allocation7_spill]] %s5176_s5  ;;  %s3516_s5 = smov 96  }
   0x6   :  { %5213 = sst [smem:[#allocation8_spill]] %s5177_s6 }
   0x7   :  { %5214 = sst [smem:[#allocation9_spill]] %s5178_s7  ;;  %s5204_s7 = smov 16  }
   0x8   :  { %5215 = sst [smem:[#allocation10_spill]] %s5179_s8  ;;  %v3338_v28 = vpop.eup %3337 }
   0x9   :  { %s5216_s24 = sld [smem:[#allocation3_spill]]  ;;  %v160_v29 = vmul.f32 32.0, %v3338_v28  ;;  %vm164_vm4 = vweird.f32 %v3338_v28 }
   0xa   :  { %s5217_s1 = sld [smem:[#allocation4_spill]] }
   0xb   :  { %s5218_s25 = sld [smem:[#allocation5_spill]]  ;;  %v161_v30 = vsub.f32 1.0, %v160_v29 }
   0xc   :  { %s5219_s3 = sld [smem:[#allocation6_spill]] }
   0xd   :  { %v162_v31 = vmul.f32 %v3338_v28, %v161_v30  ;;  %s5221_s0 = sld [smem:[#allocation8_spill]] }
   0xe   :  { %s5222_s27 = sld [smem:[#allocation9_spill]] }
   0xf   :  { %v82_v0 = vld [vmem:[%s5216_s24 + $0x8] sm:$0x7f]  ;;  %v81_v1 = vld [vmem:[%s5216_s24] sm:$0xff]  ;;  %v163_v32 = vadd.f32 %v3338_v28, %v162_v31  ;;  %s5220_s24 = sld [smem:[#allocation7_spill]] }
  0x10   :  { %3113 = vmatpush.msk.msra.mxu0 %vm104_vm0, %v82_v0  ;;  %v76_v2 = vld [vmem:[%s5217_s1] sm:$0xff]  ;;  %v77_v3 = vld [vmem:[%s5217_s1 + $0x8] sm:$0xff]  ;;  %v78_v4 = vld [vmem:[%s5217_s1 + $0x10] sm:$0xff]  ;;  %s5223_s29 = sld [smem:[#allocation10_spill]] }
  0x11   :  { %v79_v5 = vld [vmem:[%s5217_s1 + $0x18] sm:$0xff]  ;;  %v80_v6 = vld [vmem:[%s5217_s1 + $0x20] sm:$0xf]  ;;  %v84_v11 = vld [vmem:[%s5218_s25 + $0x8] sm:$0xff]  ;;  %v3683_v33 = vsel %vm164_vm4, %v3338_v28, %v163_v32  ;;  %s5202_s1 = smov 48  }
  0x12   :  { %123 = vmatpush.msra.mxu0 %v81_v1  ;;  %v83_v7 = vld [vmem:[%s5218_s25] sm:$0xff]  ;;  %v85_v15 = vld [vmem:[%s5218_s25 + $0x10] sm:$0xff]  ;;  %v86_v19 = vld [vmem:[%s5218_s25 + $0x18] sm:$0xff] }
  0x13   :  { %3114 = vmatmul.msk.f32.vlgmr.msra.gmra.mxu0 %vm88_vm1, %v76_v2  ;;  %v87_v23 = vld [vmem:[%s5218_s25 + $0x20] sm:$0xf]  ;;  %s5206_s25 = smov 64  }
  0x1b   :  { %3115 = vmatmul.msk.f32.gmra.mxu0 %vm88_vm1, %v77_v3 }
  0x23   :  { %3116 = vmatmul.msk.f32.gmra.mxu0 %vm88_vm1, %v78_v4 }
  0x2b   :  { %3117 = vmatmul.msk.f32.gmra.mxu0 %vm88_vm1, %v79_v5 }
  0x33   :  { %3118 = vmatmul.msk.f32.gmra.mxu0 %vm88_vm1, %v80_v6 }
  0x90   :  { %v125_v8 = vpop.f32.mrf.mxu0 }
  0x91   :  { %v126_v9 = vadd.f32 %v125_v8, %v83_v7 }
  0x93   :  { %v143_v10 = vsel %vm142_vm2, %v126_v9, 0.0 }
  0x94   :  { %144 = vadd.xlane.f32.xlu0 %v143_v10 }
  0x98   :  { %v128_v12 = vpop.f32.mrf.mxu0 }
  0x99   :  { %v129_v13 = vadd.f32 %v128_v12, %v84_v11  ;;  %v3717_v12 = vld [vmem:[%s5219_s3] ss:$0 sm:$0xff] }
  0x9b   :  { %v146_v14 = vsel %vm142_vm2, %v129_v13, 0.0 }
  0x9c   :  { %147 = vadd.xlane.f32.xlu0 %v146_v14 }
  0xa0   :  { %v131_v16 = vpop.f32.mrf.mxu0 }
  0xa1   :  { %v132_v17 = vadd.f32 %v131_v16, %v85_v15  ;;  %v3722_v16 = vld [vmem:[%s5220_s24] ss:$0 sm:$0xff]  ;;  %s3518_s24 = smov 112  }
  0xa3   :  { %v149_v18 = vsel %vm142_vm2, %v132_v17, 0.0 }
  0xa4   :  { %150 = vadd.xlane.f32.xlu1 %v149_v18 }
  0xa8   :  { %v134_v20 = vpop.f32.mrf.mxu0 }
  0xa9   :  { %v135_v21 = vadd.f32 %v134_v20, %v86_v19 }
  0xab   :  { %v152_v22 = vsel %vm142_vm2, %v135_v21, 0.0 }
  0xac   :  { %153 = vadd.xlane.f32.xlu1 %v152_v22  ;;  %v277_v22 = vld [vmem:[%s5221_s0] sm:$0xff] }
  0xb0   :  { %v137_v24 = vpop.f32.mrf.mxu0 }
  0xb1   :  { %v138_v25 = vadd.f32 %v137_v24, %v87_v23 }
  0xb3   :  { %v156_v26 = vsel %vm155_vm3, %v138_v25, 0.0 }
  0xb4   :  { %157 = vadd.xlane.f32.xlu2 %v156_v26 }
 0x107   :  { %v145_v34 = vpop.xlane.xlu0 %144 }
 0x108   :  { %v166_v35 = vmul.f32 %v3683_v33, %v145_v34 }
 0x10a   :  { %v171_v36 = vsub.f32 %v126_v9, %v166_v35 }
 0x10c   :  { %v176_v37 = vmul.f32 %v171_v36, %v171_v36 }
 0x10e   :  { %v181_v38 = vsel %vm142_vm2, %v176_v37, 0.0 }
 0x10f   :  { %182 = vadd.xlane.f32.xlu2 %v181_v38  ;;  %v148_v39 = vpop.xlane.xlu0 %147 }
 0x110   :  { %v167_v40 = vmul.f32 %v3683_v33, %v148_v39  ;;  %v278_v39 = vld [vmem:[%s5221_s0 + $0x8] sm:$0xff] }
 0x112   :  { %v3688_v41 = vsub.f32 %v129_v13, %v167_v40 }
 0x114   :  { %v177_v42 = vmul.f32 %v3688_v41, %v3688_v41 }
 0x116   :  { %v184_v43 = vsel %vm142_vm2, %v177_v42, 0.0 }
 0x117   :  { %v151_v44 = vpop.xlane.xlu1 %150  ;;  %185 = vadd.xlane.f32.xlu0 %v184_v43 }
 0x118   :  { %v168_v45 = vmul.f32 %v3683_v33, %v151_v44 }
 0x11a   :  { %v3694_v46 = vsub.f32 %v132_v17, %v168_v45 }
 0x11c   :  { %v178_v47 = vmul.f32 %v3694_v46, %v3694_v46 }
 0x11e   :  { %v187_v48 = vsel %vm142_vm2, %v178_v47, 0.0 }
 0x11f   :  { %188 = vadd.xlane.f32.xlu1 %v187_v48  ;;  %v154_v49 = vpop.xlane.xlu1 %153 }
 0x120   :  { %v169_v50 = vmul.f32 %v3683_v33, %v154_v49 }
 0x122   :  { %v3700_v51 = vsub.f32 %v135_v21, %v169_v50 }
 0x124   :  { %v179_v52 = vmul.f32 %v3700_v51, %v3700_v51 }
 0x126   :  { %v190_v53 = vsel %vm142_vm2, %v179_v52, 0.0 }
 0x127   :  { %v158_v54 = vpop.xlane.xlu2 %157  ;;  %191 = vadd.xlane.f32.xlu2 %v190_v53 }
 0x128   :  { %v170_v55 = vmul.f32 %v3683_v33, %v158_v54 }
 0x12a   :  { %v3706_v56 = vsub.f32 %v138_v25, %v170_v55  ;;  %v279_v55 = vld [vmem:[%s5221_s0 + $0x10] sm:$0xff] }
 0x12c   :  { %v180_v57 = vmul.f32 %v3706_v56, %v3706_v56 }
 0x12e   :  { %v193_v58 = vsel %vm155_vm3, %v180_v57, 0.0 }
 0x12f   :  { %194 = vadd.xlane.f32.xlu0 %v193_v58 }
 0x182   :  { %v183_v59 = vpop.xlane.xlu2 %182 }
 0x183   :  { %v196_v60 = vmul.f32 %v183_v59, %v3683_v33 }
 0x185   :  { %v201_v61 = vadd.f32 1e-05, %v196_v60 }
 0x187   :  { %3339 = vrsqrt.f32 %v201_v61  ;;  %vm212_vm6 = vweird.f32 %v201_v61 }
 0x18a   :  { %v186_v62 = vpop.xlane.xlu0 %185 }
 0x18b   :  { %v197_v63 = vmul.f32 %v186_v62, %v3683_v33 }
 0x18d   :  { %v3340_v0 = vpop.eup %3339  ;;  %v202_v1 = vadd.f32 1e-05, %v197_v63 }
 0x18e   :  { %v207_v2 = vmul.f32 %v3340_v0, %v201_v61  ;;  %vm213_vm5 = vweird.f32 %v3340_v0 }
 0x18f   :  { %3341 = vrsqrt.f32 %v202_v1  ;;  %vm214_vm7 = vmor %vm212_vm6, %vm213_vm5  ;;  %vm222_vm9 = vweird.f32 %v202_v1 }
 0x190   :  { %v208_v3 = vmul.f32 %v3340_v0, %v207_v2 }
 0x192   :  { %v209_v4 = vmul.f32 0.5, %v208_v3  ;;  %v189_v5 = vpop.xlane.xlu1 %188 }
 0x193   :  { %v198_v6 = vmul.f32 %v189_v5, %v3683_v33 }
 0x194   :  { %v210_v7 = vsub.f32 1.5, %v209_v4  ;;  %v280_v4 = vld [vmem:[%s5221_s0 + $0x18] sm:$0xff] }
 0x195   :  { %v3342_v8 = vpop.eup %3341  ;;  %v203_v9 = vadd.f32 1e-05, %v198_v6 }
 0x196   :  { %v211_v10 = vmul.f32 %v3340_v0, %v210_v7  ;;  %v217_v11 = vmul.f32 %v3342_v8, %v202_v1  ;;  %vm223_vm8 = vweird.f32 %v3342_v8 }
 0x197   :  { %3343 = vrsqrt.f32 %v203_v9  ;;  %vm224_vm10 = vmor %vm222_vm9, %vm223_vm8  ;;  %vm232_vm12 = vweird.f32 %v203_v9 }
 0x198   :  { %v215_v13 = vsel %vm214_vm7, %v3340_v0, %v211_v10  ;;  %v218_v14 = vmul.f32 %v3342_v8, %v217_v11  ;;  %v281_v11 = vld [vmem:[%s5221_s0 + $0x20] sm:$0xf] }
 0x199   :  { %v256_v15 = vmul.f32 %v215_v13, %v171_v36 }
 0x19a   :  { %v219_v17 = vmul.f32 0.5, %v218_v14  ;;  %v192_v18 = vpop.xlane.xlu2 %191 }
 0x19b   :  { %v199_v19 = vmul.f32 %v192_v18, %v3683_v33  ;;  %v264_v20 = vmul.f32 %v3717_v12, %v256_v15 }
 0x19c   :  { %v220_v21 = vsub.f32 1.5, %v219_v17 }
 0x19d   :  { %v3344_v23 = vpop.eup %3343  ;;  %v204_v24 = vadd.f32 1e-05, %v199_v19  ;;  %v272_v25 = vadd.f32 %v3722_v16, %v264_v20 }
 0x19e   :  { %v221_v26 = vmul.f32 %v3342_v8, %v220_v21  ;;  %v227_v27 = vmul.f32 %v3344_v23, %v203_v9  ;;  %vm233_vm11 = vweird.f32 %v3344_v23 }
 0x19f   :  { %3345 = vrsqrt.f32 %v204_v24  ;;  %v3730_v28 = vadd.f32 %v277_v22, %v272_v25  ;;  %vm234_vm13 = vmor %vm232_vm12, %vm233_vm11  ;;  %vm242_vm15 = vweird.f32 %v204_v24 }
 0x1a0   :  { %v225_v29 = vsel %vm224_vm10, %v3342_v8, %v221_v26  ;;  %v228_v30 = vmul.f32 %v3344_v23, %v227_v27 }
 0x1a1   :  { %v295_v31 = vsel %vm142_vm2, %v3730_v28, 0.0  ;;  %v257_v32 = vmul.f32 %v225_v29, %v3688_v41 }
 0x1a2   :  { %v229_v34 = vmul.f32 0.5, %v228_v30  ;;  %296 = vadd.xlane.f32.xlu1 %v295_v31  ;;  %v195_v35 = vpop.xlane.xlu0 %194 }
 0x1a3   :  { %v200_v36 = vmul.f32 %v195_v35, %v3683_v33  ;;  %v265_v37 = vmul.f32 %v3717_v12, %v257_v32 }
 0x1a4   :  { %v230_v38 = vsub.f32 1.5, %v229_v34 }
 0x1a5   :  { %v3346_v40 = vpop.eup %3345  ;;  %v205_v42 = vadd.f32 1e-05, %v200_v36  ;;  %v273_v43 = vadd.f32 %v3722_v16, %v265_v37 }
 0x1a6   :  { %v231_v44 = vmul.f32 %v3344_v23, %v230_v38  ;;  %v237_v41 = vmul.f32 %v3346_v40, %v204_v24  ;;  %vm243_vm14 = vweird.f32 %v3346_v40 }
 0x1a7   :  { %3347 = vrsqrt.f32 %v205_v42  ;;  %v3741_v45 = vadd.f32 %v278_v39, %v273_v43  ;;  %vm244_vm0 = vmor %vm242_vm15, %vm243_vm14  ;;  %vm252_vm4 = vweird.f32 %v205_v42  ;;  %v423_v43 = vld [vmem:[%s5181_s9 + $0x10] sm:$0xff] }
 0x1a8   :  { %v235_v47 = vsel %vm234_vm13, %v3344_v23, %v231_v44  ;;  %v238_v48 = vmul.f32 %v3346_v40, %v237_v41  ;;  %v422_v44 = vld [vmem:[%s5181_s9 + $0x8] sm:$0xff]  ;;  %v421_v41 = vld [vmem:[%s5181_s9] sm:$0xff] }
 0x1a9   :  { %v298_v49 = vsel %vm142_vm2, %v3741_v45, 0.0  ;;  %v258_v50 = vmul.f32 %v235_v47, %v3694_v46 }
 0x1aa   :  { %v239_v52 = vmul.f32 0.5, %v238_v48  ;;  %299 = vadd.xlane.f32.xlu2 %v298_v49 }
 0x1ab   :  { %v266_v53 = vmul.f32 %v3717_v12, %v258_v50 }
 0x1ac   :  { %v240_v54 = vsub.f32 1.5, %v239_v52 }
 0x1ad   :  { %v3348_v57 = vpop.eup %3347  ;;  %v274_v58 = vadd.f32 %v3722_v16, %v266_v53 }
 0x1ae   :  { %v241_v59 = vmul.f32 %v3346_v40, %v240_v54  ;;  %v247_v60 = vmul.f32 %v3348_v57, %v205_v42  ;;  %vm253_vm1 = vweird.f32 %v3348_v57  ;;  %v424_v42 = vld [vmem:[%s5181_s9 + $0x18] sm:$0xff] }
 0x1af   :  { %v3751_v61 = vadd.f32 %v279_v55, %v274_v58  ;;  %vm254_vm5 = vmor %vm252_vm4, %vm253_vm1  ;;  %456 = vmatpush.msra.mxu1 %v424_v42 }
 0x1b0   :  { %v245_v46 = vsel %vm244_vm0, %v3346_v40, %v241_v59  ;;  %v248_v62 = vmul.f32 %v3348_v57, %v247_v60 }
 0x1b1   :  { %v259_v63 = vmul.f32 %v245_v46, %v3700_v51  ;;  %v301_v0 = vsel %vm142_vm2, %v3751_v61, 0.0  ;;  %457 = vmatpush.msra.mxu1 %v423_v43 }
 0x1b2   :  { %v249_v1 = vmul.f32 0.5, %v248_v62  ;;  %302 = vadd.xlane.f32.xlu0 %v301_v0 }
 0x1b3   :  { %v267_v2 = vmul.f32 %v3717_v12, %v259_v63  ;;  %458 = vmatpush.msra.mxu1 %v422_v44 }
 0x1b4   :  { %v250_v3 = vsub.f32 1.5, %v249_v1 }
 0x1b5   :  { %v275_v5 = vadd.f32 %v3722_v16, %v267_v2  ;;  %459 = vmatpush.msra.mxu1 %v421_v41  ;;  %v3828_v2 = vld [vmem:[%s5222_s27] ss:$0 sm:$0xff] }
 0x1b6   :  { %v251_v6 = vmul.f32 %v3348_v57, %v250_v3 }
 0x1b7   :  { %v3761_v7 = vadd.f32 %v280_v4, %v275_v5 }
 0x1b8   :  { %v255_v51 = vsel %vm254_vm5, %v3348_v57, %v251_v6  ;;  %v3834_v6 = vld [vmem:[%s5223_s29] ss:$0 sm:$0xff] }
 0x1b9   :  { %v304_v8 = vsel %vm142_vm2, %v3761_v7, 0.0  ;;  %v260_v9 = vmul.f32 %v255_v51, %v3706_v56 }
 0x1ba   :  { %305 = vadd.xlane.f32.xlu1 %v304_v8 }
 0x1bb   :  { %v268_v10 = vmul.f32 %v3717_v12, %v260_v9 }
 0x1bd   :  { %v276_v13 = vadd.f32 %v3722_v16, %v268_v10 }
 0x1bf   :  { %v3771_v14 = vadd.f32 %v281_v11, %v276_v13 }
 0x1c1   :  { %v307_v15 = vsel %vm155_vm3, %v3771_v14, 0.0 }
 0x1c2   :  { %308 = vadd.xlane.f32.xlu2 %v307_v15 }
 0x215   :  { %v297_v17 = vpop.xlane.xlu1 %296 }
 0x216   :  { %v310_v18 = vmul.f32 %v297_v17, %v3683_v33 }
 0x218   :  { %v3777_v56 = vsub.f32 %v3730_v28, %v310_v18 }
 0x21a   :  { %v320_v12 = vmul.f32 %v3777_v56, %v3777_v56 }
 0x21c   :  { %v325_v19 = vsel %vm142_vm2, %v320_v12, 0.0 }
 0x21d   :  { %326 = vadd.xlane.f32.xlu0 %v325_v19  ;;  %v300_v20 = vpop.xlane.xlu2 %299 }
 0x21e   :  { %v311_v16 = vmul.f32 %v300_v20, %v3683_v33 }
 0x220   :  { %v3784_v21 = vsub.f32 %v3741_v45, %v311_v16 }
 0x222   :  { %v321_v22 = vmul.f32 %v3784_v21, %v3784_v21 }
 0x224   :  { %v328_v23 = vsel %vm142_vm2, %v321_v22, 0.0 }
 0x225   :  { %329 = vadd.xlane.f32.xlu1 %v328_v23  ;;  %v303_v24 = vpop.xlane.xlu0 %302 }
 0x226   :  { %v312_v25 = vmul.f32 %v303_v24, %v3683_v33 }
 0x228   :  { %v3791_v26 = vsub.f32 %v3751_v61, %v312_v25 }
 0x22a   :  { %v322_v27 = vmul.f32 %v3791_v26, %v3791_v26 }
 0x22c   :  { %v331_v29 = vsel %vm142_vm2, %v322_v27, 0.0 }
 0x22d   :  { %v306_v30 = vpop.xlane.xlu1 %305  ;;  %332 = vadd.xlane.f32.xlu2 %v331_v29 }
 0x22e   :  { %v313_v31 = vmul.f32 %v306_v30, %v3683_v33 }
 0x230   :  { %v3798_v32 = vsub.f32 %v3761_v7, %v313_v31 }
 0x232   :  { %v323_v34 = vmul.f32 %v3798_v32, %v3798_v32 }
 0x234   :  { %v334_v35 = vsel %vm142_vm2, %v323_v34, 0.0 }
 0x235   :  { %335 = vadd.xlane.f32.xlu0 %v334_v35  ;;  %v309_v36 = vpop.xlane.xlu2 %308 }
 0x236   :  { %v314_v37 = vmul.f32 %v309_v36, %v3683_v33 }
 0x238   :  { %v3805_v38 = vsub.f32 %v3771_v14, %v314_v37 }
 0x23a   :  { %v324_v39 = vmul.f32 %v3805_v38, %v3805_v38 }
 0x23c   :  { %v337_v40 = vsel %vm155_vm3, %v324_v39, 0.0 }
 0x23d   :  { %338 = vadd.xlane.f32.xlu1 %v337_v40 }
 0x290   :  { %v327_v47 = vpop.xlane.xlu0 %326 }
 0x291   :  { %v340_v48 = vmul.f32 %v327_v47, %v3683_v33 }
 0x293   :  { %v345_v49 = vadd.f32 1e-05, %v340_v48 }
 0x295   :  { %3349 = vrsqrt.f32 %v345_v49  ;;  %vm356_vm7 = vweird.f32 %v345_v49 }
 0x298   :  { %v330_v50 = vpop.xlane.xlu1 %329 }
 0x299   :  { %v341_v52 = vmul.f32 %v330_v50, %v3683_v33 }
 0x29b   :  { %v3350_v53 = vpop.eup %3349  ;;  %v346_v54 = vadd.f32 1e-05, %v341_v52 }
 0x29c   :  { %v351_v55 = vmul.f32 %v3350_v53, %v345_v49  ;;  %vm357_vm6 = vweird.f32 %v3350_v53 }
 0x29d   :  { %3351 = vrsqrt.f32 %v346_v54  ;;  %vm358_vm8 = vmor %vm356_vm7, %vm357_vm6  ;;  %vm366_vm10 = vweird.f32 %v346_v54  ;;  %vm538_vm7 = vcmask 130048  }
 0x29e   :  { %v352_v57 = vmul.f32 %v3350_v53, %v351_v55 }
 0x2a0   :  { %v353_v58 = vmul.f32 0.5, %v352_v57  ;;  %v333_v59 = vpop.xlane.xlu2 %332 }
 0x2a1   :  { %v342_v60 = vmul.f32 %v333_v59, %v3683_v33 }
 0x2a2   :  { %v354_v46 = vsub.f32 1.5, %v353_v58 }
 0x2a3   :  { %v3352_v62 = vpop.eup %3351  ;;  %v347_v63 = vadd.f32 1e-05, %v342_v60 }
 0x2a4   :  { %v355_v0 = vmul.f32 %v3350_v53, %v354_v46  ;;  %v361_v1 = vmul.f32 %v3352_v62, %v346_v54  ;;  %vm367_vm9 = vweird.f32 %v3352_v62 }
 0x2a5   :  { %3353 = vrsqrt.f32 %v347_v63  ;;  %vm368_vm11 = vmor %vm366_vm10, %vm367_vm9  ;;  %vm376_vm13 = vweird.f32 %v347_v63  ;;  %vm659_vm9 = vcmask 146432   ;;  %vm666_vm10 = vcmask 140288  }
 0x2a6   :  { %v362_v3 = vmul.f32 %v3352_v62, %v361_v1  ;;  %v359_v4 = vsel %vm358_vm8, %v3350_v53, %v355_v0  ;;  %vm763_vm8 = vcmask 1041408  }
 0x2a7   :  { %v400_v5 = vmul.f32 %v359_v4, %v3777_v56 }
 0x2a8   :  { %v363_v51 = vmul.f32 0.5, %v362_v3  ;;  %v336_v8 = vpop.xlane.xlu0 %335 }
 0x2a9   :  { %v343_v9 = vmul.f32 %v336_v8, %v3683_v33  ;;  %v408_v10 = vmul.f32 %v3828_v2, %v400_v5 }
 0x2aa   :  { %v364_v11 = vsub.f32 1.5, %v363_v51 }
 0x2ab   :  { %v3354_v13 = vpop.eup %3353  ;;  %v348_v15 = vadd.f32 1e-05, %v343_v9  ;;  %v416_v17 = vadd.f32 %v3834_v6, %v408_v10 }
 0x2ac   :  { %v365_v18 = vmul.f32 %v3352_v62, %v364_v11  ;;  %v371_v56 = vmul.f32 %v3354_v13, %v347_v63  ;;  %vm377_vm12 = vweird.f32 %v3354_v13 }
 0x2ad   :  { %3355 = vrsqrt.f32 %v348_v15  ;;  %3119 = vmatmul.msk.f32.vlgmr.msra.gmra.mxu1 %vm142_vm2, %v416_v17  ;;  %vm378_vm14 = vmor %vm376_vm13, %vm377_vm12  ;;  %vm386_vm0 = vweird.f32 %v348_v15 }
 0x2ae   :  { %v372_v12 = vmul.f32 %v3354_v13, %v371_v56  ;;  %v369_v19 = vsel %vm368_vm11, %v3352_v62, %v365_v18 }
 0x2af   :  { %v401_v20 = vmul.f32 %v369_v19, %v3784_v21 }
 0x2b0   :  { %v373_v16 = vmul.f32 0.5, %v372_v12  ;;  %v339_v22 = vpop.xlane.xlu1 %338 }
 0x2b1   :  { %v344_v23 = vmul.f32 %v339_v22, %v3683_v33  ;;  %v409_v24 = vmul.f32 %v3828_v2, %v401_v20 }
 0x2b2   :  { %v374_v25 = vsub.f32 1.5, %v373_v16 }
 0x2b3   :  { %v3356_v27 = vpop.eup %3355  ;;  %v349_v29 = vadd.f32 1e-05, %v344_v23  ;;  %v417_v30 = vadd.f32 %v3834_v6, %v409_v24 }
 0x2b4   :  { %v375_v31 = vmul.f32 %v3354_v13, %v374_v25  ;;  %v381_v34 = vmul.f32 %v3356_v27, %v348_v15  ;;  %vm387_vm15 = vweird.f32 %v3356_v27 }
 0x2b5   :  { %3357 = vrsqrt.f32 %v349_v29  ;;  %3120 = vmatmul.msk.f32.gmra.mxu1 %vm142_vm2, %v417_v30  ;;  %vm388_vm1 = vmor %vm386_vm0, %vm387_vm15  ;;  %vm396_vm5 = vweird.f32 %v349_v29 }
 0x2b6   :  { %v379_v21 = vsel %vm378_vm14, %v3354_v13, %v375_v31  ;;  %v382_v35 = vmul.f32 %v3356_v27, %v381_v34 }
 0x2b7   :  { %v402_v36 = vmul.f32 %v379_v21, %v3791_v26 }
 0x2b8   :  { %v383_v37 = vmul.f32 0.5, %v382_v35 }
 0x2b9   :  { %v410_v39 = vmul.f32 %v3828_v2, %v402_v36 }
 0x2ba   :  { %v384_v40 = vsub.f32 1.5, %v383_v37 }
 0x2bb   :  { %v3358_v42 = vpop.eup %3357  ;;  %v418_v43 = vadd.f32 %v3834_v6, %v410_v39 }
 0x2bc   :  { %v385_v44 = vmul.f32 %v3356_v27, %v384_v40  ;;  %v391_v41 = vmul.f32 %v3358_v42, %v349_v29  ;;  %vm397_vm4 = vweird.f32 %v3358_v42 }
 0x2bd   :  { %3121 = vmatmul.msk.f32.gmra.mxu1 %vm142_vm2, %v418_v43  ;;  %vm398_vm6 = vmor %vm396_vm5, %vm397_vm4 }
 0x2be   :  { %v392_v47 = vmul.f32 %v3358_v42, %v391_v41  ;;  %v389_v48 = vsel %vm388_vm1, %v3356_v27, %v385_v44 }
 0x2bf   :  { %v403_v49 = vmul.f32 %v389_v48, %v3798_v32  ;;  %v3322_v32 = vld [vmem:[%s5180_s10] ss:$0 sm:$0xff] }
 0x2c0   :  { %v393_v50 = vmul.f32 0.5, %v392_v47 }
 0x2c1   :  { %v411_v26 = vmul.f32 %v3828_v2, %v403_v49 }
 0x2c2   :  { %v394_v52 = vsub.f32 1.5, %v393_v50 }
 0x2c3   :  { %v419_v53 = vadd.f32 %v3834_v6, %v411_v26 }
 0x2c4   :  { %v395_v54 = vmul.f32 %v3358_v42, %v394_v52 }
 0x2c5   :  { %3122 = vmatmul.msk.f32.gmra.mxu1 %vm142_vm2, %v419_v53 }
 0x2c6   :  { %v399_v55 = vsel %vm398_vm6, %v3358_v42, %v395_v54 }
 0x2c7   :  { %v404_v57 = vmul.f32 %v399_v55, %v3805_v38 }
 0x2c9   :  { %v412_v58 = vmul.f32 %v3828_v2, %v404_v57 }
 0x2cb   :  { %v420_v59 = vadd.f32 %v3834_v6, %v412_v58 }
 0x2cd   :  { %3123 = vmatmul.msk.f32.gmra.mxu1 %vm142_vm2, %v420_v59 }
 0x32a   :  { %v461_v60 = vpop.f32.mrf.mxu1 }
 0x32b   :  { %v3860_v46 = vadd.f32 %v3322_v32, %v461_v60 }
 0x32d   :  { %v3863_v62 = vrot.slane %v3860_v46, 2  ;;  %v3866_v63 = vrot.slane %v3860_v46, 4  ;;  %v3869_v38 = vrot.slane %v3860_v46, 6  ;;  %494 = vst [vmem:[#allocation1] ss:$4 sm:$0xff] %v3860_v46 }
 0x32f   :  { %496 = vst [vmem:[#allocation1 + $0x1] ss:$4 sm:$0xff] %v3863_v62 }
 0x330   :  { %498 = vst [vmem:[#allocation1 + $0x2] ss:$4 sm:$0xff] %v3866_v63 }
 0x331   :  { %500 = vst [vmem:[#allocation1 + $0x3] ss:$4 sm:$0xff] %v3869_v38 }
 0x332   :  { %v464_v0 = vpop.f32.mrf.mxu1 }
 0x333   :  { %v3875_v1 = vadd.f32 %v3322_v32, %v464_v0 }
 0x335   :  { %v3878_v2 = vrot.slane %v3875_v1, 2  ;;  %v3881_v3 = vrot.slane %v3875_v1, 4  ;;  %v3884_v4 = vrot.slane %v3875_v1, 6  ;;  %502 = vst [vmem:[#allocation1 + $0x20] ss:$4 sm:$0xff] %v3875_v1 }
 0x337   :  { %504 = vst [vmem:[#allocation1 + $0x21] ss:$4 sm:$0xff] %v3878_v2 }
 0x338   :  { %506 = vst [vmem:[#allocation1 + $0x22] ss:$4 sm:$0xff] %v3881_v3  ;;  %v3892_v51 = vld.sshfl [vmem:[#allocation1] sm:$0xff pattern:$0x73625140] }
 0x339   :  { %508 = vst [vmem:[#allocation1 + $0x23] ss:$4 sm:$0xff] %v3884_v4 }
 0x33a   :  { %v467_v5 = vpop.f32.mrf.mxu1 }
 0x33b   :  { %v3890_v6 = vadd.f32 %v3322_v32, %v467_v5 }
 0x33d   :  { %511 = vst [vmem:[#allocation1] ss:$4 sm:$0xff] %v3890_v6  ;;  %v3928_v20 = vrot.slane %v3890_v6, 2  ;;  %v3933_v22 = vrot.slane %v3890_v6, 4  ;;  %v3937_v24 = vrot.slane %v3890_v6, 6 }
 0x340   :  { %v3895_v8 = vld.sshfl [vmem:[#allocation1 + $0x20] sm:$0xff pattern:$0x73625140] }
 0x341   :  { %521 = vst [vmem:[#allocation1 + $0x20] ss:$4 sm:$0xff] %v3875_v1 }
 0x342   :  { %523 = vst [vmem:[#allocation1 + $0x21] ss:$4 sm:$0xff] %v3878_v2  ;;  %v470_v9 = vpop.f32.mrf.mxu1 }
 0x343   :  { %525 = vst [vmem:[#allocation1 + $0x22] ss:$4 sm:$0xff] %v3881_v3  ;;  %v3903_v11 = vadd.f32 %v3322_v32, %v470_v9 }
 0x344   :  { %527 = vst [vmem:[#allocation1 + $0x23] ss:$4 sm:$0xff] %v3884_v4  ;;  %v3901_v10 = vld.sshfl [vmem:[#allocation1] sm:$0xff pattern:$0x73625140] }
 0x345   :  { %513 = vst [vmem:[#allocation1] ss:$4 sm:$0xff] %v3860_v46  ;;  %v3910_v13 = vrot.slane %v3903_v11, 2  ;;  %v3913_v15 = vrot.slane %v3903_v11, 4  ;;  %v3916_v17 = vrot.slane %v3903_v11, 6 }
 0x346   :  { %515 = vst [vmem:[#allocation1 + $0x1] ss:$4 sm:$0xff] %v3863_v62 }
 0x347   :  { %517 = vst [vmem:[#allocation1 + $0x2] ss:$4 sm:$0xff] %v3866_v63 }
 0x348   :  { %519 = vst [vmem:[#allocation1 + $0x3] ss:$4 sm:$0xff] %v3869_v38 }
 0x34a   :  { %v473_v18 = vpop.f32.mrf.mxu1 }
 0x34b   :  { %v529_v56 = vld.sshfl [vmem:[#allocation1 + $0x20] sm:$0xff pattern:$0x73625140]  ;;  %v3918_v12 = vadd.f32 %v3322_v32, %v473_v18 }
 0x34c   :  { %585 = vst [vmem:[#allocation1 + $0x20] ss:$4 sm:$0xff] %v3910_v13  ;;  %534 = vrot.lane.b32.xlu0 %v529_v56, %s3516_s5  ;;  %v288_v56 = vld [vmem:[%s5182_s2 + $0x8] sm:$0xff] }
 0x34d   :  { %587 = vst [vmem:[#allocation1 + $0x21] ss:$4 sm:$0xff] %v3913_v15  ;;  %v3948_v25 = vrot.slane %v3918_v12, 2 }
 0x34e   :  { %589 = vst [vmem:[#allocation1 + $0x22] ss:$4 sm:$0xff] %v3916_v17 }
 0x34f   :  { %v528_v19 = vld.sshfl [vmem:[#allocation1] sm:$0xff pattern:$0x73625140]  ;;  %591 = vst [vmem:[#allocation1 + $0x23] ss:$4 sm:$0xff] %v3918_v12 }
 0x350   :  { %530 = vst [vmem:[#allocation1] ss:$4 sm:$0xff] %v3890_v6  ;;  %532 = vrot.lane.b32.xlu1 %v528_v19, %s3516_s5 }
 0x356   :  { %v3930_v16 = vld.sshfl [vmem:[#allocation1 + $0x20] sm:$0xff pattern:$0x73625140] }
 0x357   :  { %v531_v23 = vld.sshfl [vmem:[#allocation1] sm:$0xff pattern:$0x73625140]  ;;  %604 = vst [vmem:[#allocation1 + $0x20] ss:$4 sm:$0xff] %v3910_v13 }
 0x358   :  { %577 = vst [vmem:[#allocation1] ss:$4 sm:$0xff] %v3928_v20  ;;  %536 = vrot.lane.b32.xlu2 %v531_v23, %s3516_s5  ;;  %v289_v23 = vld [vmem:[%s5182_s2 + $0x10] sm:$0x3] }
 0x359   :  { %579 = vst [vmem:[#allocation1 + $0x1] ss:$4 sm:$0xff] %v3933_v22 }
 0x35a   :  { %581 = vst [vmem:[#allocation1 + $0x2] ss:$4 sm:$0xff] %v3937_v24 }
 0x35b   :  { %583 = vst [vmem:[#allocation1 + $0x3] ss:$4 sm:$0xff] %v3903_v11 }
 0x35c   :  { %606 = vst [vmem:[#allocation1 + $0x21] ss:$4 sm:$0xff] %v3913_v15 }
 0x35d   :  { %608 = vst [vmem:[#allocation1 + $0x22] ss:$4 sm:$0xff] %v3916_v17 }
 0x35e   :  { %610 = vst [vmem:[#allocation1 + $0x23] ss:$4 sm:$0xff] %v3918_v12 }
 0x362   :  { %v3950_v27 = vld.sshfl [vmem:[#allocation1] sm:$0xff pattern:$0x73625140] }
 0x363   :  { %594 = vst [vmem:[#allocation1] ss:$4 sm:$0xff] %v3948_v25 }
 0x365   :  { %v612_v29 = vld.sshfl [vmem:[#allocation1 + $0x20] sm:$0xff pattern:$0x73625140] }
 0x366   :  { %735 = vst [vmem:[#allocation1 + $0x20] ss:$4 sm:$0xff] %v3875_v1  ;;  %617 = vrot.lane.b32.xlu0 %v612_v29, %s3516_s5 }
 0x367   :  { %737 = vst [vmem:[#allocation1 + $0x21] ss:$4 sm:$0xff] %v3878_v2 }
 0x368   :  { %739 = vst [vmem:[#allocation1 + $0x22] ss:$4 sm:$0xff] %v3881_v3 }
 0x369   :  { %741 = vst [vmem:[#allocation1 + $0x23] ss:$4 sm:$0xff] %v3884_v4 }
 0x36a   :  { %v3958_v30 = vld.sshfl [vmem:[#allocation1] sm:$0xff pattern:$0x73625140] }
 0x36b   :  { %596 = vst [vmem:[#allocation1] ss:$4 sm:$0xff] %v3928_v20 }
 0x36c   :  { %598 = vst [vmem:[#allocation1 + $0x1] ss:$4 sm:$0xff] %v3933_v22 }
 0x36d   :  { %600 = vst [vmem:[#allocation1 + $0x2] ss:$4 sm:$0xff] %v3937_v24 }
 0x36e   :  { %602 = vst [vmem:[#allocation1 + $0x3] ss:$4 sm:$0xff] %v3903_v11 }
 0x370   :  { %v3964_v31 = vld.sshfl [vmem:[#allocation1 + $0x20] sm:$0xff pattern:$0x73625140] }
 0x371   :  { %800 = vst [vmem:[#allocation1 + $0x20] ss:$4 sm:$0xff] %v3910_v13 }
 0x372   :  { %802 = vst [vmem:[#allocation1 + $0x21] ss:$4 sm:$0xff] %v3913_v15 }
 0x373   :  { %804 = vst [vmem:[#allocation1 + $0x22] ss:$4 sm:$0xff] %v3916_v17 }
 0x374   :  { %806 = vst [vmem:[#allocation1 + $0x23] ss:$4 sm:$0xff] %v3918_v12 }
 0x375   :  { %v611_v34 = vld.sshfl [vmem:[#allocation1] sm:$0xff pattern:$0x73625140] }
 0x376   :  { %613 = vst [vmem:[#allocation1] ss:$4 sm:$0xff] %v3948_v25 }
 0x37b   :  { %v3971_v21 = vld.sshfl [vmem:[#allocation1 + $0x20] sm:$0xff pattern:$0x73625140] }
 0x37c   :  { %864 = vst [vmem:[#allocation1 + $0x20] ss:$4 sm:$0xff] %v3875_v1 }
 0x37d   :  { %v614_v35 = vld.sshfl [vmem:[#allocation1] sm:$0xff pattern:$0x73625140]  ;;  %866 = vst [vmem:[#allocation1 + $0x21] ss:$4 sm:$0xff] %v3878_v2 }
 0x37e   :  { %727 = vst [vmem:[#allocation1] ss:$4 sm:$0xff] %v3860_v46  ;;  %619 = vrot.lane.b32.xlu2 %v614_v35, %s3516_s5 }
 0x37f   :  { %729 = vst [vmem:[#allocation1 + $0x1] ss:$4 sm:$0xff] %v3863_v62 }
 0x380   :  { %731 = vst [vmem:[#allocation1 + $0x2] ss:$4 sm:$0xff] %v3866_v63 }
 0x381   :  { %733 = vst [vmem:[#allocation1 + $0x3] ss:$4 sm:$0xff] %v3869_v38 }
 0x382   :  { %868 = vst [vmem:[#allocation1 + $0x22] ss:$4 sm:$0xff] %v3881_v3 }
 0x383   :  { %870 = vst [vmem:[#allocation1 + $0x23] ss:$4 sm:$0xff] %v3884_v4 }
 0x386   :  { %615 = vrot.lane.b32.xlu2 %v611_v34, %s3516_s5 }
 0x388   :  { %v3983_v36 = vld.sshfl [vmem:[#allocation1] sm:$0xff pattern:$0x73625140] }
 0x389   :  { %744 = vst [vmem:[#allocation1] ss:$4 sm:$0xff] %v3890_v6  ;;  %v3276_v0 = vpack.i.bf16 %v3983_v36, %v3964_v31  ;;  %v292_v36 = vld [vmem:[%s5182_s2 + $0x28] sm:$0x3] }
 0x38a   :  { %v872_v37 = vld.sshfl [vmem:[#allocation1 + $0x20] sm:$0xff pattern:$0x73625140] }
 0x38b   :  { %889 = vst [vmem:[#allocation1 + $0x20] ss:$4 sm:$0xff] %v3875_v1 }
 0x38c   :  { %891 = vst [vmem:[#allocation1 + $0x21] ss:$4 sm:$0xff] %v3878_v2 }
 0x38d   :  { %893 = vst [vmem:[#allocation1 + $0x22] ss:$4 sm:$0xff] %v3881_v3 }
 0x38e   :  { %895 = vst [vmem:[#allocation1 + $0x23] ss:$4 sm:$0xff] %v3884_v4 }
 0x390   :  { %v3990_v39 = vld.sshfl [vmem:[#allocation1] sm:$0xff pattern:$0x73625140] }
 0x391   :  { %792 = vst [vmem:[#allocation1] ss:$4 sm:$0xff] %v3928_v20 }
 0x392   :  { %794 = vst [vmem:[#allocation1 + $0x1] ss:$4 sm:$0xff] %v3933_v22 }
 0x393   :  { %796 = vst [vmem:[#allocation1 + $0x2] ss:$4 sm:$0xff] %v3937_v24 }
 0x394   :  { %798 = vst [vmem:[#allocation1 + $0x3] ss:$4 sm:$0xff] %v3903_v11 }
 0x395   :  { %v897_v40 = vld.sshfl [vmem:[#allocation1 + $0x20] sm:$0xff pattern:$0x73625140] }
 0x396   :  { %952 = vst [vmem:[#allocation1 + $0x20] ss:$4 sm:$0xff] %v3910_v13  ;;  %902 = vrot.lane.b32.xlu0 %v897_v40, %s3517_s30 }
 0x397   :  { %954 = vst [vmem:[#allocation1 + $0x21] ss:$4 sm:$0xff] %v3913_v15 }
 0x398   :  { %956 = vst [vmem:[#allocation1 + $0x22] ss:$4 sm:$0xff] %v3916_v17 }
 0x399   :  { %958 = vst [vmem:[#allocation1 + $0x23] ss:$4 sm:$0xff] %v3918_v12 }
 0x39b   :  { %v4001_v42 = vld.sshfl [vmem:[#allocation1] sm:$0xff pattern:$0x73625140] }
 0x39c   :  { %809 = vst [vmem:[#allocation1] ss:$4 sm:$0xff] %v3948_v25 }
 0x3a0   :  { %v4004_v43 = vld.sshfl [vmem:[#allocation1 + $0x20] sm:$0xff pattern:$0x73625140] }
 0x3a1   :  { %977 = vst [vmem:[#allocation1 + $0x20] ss:$4 sm:$0xff] %v3910_v13 }
 0x3a2   :  { %979 = vst [vmem:[#allocation1 + $0x21] ss:$4 sm:$0xff] %v3913_v15 }
 0x3a3   :  { %v4008_v44 = vld.sshfl [vmem:[#allocation1] sm:$0xff pattern:$0x73625140]  ;;  %981 = vst [vmem:[#allocation1 + $0x22] ss:$4 sm:$0xff] %v3916_v17 }
 0x3a4   :  { %856 = vst [vmem:[#allocation1] ss:$4 sm:$0xff] %v3860_v46 }
 0x3a5   :  { %858 = vst [vmem:[#allocation1 + $0x1] ss:$4 sm:$0xff] %v3863_v62 }
 0x3a6   :  { %860 = vst [vmem:[#allocation1 + $0x2] ss:$4 sm:$0xff] %v3866_v63 }
 0x3a7   :  { %862 = vst [vmem:[#allocation1 + $0x3] ss:$4 sm:$0xff] %v3869_v38 }
 0x3a8   :  { %983 = vst [vmem:[#allocation1 + $0x23] ss:$4 sm:$0xff] %v3918_v12 }
 0x3ae   :  { %v871_v41 = vld.sshfl [vmem:[#allocation1] sm:$0xff pattern:$0x73625140] }
 0x3af   :  { %873 = vst [vmem:[#allocation1] ss:$4 sm:$0xff] %v3890_v6  ;;  %v985_v47 = vld.sshfl [vmem:[#allocation1 + $0x20] sm:$0xff pattern:$0x73625140] }
 0x3b0   :  { %1106 = vst [vmem:[#allocation1 + $0x20] ss:$4 sm:$0xff] %v3875_v1 }
 0x3b1   :  { %1108 = vst [vmem:[#allocation1 + $0x21] ss:$4 sm:$0xff] %v3878_v2 }
 0x3b2   :  { %1110 = vst [vmem:[#allocation1 + $0x22] ss:$4 sm:$0xff] %v3881_v3  ;;  %v537_v49 = vpop.permute.xlu2 %536 }
 0x3b3   :  { %1112 = vst [vmem:[#allocation1 + $0x23] ss:$4 sm:$0xff] %v3884_v4  ;;  %3124 = vmatpush.xpose.msk.msra.mxu2 %vm538_vm7, %v537_v49 }
 0x3b6   :  { %v874_v48 = vld.sshfl [vmem:[#allocation1] sm:$0xff pattern:$0x73625140] }
 0x3b7   :  { %881 = vst [vmem:[#allocation1] ss:$4 sm:$0xff] %v3860_v46 }
 0x3b8   :  { %883 = vst [vmem:[#allocation1 + $0x1] ss:$4 sm:$0xff] %v3863_v62 }
 0x3b9   :  { %885 = vst [vmem:[#allocation1 + $0x2] ss:$4 sm:$0xff] %v3866_v63 }
 0x3ba   :  { %887 = vst [vmem:[#allocation1 + $0x3] ss:$4 sm:$0xff] %v3869_v38  ;;  %v4026_v50 = vld.sshfl [vmem:[#allocation1 + $0x20] sm:$0xff pattern:$0x73625140] }
 0x3bb   :  { %1170 = vst [vmem:[#allocation1 + $0x20] ss:$4 sm:$0xff] %v3910_v13 }
 0x3bc   :  { %1172 = vst [vmem:[#allocation1 + $0x21] ss:$4 sm:$0xff] %v3913_v15 }
 0x3bd   :  { %1174 = vst [vmem:[#allocation1 + $0x22] ss:$4 sm:$0xff] %v3916_v17 }
 0x3be   :  { %1176 = vst [vmem:[#allocation1 + $0x23] ss:$4 sm:$0xff] %v3918_v12  ;;  %v535_v52 = vpop.permute.xlu0 %534 }
 0x3bf   :  { %3125 = vmatpush.xpose.msk.msra.mxu2 %vm538_vm7, %v535_v52 }
 0x3c1   :  { %v896_v26 = vld.sshfl [vmem:[#allocation1] sm:$0xff pattern:$0x73625140] }
 0x3c2   :  { %898 = vst [vmem:[#allocation1] ss:$4 sm:$0xff] %v3890_v6  ;;  %900 = vrot.lane.b32.xlu2 %v896_v26, %s3517_s30  ;;  %v533_v53 = vpop.permute.xlu1 %532 }
 0x3c3   :  { %3126 = vmatpush.xpose.msk.msra.mxu2 %vm538_vm7, %v533_v53 }
 0x3c6   :  { %3127 = vmatmul.msk.f32.vlgmr.msra.gmra.mxu2 %vm538_vm7, %v3892_v51 }
 0x3c9   :  { %v899_v54 = vld.sshfl [vmem:[#allocation1] sm:$0xff pattern:$0x73625140] }
 0x3ca   :  { %944 = vst [vmem:[#allocation1] ss:$4 sm:$0xff] %v3928_v20  ;;  %904 = vrot.lane.b32.xlu1 %v899_v54, %s3517_s30  ;;  %877 = vrot.lane.b32.xlu2 %v872_v37, %s3518_s24  ;;  %v291_v37 = vld [vmem:[%s5182_s2 + $0x20] sm:$0xff] }
 0x3cb   :  { %946 = vst [vmem:[#allocation1 + $0x1] ss:$4 sm:$0xff] %v3933_v22 }
 0x3cc   :  { %948 = vst [vmem:[#allocation1 + $0x2] ss:$4 sm:$0xff] %v3937_v24 }
 0x3cd   :  { %950 = vst [vmem:[#allocation1 + $0x3] ss:$4 sm:$0xff] %v3903_v11 }
 0x3ce   :  { %3128 = vmatmul.msk.f32.gmra.mxu2 %vm538_vm7, %v3895_v8 }
 0x3d2   :  { %875 = vrot.lane.b32.xlu1 %v871_v41, %s3518_s24 }
 0x3d4   :  { %v959_v55 = vld.sshfl [vmem:[#allocation1] sm:$0xff pattern:$0x73625140] }
 0x3d5   :  { %961 = vst [vmem:[#allocation1] ss:$4 sm:$0xff] %v3948_v25  ;;  %963 = vrot.lane.b32.xlu2 %v959_v55, %s3518_s24 }
 0x3d6   :  { %3129 = vmatmul.msk.f32.gmra.mxu2 %vm538_vm7, %v3901_v10 }
 0x3d8   :  { %v620_v57 = vpop.permute.xlu2 %619  ;;  %v618_v59 = vpop.permute.xlu0 %617 }
 0x3d9   :  { %3130 = vmatpush.xpose.msk.msrb.mxu0 %vm538_vm7, %v620_v57  ;;  %3266 = vmatpush.xpose.msk.msra.mxu3 %vm538_vm7, %v620_v57 }
 0x3da   :  { %990 = vrot.lane.b32.xlu1 %v985_v47, %s3517_s30 }
 0x3dc   :  { %v962_v58 = vld.sshfl [vmem:[#allocation1] sm:$0xff pattern:$0x73625140] }
 0x3dd   :  { %969 = vst [vmem:[#allocation1] ss:$4 sm:$0xff] %v3928_v20  ;;  %967 = vrot.lane.b32.xlu2 %v962_v58, %s3518_s24  ;;  %3131 = vmatpush.xpose.msk.msrb.mxu0 %vm538_vm7, %v618_v59 }
 0x3de   :  { %971 = vst [vmem:[#allocation1 + $0x1] ss:$4 sm:$0xff] %v3933_v22  ;;  %3267 = vmatpush.xpose.msk.msra.mxu3 %vm538_vm7, %v618_v59 }
 0x3df   :  { %973 = vst [vmem:[#allocation1 + $0x2] ss:$4 sm:$0xff] %v3937_v24 }
 0x3e0   :  { %975 = vst [vmem:[#allocation1 + $0x3] ss:$4 sm:$0xff] %v3903_v11  ;;  %v616_v32 = vpop.permute.xlu2 %615 }
 0x3e1   :  { %3132 = vmatpush.xpose.msk.msrb.mxu0 %vm538_vm7, %v616_v32 }
 0x3e2   :  { %879 = vrot.lane.b32.xlu1 %v874_v48, %s3518_s24  ;;  %3268 = vmatpush.xpose.msk.msra.mxu3 %vm538_vm7, %v616_v32 }
 0x3e4   :  { %3133 = vmatmul.msk.f32.vlgmr.msrb.gmra.mxu0 %vm538_vm7, %v3950_v27  ;;  %v290_v27 = vld [vmem:[%s5182_s2 + $0x18] sm:$0xff] }
 0x3e5   :  { %750 = vrot.lane.b32.xlu2 %v3990_v39, %s5206_s25  ;;  %3135 = vmatmul.msk.f32.vlgmr.msra.gmra.mxu3 %vm538_vm7, %v3958_v30 }
 0x3e7   :  { %v984_v60 = vld.sshfl [vmem:[#allocation1] sm:$0xff pattern:$0x73625140] }
 0x3e8   :  { %986 = vst [vmem:[#allocation1] ss:$4 sm:$0xff] %v3948_v25 }
 0x3ea   :  { %3277 = vrot.lane.b32.xlu1 %v3276_v0, %s5206_s25 }
 0x3ec   :  { %3134 = vmatmul.msk.f32.gmra.mxu0 %vm538_vm7, %v3930_v16 }
 0x3ef   :  { %v987_v1 = vld.sshfl [vmem:[#allocation1] sm:$0xff pattern:$0x73625140] }
 0x3f0   :  { %1098 = vst [vmem:[#allocation1] ss:$4 sm:$0xff] %v3860_v46  ;;  %992 = vrot.lane.b32.xlu0 %v987_v1, %s3517_s30 }
 0x3f1   :  { %1100 = vst [vmem:[#allocation1 + $0x1] ss:$4 sm:$0xff] %v3863_v62  ;;  %v3281_v62 = vpack.i.bf16 %v4001_v42, %v3971_v21 }
 0x3f2   :  { %1102 = vst [vmem:[#allocation1 + $0x2] ss:$4 sm:$0xff] %v3866_v63 }
 0x3f3   :  { %1104 = vst [vmem:[#allocation1 + $0x3] ss:$4 sm:$0xff] %v3869_v38 }
 0x3f8   :  { %988 = vrot.lane.b32.xlu0 %v984_v60, %s3517_s30 }
 0x3fa   :  { %v4082_v2 = vld.sshfl [vmem:[#allocation1] sm:$0xff pattern:$0x73625140] }
 0x3fb   :  { %1115 = vst [vmem:[#allocation1] ss:$4 sm:$0xff] %v3890_v6 }
 0x400   :  { %965 = vrot.lane.b32.xlu0 %v4004_v43, %s3518_s24 }
 0x402   :  { %v4087_v3 = vld.sshfl [vmem:[#allocation1] sm:$0xff pattern:$0x73625140] }
 0x403   :  { %1162 = vst [vmem:[#allocation1] ss:$4 sm:$0xff] %v3928_v20 }
 0x404   :  { %1164 = vst [vmem:[#allocation1 + $0x1] ss:$4 sm:$0xff] %v3933_v22 }
 0x405   :  { %1166 = vst [vmem:[#allocation1 + $0x2] ss:$4 sm:$0xff] %v3937_v24 }
 0x406   :  { %1168 = vst [vmem:[#allocation1 + $0x3] ss:$4 sm:$0xff] %v3903_v11  ;;  %v287_v11 = vld [vmem:[%s5182_s2] sm:$0xff] }
 0x408   :  { %815 = vrot.lane.b32.xlu0 %v4008_v44, %s5206_s25  ;;  %v903_v8 = vpop.permute.xlu0 %902 }
 0x40d   :  { %v4095_v46 = vld.sshfl [vmem:[#allocation1] sm:$0xff pattern:$0x73625140] }
 0x40e   :  { %1179 = vst [vmem:[#allocation1] ss:$4 sm:$0xff] %v3948_v25 }
 0x410   :  { %3282 = vrot.lane.b32.xlu0 %v3281_v62, %s5206_s25  ;;  %s5226_s25 = smov 16  }
 0x41c   :  { %v901_v63 = vpop.permute.xlu2 %900 }
 0x424   :  { %v878_v38 = vpop.permute.xlu2 %877 }
 0x42f   :  { %v964_v4 = vpop.permute.xlu2 %963 }
 0x437   :  { %v4101_v5 = vpop.permute.xlu2 %967 }
 0x43c   :  { %v905_v6 = vpop.permute.xlu1 %904 }
 0x43d   :  { %3144 = vmatpush.xpose.msk.msra.mxu0 %vm538_vm7, %v905_v6 }
 0x43f   :  { %v751_v51 = vpop.permute.xlu2 %750 }
 0x440   :  { %3136 = vmatpush.msk.msrb.mxu2 %vm763_vm8, %v751_v51 }
 0x441   :  { %3145 = vmatpush.xpose.msk.msra.mxu0 %vm538_vm7, %v903_v8 }
 0x444   :  { %v876_v9 = vpop.permute.xlu1 %875 }
 0x445   :  { %3146 = vmatpush.xpose.msk.msra.mxu0 %vm538_vm7, %v901_v63 }
 0x448   :  { %3147 = vmatmul.msk.f32.vlgmr.msra.gmra.mxu0 %vm538_vm7, %v876_v9 }
 0x449   :  { %v568_v13 = vpop.f32.mrf.mxu2 }
 0x44a   :  { %v569_v15 = vadd.f32 %v568_v13, %v287_v11 }
 0x44c   :  { %v991_v10 = vpop.permute.xlu1 %990  ;;  %v660_v17 = vsel %vm659_vm9, %v569_v15, -inf }
 0x44d   :  { %661 = vmax.xlane.f32.xlu1 %v660_v17 }
 0x450   :  { %3148 = vmatmul.msk.f32.gmra.mxu0 %vm538_vm7, %v878_v38 }
 0x451   :  { %v571_v12 = vpop.f32.mrf.mxu2 }
 0x452   :  { %v4117_v19 = vadd.f32 %v571_v12, %v288_v56 }
 0x454   :  { %v880_v18 = vpop.permute.xlu1 %879  ;;  %v663_v20 = vsel %vm659_vm9, %v4117_v19, -inf }
 0x455   :  { %664 = vmax.xlane.f32.xlu0 %v663_v20 }
 0x458   :  { %3149 = vmatmul.msk.f32.gmra.mxu0 %vm538_vm7, %v880_v18 }
 0x459   :  { %v574_v25 = vpop.f32.mrf.mxu2 }
 0x45a   :  { %v4127_v29 = vadd.f32 %v574_v25, %v289_v23 }
 0x45c   :  { %v3278_v16 = vpop.permute.xlu1 %3277  ;;  %v667_v21 = vsel %vm666_vm10, %v4127_v29, -inf }
 0x45d   :  { %v3279_v22 = vunpack.i.l.bf16 %v3278_v16  ;;  %v3280_v24 = vunpack.i.h.bf16 %v3278_v16  ;;  %668 = vmax.xlane.f32.xlu2 %v667_v21 }
 0x45f   :  { %780 = vmatpush.msrb.mxu2 %v3279_v22 }
 0x461   :  { %781 = vmatpush.msrb.mxu2 %v3280_v24  ;;  %v650_v30 = vpop.f32.mrf.mxu0 }
 0x462   :  { %v993_v31 = vpop.permute.xlu0 %992  ;;  %v4129_v34 = vadd.f32 %v650_v30, %v290_v27  ;;  %v3286_v30 = vpack.i.bf16 %v4082_v2, %v4026_v50  ;;  %v1180_v50 = vld.sshfl [vmem:[#allocation1] sm:$0xff pattern:$0x73625140] }
 0x463   :  { %3150 = vmatpush.xpose.msk.msrb.mxu1 %vm538_vm7, %v993_v31 }
 0x464   :  { %v670_v35 = vsel %vm659_vm9, %v4129_v34, -inf }
 0x465   :  { %671 = vmax.xlane.f32.xlu1 %v670_v35 }
 0x467   :  { %3151 = vmatpush.xpose.msk.msrb.mxu1 %vm538_vm7, %v991_v10 }
 0x468   :  { %v656_v39 = vpop.f32.mrf.mxu3 }
 0x469   :  { %v4143_v40 = vadd.f32 %v656_v39, %v292_v36  ;;  %v653_v42 = vpop.f32.mrf.mxu0 }
 0x46a   :  { %v989_v43 = vpop.permute.xlu0 %988  ;;  %v654_v44 = vadd.f32 %v653_v42, %v291_v37 }
 0x46b   :  { %3152 = vmatpush.xpose.msk.msrb.mxu1 %vm538_vm7, %v989_v43  ;;  %v676_v47 = vsel %vm666_vm10, %v4143_v40, -inf }
 0x46c   :  { %v673_v41 = vsel %vm659_vm9, %v654_v44, -inf }
 0x46d   :  { %674 = vmax.xlane.f32.xlu0 %v673_v41  ;;  %677 = vmax.xlane.f32.xlu1 %v676_v47 }
 0x46e   :  { %3153 = vmatmul.msk.f32.vlgmr.msrb.gmra.mxu1 %vm538_vm7, %v964_v4 }
 0x472   :  { %v966_v48 = vpop.permute.xlu0 %965 }
 0x476   :  { %3154 = vmatmul.msk.f32.gmra.mxu1 %vm538_vm7, %v966_v48 }
 0x47a   :  { %v816_v49 = vpop.permute.xlu0 %815 }
 0x47b   :  { %3140 = vmatpush.msk.msrb.mxu3 %vm763_vm8, %v816_v49 }
 0x47e   :  { %3155 = vmatmul.msk.f32.gmra.mxu1 %vm538_vm7, %v4101_v5 }
 0x482   :  { %v3283_v26 = vpop.permute.xlu0 %3282 }
 0x483   :  { %v3284_v52 = vunpack.i.l.bf16 %v3283_v26  ;;  %v3285_v53 = vunpack.i.h.bf16 %v3283_v26 }
 0x485   :  { %844 = vmatpush.msrb.mxu3 %v3284_v52 }
 0x487   :  { %845 = vmatpush.msrb.mxu3 %v3285_v53 }
 0x4c0   :  { %v662_v57 = vpop.xlane.xlu1 %661 }
 0x4c1   :  { %v679_v58 = vsub.f32 %v569_v15, %v662_v57 }
 0x4c3   :  { %v685_v32 = vmul.f32 1.442695, %v679_v58 }
 0x4c5   :  { %v935_v54 = vpop.f32.mrf.mxu0  ;;  %3359 = vpow2.f32 %v685_v32 }
 0x4c6   :  { %v4154_v55 = vadd.f32 %v935_v54, %v287_v11 }
 0x4c8   :  { %v1032_v59 = vsel %vm659_vm9, %v4154_v55, -inf  ;;  %v665_v6 = vpop.xlane.xlu0 %664 }
 0x4c9   :  { %1033 = vmax.xlane.f32.xlu2 %v1032_v59  ;;  %v680_v9 = vsub.f32 %v4117_v19, %v665_v6 }
 0x4cb   :  { %v4162_v62 = vpop.eup %3359  ;;  %v687_v11 = vmul.f32 1.442695, %v680_v9 }
 0x4cc   :  { %v697_v4 = vsel %vm659_vm9, %v4162_v62, 0.0 }
 0x4cd   :  { %v938_v60 = vpop.f32.mrf.mxu0  ;;  %3361 = vpow2.f32 %v687_v11 }
 0x4ce   :  { %v4158_v0 = vadd.f32 %v938_v60, %v288_v56 }
 0x4d0   :  { %v1035_v1 = vsel %vm659_vm9, %v4158_v0, -inf  ;;  %v669_v13 = vpop.xlane.xlu2 %668 }
 0x4d1   :  { %1036 = vmax.xlane.f32.xlu0 %v1035_v1  ;;  %v681_v18 = vsub.f32 %v4127_v29, %v669_v13 }
 0x4d3   :  { %v689_v12 = vmul.f32 1.442695, %v681_v18  ;;  %v4180_v16 = vpop.eup %3361 }
 0x4d4   :  { %v700_v25 = vsel %vm659_vm9, %v4180_v16, 0.0 }
 0x4d5   :  { %v941_v63 = vpop.f32.mrf.mxu0  ;;  %3363 = vpow2.f32 %v689_v12 }
 0x4d6   :  { %v4164_v38 = vadd.f32 %v941_v63, %v289_v23 }
 0x4d8   :  { %v1038_v5 = vsel %vm666_vm10, %v4164_v38, -inf }
 0x4d9   :  { %1039 = vmax.xlane.f32.xlu1 %v1038_v5  ;;  %698 = vadd.xlane.f32.xlu0 %v697_v4 }
 0x4db   :  { %v4188_v29 = vpop.eup %3363 }
 0x4dc   :  { %v703_v31 = vsel %vm666_vm10, %v4188_v29, 0.0 }
 0x4e0   :  { %v675_v20 = vpop.xlane.xlu0 %674 }
 0x4e1   :  { %v683_v23 = vsub.f32 %v654_v44, %v675_v20 }
 0x4eb   :  { %v1023_v51 = vpop.f32.mrf.mxu1 }
 0x4ec   :  { %v4170_v8 = vadd.f32 %v1023_v51, %v290_v27  ;;  %v693_v27 = vmul.f32 1.442695, %v683_v23 }
 0x4ee   :  { %v1041_v10 = vsel %vm659_vm9, %v4170_v8, -inf  ;;  %3365 = vpow2.f32 %v693_v27 }
 0x4ef   :  { %1042 = vmax.xlane.f32.xlu2 %v1041_v10 }
 0x4f3   :  { %v1026_v15 = vpop.f32.mrf.mxu1 }
 0x4f4   :  { %v4175_v17 = vadd.f32 %v1026_v15, %v291_v37  ;;  %v4195_v21 = vpop.eup %3365 }
 0x4f5   :  { %v709_v35 = vsel %vm659_vm9, %v4195_v21, 0.0 }
 0x4f6   :  { %v1044_v56 = vsel %vm659_vm9, %v4175_v17, -inf }
 0x4f7   :  { %1045 = vmax.xlane.f32.xlu0 %v1044_v56 }
 0x4fb   :  { %v1029_v19 = vpop.f32.mrf.mxu1 }
 0x4fc   :  { %v4182_v22 = vadd.f32 %v1029_v19, %v292_v36  ;;  %v672_v36 = vpop.xlane.xlu1 %671 }
 0x4fd   :  { %v682_v37 = vsub.f32 %v4129_v34, %v672_v36 }
 0x4fe   :  { %v1047_v24 = vsel %vm666_vm10, %v4182_v22, -inf }
 0x4ff   :  { %1048 = vmax.xlane.f32.xlu1 %v1047_v24  ;;  %701 = vadd.xlane.f32.xlu0 %v700_v25  ;;  %v691_v2 = vmul.f32 1.442695, %v682_v37  ;;  %v1178_v24 = vld.sshfl [vmem:[#allocation1 + $0x20] sm:$0xff pattern:$0x73625140] }
 0x500   :  { %v3291_v27 = vpack.i.bf16 %v4095_v46, %v1178_v24 }
 0x501   :  { %3367 = vpow2.f32 %v691_v2 }
 0x504   :  { %v678_v42 = vpop.xlane.xlu1 %677 }
 0x505   :  { %v684_v44 = vsub.f32 %v4143_v40, %v678_v42 }
 0x507   :  { %3287 = vrot.lane.b32.xlu2 %v3286_v30, %s5202_s1  ;;  %704 = vadd.xlane.f32.xlu0 %v703_v31  ;;  %v4203_v39 = vpop.eup %3367  ;;  %v695_v41 = vmul.f32 1.442695, %v684_v44 }
 0x508   :  { %v706_v43 = vsel %vm659_vm9, %v4203_v39, 0.0 }
 0x509   :  { %3369 = vpow2.f32 %v695_v41 }
 0x50f   :  { %710 = vadd.xlane.f32.xlu0 %v709_v35  ;;  %v4209_v34 = vpop.eup %3369 }
 0x510   :  { %v712_v49 = vsel %vm666_vm10, %v4209_v34, 0.0 }
 0x518   :  { %1121 = vrot.lane.b32.xlu1 %v4087_v3, %s5202_s1 }
 0x523   :  { %1185 = vrot.lane.b32.xlu0 %v1180_v50, %s5202_s1 }
 0x530   :  { %707 = vadd.xlane.f32.xlu2 %v706_v43 }
 0x53c   :  { %v1034_v3 = vpop.xlane.xlu2 %1033 }
 0x53d   :  { %v1050_v47 = vsub.f32 %v4154_v55, %v1034_v3 }
 0x53f   :  { %v1056_v48 = vmul.f32 1.442695, %v1050_v47 }
 0x541   :  { %3371 = vpow2.f32 %v1056_v48 }
 0x542   :  { %713 = vadd.xlane.f32.xlu1 %v712_v49 }
 0x544   :  { %v1037_v26 = vpop.xlane.xlu0 %1036 }
 0x545   :  { %v1051_v52 = vsub.f32 %v4158_v0, %v1037_v26 }
 0x547   :  { %v4214_v53 = vpop.eup %3371  ;;  %v1058_v40 = vmul.f32 1.442695, %v1051_v52 }
 0x548   :  { %v1068_v54 = vsel %vm659_vm9, %v4214_v53, 0.0 }
 0x549   :  { %3373 = vpow2.f32 %v1058_v40  ;;  %1069 = vadd.xlane.f32.xlu2 %v1068_v54 }
 0x54c   :  { %v1040_v55 = vpop.xlane.xlu1 %1039  ;;  %v699_v57 = vpop.xlane.xlu0 %698 }
 0x54d   :  { %v1052_v58 = vsub.f32 %v4164_v38, %v1040_v55  ;;  %3375 = vrcp.f32 %v699_v57 }
 0x54f   :  { %v4219_v59 = vpop.eup %3373  ;;  %v1060_v32 = vmul.f32 1.442695, %v1052_v58 }
 0x550   :  { %v1071_v60 = vsel %vm659_vm9, %v4219_v59, 0.0 }
 0x551   :  { %3377 = vpow2.f32 %v1060_v32  ;;  %1072 = vadd.xlane.f32.xlu2 %v1071_v60 }
 0x553   :  { %v3376_v0 = vpop.eup %3375 }
 0x554   :  { %v721_v1 = vmul.f32 %v3376_v0, %v4162_v62 }
 0x556   :  { %3137 = vmatmul.msk.f32.vlgmr.msrb.gmra.mxu2 %vm659_vm9, %v721_v1 }
 0x557   :  { %v4225_v63 = vpop.eup %3377 }
 0x558   :  { %v1074_v4 = vsel %vm666_vm10, %v4225_v63, 0.0 }
 0x559   :  { %1075 = vadd.xlane.f32.xlu0 %v1074_v4 }
 0x562   :  { %v1043_v38 = vpop.xlane.xlu2 %1042 }
 0x563   :  { %v1053_v5 = vsub.f32 %v4170_v8, %v1043_v38 }
 0x565   :  { %v1062_v6 = vmul.f32 1.442695, %v1053_v5 }
 0x567   :  { %3379 = vpow2.f32 %v1062_v6 }
 0x56a   :  { %v1046_v51 = vpop.xlane.xlu0 %1045 }
 0x56b   :  { %v1054_v9 = vsub.f32 %v4175_v17, %v1046_v51 }
 0x56d   :  { %v4231_v10 = vpop.eup %3379  ;;  %v1064_v11 = vmul.f32 1.442695, %v1054_v9 }
 0x56e   :  { %v1077_v62 = vsel %vm659_vm9, %v4231_v10, 0.0 }
 0x56f   :  { %3381 = vpow2.f32 %v1064_v11  ;;  %1078 = vadd.xlane.f32.xlu0 %v1077_v62 }
 0x572   :  { %v1049_v13 = vpop.xlane.xlu1 %1048  ;;  %v702_v15 = vpop.xlane.xlu0 %701 }
 0x573   :  { %v1055_v18 = vsub.f32 %v4182_v22, %v1049_v13  ;;  %3383 = vrcp.f32 %v702_v15 }
 0x575   :  { %v4236_v56 = vpop.eup %3381  ;;  %v1066_v8 = vmul.f32 1.442695, %v1055_v18 }
 0x576   :  { %v1080_v12 = vsel %vm659_vm9, %v4236_v56, 0.0 }
 0x577   :  { %3385 = vpow2.f32 %v1066_v8  ;;  %1081 = vadd.xlane.f32.xlu1 %v1080_v12  ;;  %v1277_v8 = vld [vmem:[%s5184_s11 + $0x18] sm:$0xff]  ;;  %v1276_v12 = vld [vmem:[%s5184_s11 + $0x10] sm:$0xff] }
 0x578   :  { %1330 = vmatpush.msrb.mxu0 %v1277_v8 }
 0x579   :  { %v3384_v17 = vpop.eup %3383 }
 0x57a   :  { %v705_v20 = vpop.xlane.xlu0 %704  ;;  %v722_v19 = vmul.f32 %v3384_v17, %v4180_v16  ;;  %v3288_v16 = vpop.permute.xlu2 %3287  ;;  %1331 = vmatpush.msrb.mxu0 %v1276_v12  ;;  %v1275_v17 = vld [vmem:[%s5184_s11 + $0x8] sm:$0xff] }
 0x57b   :  { %3387 = vrcp.f32 %v705_v20  ;;  %v3289_v35 = vunpack.i.l.bf16 %v3288_v16  ;;  %v3290_v36 = vunpack.i.h.bf16 %v3288_v16  ;;  %v1274_v20 = vld [vmem:[%s5184_s11] sm:$0xff] }
 0x57c   :  { %3138 = vmatmul.msk.f32.gmra.mxu2 %vm659_vm9, %v722_v19  ;;  %1332 = vmatpush.msrb.mxu0 %v1275_v17 }
 0x57d   :  { %v4242_v23 = vpop.eup %3385 }
 0x57e   :  { %v1083_v22 = vsel %vm666_vm10, %v4242_v23, 0.0  ;;  %1333 = vmatpush.msrb.mxu0 %v1274_v20 }
 0x57f   :  { %1084 = vadd.xlane.f32.xlu2 %v1083_v22 }
 0x581   :  { %v3388_v25 = vpop.eup %3387 }
 0x582   :  { %v723_v30 = vmul.f32 %v3388_v25, %v4188_v29  ;;  %v711_v37 = vpop.xlane.xlu0 %710 }
 0x583   :  { %3292 = vrot.lane.b32.xlu0 %v3291_v27, %s5202_s1 }
 0x584   :  { %3139 = vmatmul.msk.f32.gmra.mxu2 %vm659_vm9, %v723_v30 }
 0x58a   :  { %v1122_v31 = vpop.permute.xlu1 %1121 }
 0x58b   :  { %3156 = vmatpush.msk.msra.mxu2 %vm763_vm8, %v1122_v31 }
 0x58d   :  { %1150 = vmatpush.msra.mxu2 %v3289_v35 }
 0x58f   :  { %1151 = vmatpush.msra.mxu2 %v3290_v36 }
 0x595   :  { %v1186_v50 = vpop.permute.xlu0 %1185 }
 0x596   :  { %3160 = vmatpush.msk.msra.mxu3 %vm763_vm8, %v1186_v50 }
 0x5a3   :  { %v708_v2 = vpop.xlane.xlu2 %707 }
 0x5a4   :  { %3389 = vrcp.f32 %v708_v2 }
 0x5a5   :  { %3391 = vrcp.f32 %v711_v37 }
 0x5aa   :  { %v3390_v46 = vpop.eup %3389 }
 0x5ab   :  { %v724_v29 = vmul.f32 %v3390_v46, %v4203_v39  ;;  %v3392_v42 = vpop.eup %3391 }
 0x5ac   :  { %v725_v43 = vmul.f32 %v3392_v42, %v4195_v21 }
 0x5ad   :  { %3141 = vmatmul.msk.f32.vlgmr.msrb.gmra.mxu3 %vm659_vm9, %v724_v29 }
 0x5b5   :  { %v714_v44 = vpop.xlane.xlu1 %713  ;;  %3142 = vmatmul.msk.f32.gmra.mxu3 %vm659_vm9, %v725_v43 }
 0x5b6   :  { %3393 = vrcp.f32 %v714_v44 }
 0x5bc   :  { %v3394_v41 = vpop.eup %3393  ;;  %v1070_v3 = vpop.xlane.xlu2 %1069 }
 0x5bd   :  { %v726_v47 = vmul.f32 %v3394_v41, %v4209_v34  ;;  %3395 = vrcp.f32 %v1070_v3 }
 0x5bf   :  { %3143 = vmatmul.msk.f32.gmra.mxu3 %vm659_vm9, %v726_v47 }
 0x5c3   :  { %v3396_v48 = vpop.eup %3395 }
 0x5c4   :  { %v1092_v49 = vmul.f32 %v3396_v48, %v4214_v53  ;;  %v1073_v39 = vpop.xlane.xlu2 %1072 }
 0x5c5   :  { %3397 = vrcp.f32 %v1073_v39 }
 0x5c6   :  { %3157 = vmatmul.msk.f32.vlgmr.msra.gmra.mxu2 %vm659_vm9, %v1092_v49 }
 0x5cb   :  { %v3398_v26 = vpop.eup %3397 }
 0x5cc   :  { %v1076_v21 = vpop.xlane.xlu0 %1075  ;;  %v1093_v52 = vmul.f32 %v3398_v26, %v4219_v59 }
 0x5cd   :  { %3399 = vrcp.f32 %v1076_v21 }
 0x5ce   :  { %3158 = vmatmul.msk.f32.gmra.mxu2 %vm659_vm9, %v1093_v52 }
 0x5d3   :  { %v3400_v40 = vpop.eup %3399 }
 0x5d4   :  { %v1094_v34 = vmul.f32 %v3400_v40, %v4225_v63 }
 0x5d6   :  { %3159 = vmatmul.msk.f32.gmra.mxu2 %vm659_vm9, %v1094_v34  ;;  %v3323_v34 = vld [vmem:[%s5183_s12] ss:$0 sm:$0xff] }
 0x5d9   :  { %v783_v38 = vpop.f32.mrf.mxu2 }
 0x5e2   :  { %v1079_v54 = vpop.xlane.xlu0 %1078 }
 0x5e3   :  { %3401 = vrcp.f32 %v1079_v54 }
 0x5e9   :  { %v3402_v57 = vpop.eup %3401 }
 0x5ea   :  { %v1082_v55 = vpop.xlane.xlu1 %1081  ;;  %v1095_v60 = vmul.f32 %v3402_v57, %v4231_v10 }
 0x5eb   :  { %3403 = vrcp.f32 %v1082_v55 }
 0x5f1   :  { %v3404_v0 = vpop.eup %3403 }
 0x5f2   :  { %v1085_v59 = vpop.xlane.xlu2 %1084  ;;  %v1096_v1 = vmul.f32 %v3404_v0, %v4236_v56 }
 0x5f3   :  { %3405 = vrcp.f32 %v1085_v59 }
 0x5f5   :  { %v3293_v53 = vpop.permute.xlu0 %3292 }
 0x5f6   :  { %v3294_v58 = vunpack.i.l.bf16 %v3293_v53  ;;  %v3295_v32 = vunpack.i.h.bf16 %v3293_v53 }
 0x5f8   :  { %1214 = vmatpush.msra.mxu3 %v3294_v58 }
 0x5f9   :  { %v3406_v63 = vpop.eup %3405 }
 0x5fa   :  { %1215 = vmatpush.msra.mxu3 %v3295_v32  ;;  %v1097_v4 = vmul.f32 %v3406_v63, %v4242_v23 }
 0x5fb   :  { %3161 = vmatmul.msk.f32.vlgmr.msra.gmra.mxu3 %vm659_vm9, %v1095_v60 }
 0x5ff   :  { %v786_v5 = vpop.f32.mrf.mxu2 }
 0x603   :  { %3162 = vmatmul.msk.f32.gmra.mxu3 %vm659_vm9, %v1096_v1 }
 0x607   :  { %v789_v6 = vpop.f32.mrf.mxu2 }
 0x60b   :  { %3163 = vmatmul.msk.f32.gmra.mxu3 %vm659_vm9, %v1097_v4 }
 0x630   :  { %v847_v11 = vpop.f32.mrf.mxu3 }
 0x638   :  { %v850_v62 = vpop.f32.mrf.mxu3 }
 0x642   :  { %v4273_v13 = vpop.f32.mrf.mxu3 }
 0x649   :  { %v1153_v51 = vpop.f32.mrf.mxu2 }
 0x64a   :  { %1232 = vrot.lane.b32.xlu0 %v1153_v51, %s5204_s7 }
 0x651   :  { %v1156_v9 = vpop.f32.mrf.mxu2 }
 0x652   :  { %1234 = vrot.lane.b32.xlu1 %v1156_v9, %s5204_s7 }
 0x659   :  { %v1159_v10 = vpop.f32.mrf.mxu2 }
 0x65a   :  { %1236 = vrot.lane.b32.xlu0 %v1159_v10, %s5204_s7 }
 0x67e   :  { %v1217_v15 = vpop.f32.mrf.mxu3 }
 0x67f   :  { %1238 = vrot.lane.b32.xlu2 %v1217_v15, %s5204_s7 }
 0x686   :  { %v1220_v18 = vpop.f32.mrf.mxu3 }
 0x687   :  { %1240 = vrot.lane.b32.xlu0 %v1220_v18, %s5204_s7 }
 0x68e   :  { %v1223_v56 = vpop.f32.mrf.mxu3 }
 0x68f   :  { %1242 = vrot.lane.b32.xlu0 %v1223_v56, %s5204_s7 }
 0x6bc   :  { %v1233_v19 = vpop.permute.xlu0 %1232 }
 0x6bd   :  { %v1250_v23 = vsel %vm538_vm7, %v783_v38, %v1233_v19 }
 0x6be   :  { %v1262_v22 = vrot.slane %v1250_v23, 2  ;;  %v1263_v24 = vrot.slane %v1250_v23, 4  ;;  %v1264_v25 = vrot.slane %v1250_v23, 6  ;;  %1278 = vst [vmem:[#allocation1] ss:$4 sm:$0xff] %v1250_v23 }
 0x6c0   :  { %1280 = vst [vmem:[#allocation1 + $0x1] ss:$4 sm:$0xff] %v1262_v22 }
 0x6c1   :  { %1282 = vst [vmem:[#allocation1 + $0x2] ss:$4 sm:$0xff] %v1263_v24 }
 0x6c2   :  { %1284 = vst [vmem:[#allocation1 + $0x3] ss:$4 sm:$0xff] %v1264_v25 }
 0x6c4   :  { %v1235_v27 = vpop.permute.xlu1 %1234 }
 0x6c5   :  { %v1251_v30 = vsel %vm538_vm7, %v786_v5, %v1235_v27 }
 0x6c6   :  { %v1265_v16 = vrot.slane %v1251_v30, 2  ;;  %v1266_v31 = vrot.slane %v1251_v30, 4  ;;  %v1267_v35 = vrot.slane %v1251_v30, 6  ;;  %1286 = vst [vmem:[#allocation1 + $0x20] ss:$4 sm:$0xff] %v1251_v30 }
 0x6c8   :  { %1288 = vst [vmem:[#allocation1 + $0x21] ss:$4 sm:$0xff] %v1265_v16 }
 0x6c9   :  { %v1293_v36 = vld.sshfl [vmem:[#allocation1] sm:$0xff pattern:$0x73625140]  ;;  %1290 = vst [vmem:[#allocation1 + $0x22] ss:$4 sm:$0xff] %v1266_v31 }
 0x6ca   :  { %1292 = vst [vmem:[#allocation1 + $0x23] ss:$4 sm:$0xff] %v1267_v35  ;;  %3164 = vmatmul.msk.f32.vlgmr.msrb.gmra.mxu0 %vm142_vm2, %v1293_v36 }
 0x6cc   :  { %v1237_v37 = vpop.permute.xlu0 %1236 }
 0x6cd   :  { %v1252_v50 = vsel %vm538_vm7, %v789_v6, %v1237_v37 }
 0x6ce   :  { %1295 = vst [vmem:[#allocation1] ss:$4 sm:$0xff] %v1252_v50  ;;  %v1495_v50 = vld [vmem:[%s5188_s15 + $0x18] sm:$0xff] }
 0x6cf   :  { %1527 = vmatpush.msra.mxu1 %v1495_v50 }
 0x6d1   :  { %v1294_v2 = vld.sshfl [vmem:[#allocation1 + $0x20] sm:$0xff pattern:$0x73625140] }
 0x6d2   :  { %3165 = vmatmul.msk.f32.gmra.mxu0 %vm142_vm2, %v1294_v2 }
 0x6d9   :  { %v1239_v46 = vpop.permute.xlu2 %1238 }
 0x6da   :  { %v1253_v29 = vsel %vm538_vm7, %v847_v11, %v1239_v46 }
 0x6db   :  { %v1268_v42 = vrot.slane %v1253_v29, 2  ;;  %v1269_v43 = vrot.slane %v1253_v29, 4  ;;  %v1270_v44 = vrot.slane %v1253_v29, 6  ;;  %1296 = vst [vmem:[#allocation1 + $0x1] ss:$4 sm:$0xff] %v1253_v29 }
 0x6dd   :  { %1297 = vst [vmem:[#allocation1 + $0x2] ss:$4 sm:$0xff] %v1268_v42 }
 0x6de   :  { %1298 = vst [vmem:[#allocation1 + $0x3] ss:$4 sm:$0xff] %v1269_v43 }
 0x6df   :  { %1299 = vst [vmem:[#allocation1 + $0x20] ss:$4 sm:$0xff] %v1270_v44  ;;  %v1494_v44 = vld [vmem:[%s5188_s15 + $0x10] sm:$0xff] }
 0x6e0   :  { %1528 = vmatpush.msra.mxu1 %v1494_v44 }
 0x6e5   :  { %v1303_v41 = vld.sshfl [vmem:[#allocation1] sm:$0xff pattern:$0x73625140] }
 0x6e6   :  { %3166 = vmatmul.msk.f32.gmra.mxu0 %vm142_vm2, %v1303_v41 }
 0x6f9   :  { %v1241_v3 = vpop.permute.xlu0 %1240 }
 0x6fa   :  { %v1254_v47 = vsel %vm538_vm7, %v850_v62, %v1241_v3 }
 0x6fb   :  { %v1271_v48 = vrot.slane %v1254_v47, 2  ;;  %v1272_v49 = vrot.slane %v1254_v47, 4  ;;  %v1273_v39 = vrot.slane %v1254_v47, 6  ;;  %1300 = vst [vmem:[#allocation1 + $0x21] ss:$4 sm:$0xff] %v1254_v47  ;;  %v1493_v47 = vld [vmem:[%s5188_s15 + $0x8] sm:$0xff] }
 0x6fc   :  { %1529 = vmatpush.msra.mxu1 %v1493_v47 }
 0x6fd   :  { %1301 = vst [vmem:[#allocation1 + $0x22] ss:$4 sm:$0xff] %v1271_v48 }
 0x6fe   :  { %1302 = vst [vmem:[#allocation1 + $0x23] ss:$4 sm:$0xff] %v1272_v49  ;;  %v1492_v49 = vld [vmem:[%s5188_s15] sm:$0xff] }
 0x6ff   :  { %1305 = vst [vmem:[#allocation1] ss:$4 sm:$0xff] %v1273_v39  ;;  %1530 = vmatpush.msra.mxu1 %v1492_v49 }
 0x701   :  { %v1243_v26 = vpop.permute.xlu0 %1242 }
 0x702   :  { %v1255_v21 = vsel %vm538_vm7, %v4273_v13, %v1243_v26 }
 0x703   :  { %1306 = vst [vmem:[#allocation1 + $0x1] ss:$4 sm:$0xff] %v1255_v21 }
 0x705   :  { %v1304_v52 = vld.sshfl [vmem:[#allocation1 + $0x20] sm:$0xff pattern:$0x73625140] }
 0x706   :  { %3167 = vmatmul.msk.f32.gmra.mxu0 %vm142_vm2, %v1304_v52 }
 0x70a   :  { %v1307_v40 = vld.sshfl [vmem:[#allocation1] sm:$0xff pattern:$0x73625140] }
 0x70e   :  { %3168 = vmatmul.msk.f32.gmra.mxu0 %vm142_vm2, %v1307_v40 }
 0x747   :  { %v1335_v54 = vpop.f32.mrf.mxu0 }
 0x748   :  { %v1350_v55 = vadd.f32 %v1335_v54, %v3730_v28  ;;  %v4378_v54 = vld [vmem:[%s5185_s13] ss:$0 sm:$0xff] }
 0x74a   :  { %v4306_v53 = vadd.f32 %v3323_v34, %v1350_v55 }
 0x74c   :  { %v1366_v57 = vsel %vm142_vm2, %v4306_v53, 0.0 }
 0x74d   :  { %1367 = vadd.xlane.f32.xlu1 %v1366_v57 }
 0x74f   :  { %v1338_v58 = vpop.f32.mrf.mxu0 }
 0x750   :  { %v1351_v32 = vadd.f32 %v1338_v58, %v3741_v45 }
 0x752   :  { %v4311_v60 = vadd.f32 %v3323_v34, %v1351_v32  ;;  %v4383_v32 = vld [vmem:[%s5186_s14] ss:$0 sm:$0xff] }
 0x754   :  { %v1369_v59 = vsel %vm142_vm2, %v4311_v60, 0.0 }
 0x755   :  { %1370 = vadd.xlane.f32.xlu2 %v1369_v59 }
 0x763   :  { %v1341_v0 = vpop.f32.mrf.mxu0 }
 0x764   :  { %v1352_v1 = vadd.f32 %v1341_v0, %v3751_v61 }
 0x766   :  { %v4316_v63 = vadd.f32 %v3323_v34, %v1352_v1 }
 0x768   :  { %v1372_v28 = vsel %vm142_vm2, %v4316_v63, 0.0 }
 0x769   :  { %1373 = vadd.xlane.f32.xlu0 %v1372_v28 }
 0x783   :  { %v1344_v4 = vpop.f32.mrf.mxu0 }
 0x784   :  { %v1353_v38 = vadd.f32 %v1344_v4, %v3761_v7 }
 0x786   :  { %v4321_v5 = vadd.f32 %v3323_v34, %v1353_v38 }
 0x788   :  { %v1375_v45 = vsel %vm142_vm2, %v4321_v5, 0.0 }
 0x789   :  { %1376 = vadd.xlane.f32.xlu1 %v1375_v45 }
 0x78b   :  { %v1347_v6 = vpop.f32.mrf.mxu0 }
 0x78c   :  { %v1354_v51 = vadd.f32 %v1347_v6, %v3771_v14 }
 0x78e   :  { %v4326_v9 = vadd.f32 %v3323_v34, %v1354_v51 }
 0x790   :  { %v1378_v61 = vsel %vm155_vm3, %v4326_v9, 0.0 }
 0x791   :  { %1379 = vadd.xlane.f32.xlu2 %v1378_v61 }
 0x7c0   :  { %v1368_v10 = vpop.xlane.xlu1 %1367 }
 0x7c1   :  { %v1381_v11 = vmul.f32 %v1368_v10, %v3683_v33 }
 0x7c3   :  { %v1386_v7 = vsub.f32 %v4306_v53, %v1381_v11 }
 0x7c5   :  { %v1391_v62 = vmul.f32 %v1386_v7, %v1386_v7 }
 0x7c7   :  { %v1396_v13 = vsel %vm142_vm2, %v1391_v62, 0.0 }
 0x7c8   :  { %v1371_v15 = vpop.xlane.xlu2 %1370  ;;  %1397 = vadd.xlane.f32.xlu0 %v1396_v13 }
 0x7c9   :  { %v1382_v18 = vmul.f32 %v1371_v15, %v3683_v33 }
 0x7cb   :  { %v4335_v14 = vsub.f32 %v4311_v60, %v1382_v18 }
 0x7cd   :  { %v1392_v56 = vmul.f32 %v4335_v14, %v4335_v14 }
 0x7cf   :  { %v1399_v8 = vsel %vm142_vm2, %v1392_v56, 0.0 }
 0x7d0   :  { %1400 = vadd.xlane.f32.xlu1 %v1399_v8 }
 0x7dc   :  { %v1374_v12 = vpop.xlane.xlu0 %1373 }
 0x7dd   :  { %v1383_v17 = vmul.f32 %v1374_v12, %v3683_v33 }
 0x7df   :  { %v4342_v20 = vsub.f32 %v4316_v63, %v1383_v17 }
 0x7e1   :  { %v1393_v19 = vmul.f32 %v4342_v20, %v4342_v20 }
 0x7e3   :  { %v1402_v23 = vsel %vm142_vm2, %v1393_v19, 0.0 }
 0x7e4   :  { %1403 = vadd.xlane.f32.xlu2 %v1402_v23 }
 0x7fc   :  { %v1377_v22 = vpop.xlane.xlu1 %1376 }
 0x7fd   :  { %v1384_v24 = vmul.f32 %v1377_v22, %v3683_v33 }
 0x7ff   :  { %v4349_v25 = vsub.f32 %v4321_v5, %v1384_v24  ;;  %v1607_v24 = vld [vmem:[%s5189_s17 + $0x78] sm:$0xff] }
 0x800   :  { %1608 = vmatpush.msrb.mxu2 %v1607_v24 }
 0x801   :  { %v1394_v27 = vmul.f32 %v4349_v25, %v4349_v25 }
 0x803   :  { %v1405_v30 = vsel %vm142_vm2, %v1394_v27, 0.0  ;;  %v1606_v27 = vld [vmem:[%s5189_s17 + $0x70] sm:$0xff] }
 0x804   :  { %1406 = vadd.xlane.f32.xlu0 %v1405_v30  ;;  %v1380_v16 = vpop.xlane.xlu2 %1379  ;;  %1609 = vmatpush.msrb.mxu2 %v1606_v27 }
 0x805   :  { %v1385_v31 = vmul.f32 %v1380_v16, %v3683_v33 }
 0x807   :  { %v4356_v35 = vsub.f32 %v4326_v9, %v1385_v31  ;;  %v1604_v31 = vld [vmem:[%s5189_s17 + $0x60] sm:$0xff] }
 0x809   :  { %v1395_v36 = vmul.f32 %v4356_v35, %v4356_v35 }
 0x80b   :  { %v1408_v37 = vsel %vm155_vm3, %v1395_v36, 0.0 }
 0x80c   :  { %1409 = vadd.xlane.f32.xlu1 %v1408_v37 }
 0x83b   :  { %v1398_v2 = vpop.xlane.xlu0 %1397 }
 0x83c   :  { %v1411_v46 = vmul.f32 %v1398_v2, %v3683_v33 }
 0x83e   :  { %v1416_v29 = vadd.f32 1e-05, %v1411_v46 }
 0x840   :  { %3407 = vrsqrt.f32 %v1416_v29  ;;  %vm1427_vm12 = vweird.f32 %v1416_v29 }
 0x843   :  { %v1401_v42 = vpop.xlane.xlu1 %1400 }
 0x844   :  { %v1412_v43 = vmul.f32 %v1401_v42, %v3683_v33 }
 0x846   :  { %v3408_v41 = vpop.eup %3407  ;;  %v1417_v3 = vadd.f32 1e-05, %v1412_v43 }
 0x847   :  { %v1422_v48 = vmul.f32 %v3408_v41, %v1416_v29  ;;  %vm1428_vm11 = vweird.f32 %v3408_v41 }
 0x848   :  { %3409 = vrsqrt.f32 %v1417_v3  ;;  %vm1429_vm13 = vmor %vm1427_vm12, %vm1428_vm11  ;;  %vm1437_vm15 = vweird.f32 %v1417_v3 }
 0x849   :  { %v1423_v39 = vmul.f32 %v3408_v41, %v1422_v48 }
 0x84b   :  { %v1424_v26 = vmul.f32 0.5, %v1423_v39 }
 0x84d   :  { %v1425_v21 = vsub.f32 1.5, %v1424_v26 }
 0x84e   :  { %v3410_v52 = vpop.eup %3409 }
 0x84f   :  { %v1426_v40 = vmul.f32 %v3408_v41, %v1425_v21  ;;  %v1432_v34 = vmul.f32 %v3410_v52, %v1417_v3  ;;  %vm1438_vm14 = vweird.f32 %v3410_v52 }
 0x850   :  { %vm1439_vm0 = vmor %vm1437_vm15, %vm1438_vm14 }
 0x851   :  { %v1430_v55 = vsel %vm1429_vm13, %v3408_v41, %v1426_v40  ;;  %v1433_v57 = vmul.f32 %v3410_v52, %v1432_v34 }
 0x852   :  { %v1471_v58 = vmul.f32 %v1430_v55, %v1386_v7 }
 0x853   :  { %v1434_v59 = vmul.f32 0.5, %v1433_v57  ;;  %v1602_v57 = vld [vmem:[%s5189_s17 + $0x50] sm:$0xff] }
 0x854   :  { %v1479_v0 = vmul.f32 %v4378_v54, %v1471_v58  ;;  %v1601_v58 = vld [vmem:[%s5189_s17 + $0x48] sm:$0xff] }
 0x855   :  { %v1435_v1 = vsub.f32 1.5, %v1434_v59  ;;  %v1597_v59 = vld [vmem:[%s5189_s17 + $0x28] sm:$0xff] }
 0x856   :  { %v1487_v28 = vadd.f32 %v4383_v32, %v1479_v0  ;;  %v1596_v0 = vld [vmem:[%s5189_s17 + $0x20] sm:$0xff] }
 0x857   :  { %v1436_v4 = vmul.f32 %v3410_v52, %v1435_v1  ;;  %v1404_v38 = vpop.xlane.xlu2 %1403  ;;  %v1595_v1 = vld [vmem:[%s5189_s17 + $0x18] sm:$0xff] }
 0x858   :  { %v1413_v45 = vmul.f32 %v1404_v38, %v3683_v33  ;;  %3169 = vmatmul.msk.f32.vlgmr.msra.gmra.mxu1 %vm142_vm2, %v1487_v28  ;;  %v1594_v28 = vld [vmem:[%s5189_s17 + $0x10] sm:$0xff]  ;;  %v3326_v38 = vld [vmem:[%s5187_s16] ss:$0 sm:$0xff] }
 0x859   :  { %v1440_v6 = vsel %vm1439_vm0, %v3410_v52, %v1436_v4  ;;  %v1593_v4 = vld [vmem:[%s5189_s17 + $0x8] sm:$0xff] }
 0x85a   :  { %v1418_v51 = vadd.f32 1e-05, %v1413_v45  ;;  %v1472_v61 = vmul.f32 %v1440_v6, %v4335_v14  ;;  %v1592_v45 = vld [vmem:[%s5189_s17] sm:$0xff] }
 0x85c   :  { %3411 = vrsqrt.f32 %v1418_v51  ;;  %v1480_v10 = vmul.f32 %v4378_v54, %v1472_v61  ;;  %vm1447_vm4 = vweird.f32 %v1418_v51 }
 0x85e   :  { %v1488_v11 = vadd.f32 %v4383_v32, %v1480_v10 }
 0x860   :  { %3170 = vmatmul.msk.f32.gmra.mxu1 %vm142_vm2, %v1488_v11 }
 0x862   :  { %v3412_v7 = vpop.eup %3411 }
 0x863   :  { %v1442_v62 = vmul.f32 %v3412_v7, %v1418_v51  ;;  %vm1448_vm1 = vweird.f32 %v3412_v7 }
 0x864   :  { %vm1449_vm5 = vmor %vm1447_vm4, %vm1448_vm1 }
 0x865   :  { %v1443_v13 = vmul.f32 %v3412_v7, %v1442_v62 }
 0x867   :  { %v1444_v15 = vmul.f32 0.5, %v1443_v13 }
 0x869   :  { %v1445_v18 = vsub.f32 1.5, %v1444_v15 }
 0x86b   :  { %v1446_v56 = vmul.f32 %v3412_v7, %v1445_v18 }
 0x86d   :  { %v1450_v8 = vsel %vm1449_vm5, %v3412_v7, %v1446_v56 }
 0x86e   :  { %v1473_v12 = vmul.f32 %v1450_v8, %v4342_v20  ;;  %v1605_v20 = vld [vmem:[%s5189_s17 + $0x68] sm:$0xff] }
 0x86f   :  { %1610 = vmatpush.msrb.mxu2 %v1605_v20 }
 0x870   :  { %v1481_v14 = vmul.f32 %v4378_v54, %v1473_v12 }
 0x871   :  { %1611 = vmatpush.msrb.mxu2 %v1604_v31 }
 0x872   :  { %v1489_v17 = vadd.f32 %v4383_v32, %v1481_v14 }
 0x874   :  { %3171 = vmatmul.msk.f32.gmra.mxu1 %vm142_vm2, %v1489_v17 }
 0x877   :  { %v1407_v19 = vpop.xlane.xlu0 %1406 }
 0x878   :  { %v1414_v23 = vmul.f32 %v1407_v19, %v3683_v33 }
 0x87a   :  { %v1419_v22 = vadd.f32 1e-05, %v1414_v23 }
 0x87c   :  { %3413 = vrsqrt.f32 %v1419_v22  ;;  %vm1457_vm11 = vweird.f32 %v1419_v22 }
 0x87f   :  { %v1410_v30 = vpop.xlane.xlu1 %1409 }
 0x880   :  { %v1415_v16 = vmul.f32 %v1410_v30, %v3683_v33 }
 0x882   :  { %v3414_v36 = vpop.eup %3413  ;;  %v1420_v37 = vadd.f32 1e-05, %v1415_v16 }
 0x883   :  { %v1452_v50 = vmul.f32 %v3414_v36, %v1419_v22  ;;  %vm1458_vm6 = vweird.f32 %v3414_v36 }
 0x884   :  { %3415 = vrsqrt.f32 %v1420_v37  ;;  %vm1459_vm12 = vmor %vm1457_vm11, %vm1458_vm6  ;;  %vm1467_vm14 = vweird.f32 %v1420_v37 }
 0x885   :  { %v1453_v2 = vmul.f32 %v3414_v36, %v1452_v50 }
 0x887   :  { %v1454_v46 = vmul.f32 0.5, %v1453_v2 }
 0x889   :  { %v1455_v29 = vsub.f32 1.5, %v1454_v46 }
 0x88a   :  { %v3416_v42 = vpop.eup %3415 }
 0x88b   :  { %v1456_v43 = vmul.f32 %v3414_v36, %v1455_v29  ;;  %v1462_v44 = vmul.f32 %v3416_v42, %v1420_v37  ;;  %vm1468_vm13 = vweird.f32 %v3416_v42 }
 0x88c   :  { %vm1469_vm15 = vmor %vm1467_vm14, %vm1468_vm13 }
 0x88d   :  { %v1460_v41 = vsel %vm1459_vm12, %v3414_v36, %v1456_v43  ;;  %v1463_v3 = vmul.f32 %v3416_v42, %v1462_v44 }
 0x88e   :  { %v1474_v47 = vmul.f32 %v1460_v41, %v4349_v25  ;;  %v1603_v25 = vld [vmem:[%s5189_s17 + $0x58] sm:$0xff] }
 0x88f   :  { %v1464_v48 = vmul.f32 0.5, %v1463_v3  ;;  %1612 = vmatpush.msrb.mxu2 %v1603_v25 }
 0x890   :  { %v1482_v49 = vmul.f32 %v4378_v54, %v1474_v47 }
 0x891   :  { %v1465_v39 = vsub.f32 1.5, %v1464_v48  ;;  %1613 = vmatpush.msrb.mxu2 %v1602_v57 }
 0x892   :  { %v1490_v26 = vadd.f32 %v4383_v32, %v1482_v49 }
 0x893   :  { %v1466_v21 = vmul.f32 %v3416_v42, %v1465_v39  ;;  %1614 = vmatpush.msrb.mxu2 %v1601_v58 }
 0x894   :  { %3172 = vmatmul.msk.f32.gmra.mxu1 %vm142_vm2, %v1490_v26 }
 0x895   :  { %v1470_v52 = vsel %vm1469_vm15, %v3416_v42, %v1466_v21 }
 0x896   :  { %v1475_v40 = vmul.f32 %v1470_v52, %v4356_v35  ;;  %v1600_v35 = vld [vmem:[%s5189_s17 + $0x40] sm:$0xff] }
 0x897   :  { %1615 = vmatpush.msrb.mxu2 %v1600_v35 }
 0x898   :  { %v1483_v34 = vmul.f32 %v4378_v54, %v1475_v40  ;;  %v1599_v54 = vld [vmem:[%s5189_s17 + $0x38] sm:$0xff] }
 0x899   :  { %1616 = vmatpush.msrb.mxu2 %v1599_v54 }
 0x89a   :  { %v1491_v55 = vadd.f32 %v4383_v32, %v1483_v34  ;;  %v1598_v32 = vld [vmem:[%s5189_s17 + $0x30] sm:$0xff] }
 0x89b   :  { %1617 = vmatpush.msrb.mxu2 %v1598_v32 }
 0x89c   :  { %3173 = vmatmul.msk.f32.gmra.mxu1 %vm142_vm2, %v1491_v55 }
 0x89d   :  { %1618 = vmatpush.msrb.mxu2 %v1597_v59 }
 0x89f   :  { %1619 = vmatpush.msrb.mxu2 %v1596_v0 }
 0x8a1   :  { %1620 = vmatpush.msrb.mxu2 %v1595_v1 }
 0x8a3   :  { %1621 = vmatpush.msrb.mxu2 %v1594_v28 }
 0x8a5   :  { %1622 = vmatpush.msrb.mxu2 %v1593_v4  ;;  %v3327_v4 = vld [vmem:[%s5190_s18] ss:$0 sm:$0xff] }
 0x8a7   :  { %1623 = vmatpush.msrb.mxu2 %v1592_v45 }
 0x8d5   :  { %v1532_v6 = vpop.f32.mrf.mxu1 }
 0x8d6   :  { %v1533_v51 = vadd.f32 %v3326_v38, %v1532_v6 }
 0x8d8   :  { %v1552_v61 = vmul.f32 0.044715, %v1533_v51  ;;  %v1547_v19 = vmul.f32 0.5, %v1533_v51 }
 0x8da   :  { %v1557_v10 = vmul.f32 %v1552_v61, %v1533_v51 }
 0x8dc   :  { %v1562_v11 = vmul.f32 %v1557_v10, %v1533_v51 }
 0x8dd   :  { %v1535_v7 = vpop.f32.mrf.mxu1 }
 0x8de   :  { %v1536_v62 = vadd.f32 %v3326_v38, %v1535_v7  ;;  %v1567_v13 = vadd.f32 %v1562_v11, %v1533_v51 }
 0x8e0   :  { %v1572_v15 = vmul.f32 0.7978846, %v1567_v13  ;;  %v1553_v18 = vmul.f32 0.044715, %v1536_v62  ;;  %v1548_v20 = vmul.f32 0.5, %v1536_v62 }
 0x8e2   :  { %3417 = vtanh.f32 %v1572_v15  ;;  %v1558_v56 = vmul.f32 %v1553_v18, %v1536_v62 }
 0x8e4   :  { %v1563_v8 = vmul.f32 %v1558_v56, %v1536_v62 }
 0x8e6   :  { %v1568_v12 = vadd.f32 %v1563_v8, %v1536_v62 }
 0x8e8   :  { %v3418_v14 = vpop.eup %3417  ;;  %v1573_v17 = vmul.f32 0.7978846, %v1568_v12 }
 0x8e9   :  { %v1582_v23 = vadd.f32 1.0, %v3418_v14 }
 0x8ea   :  { %3419 = vtanh.f32 %v1573_v17 }
 0x8eb   :  { %v1587_v22 = vmul.f32 %v1582_v23, %v1547_v19 }
 0x8ed   :  { %1624 = vmatmul.f32.vlgmr.msrb.gmra.mxu2 %v1587_v22 }
 0x8f0   :  { %v3420_v24 = vpop.eup %3419 }
 0x8f1   :  { %v1538_v27 = vpop.f32.mrf.mxu1  ;;  %v1583_v30 = vadd.f32 1.0, %v3420_v24 }
 0x8f2   :  { %v1539_v16 = vadd.f32 %v3326_v38, %v1538_v27 }
 0x8f3   :  { %v1588_v31 = vmul.f32 %v1583_v30, %v1548_v20 }
 0x8f4   :  { %v1554_v36 = vmul.f32 0.044715, %v1539_v16  ;;  %v1549_v42 = vmul.f32 0.5, %v1539_v16 }
 0x8f5   :  { %1627 = vmatmul.f32.gmra.mxu2 %v1588_v31 }
 0x8f6   :  { %v1559_v37 = vmul.f32 %v1554_v36, %v1539_v16 }
 0x8f8   :  { %v1564_v50 = vmul.f32 %v1559_v37, %v1539_v16 }
 0x8fa   :  { %v1569_v2 = vadd.f32 %v1564_v50, %v1539_v16 }
 0x8fc   :  { %v1574_v46 = vmul.f32 0.7978846, %v1569_v2 }
 0x8fe   :  { %3421 = vtanh.f32 %v1574_v46 }
 0x904   :  { %v3422_v29 = vpop.eup %3421 }
 0x905   :  { %v1584_v43 = vadd.f32 1.0, %v3422_v29 }
 0x907   :  { %v1589_v44 = vmul.f32 %v1584_v43, %v1549_v42 }
 0x909   :  { %1630 = vmatmul.f32.gmra.mxu2 %v1589_v44 }
 0x911   :  { %v1541_v41 = vpop.f32.mrf.mxu1 }
 0x912   :  { %v1542_v3 = vadd.f32 %v3326_v38, %v1541_v41 }
 0x914   :  { %v1555_v47 = vmul.f32 0.044715, %v1542_v3  ;;  %v1550_v35 = vmul.f32 0.5, %v1542_v3 }
 0x916   :  { %v1560_v48 = vmul.f32 %v1555_v47, %v1542_v3 }
 0x918   :  { %v1565_v49 = vmul.f32 %v1560_v48, %v1542_v3 }
 0x919   :  { %v1544_v39 = vpop.f32.mrf.mxu1 }
 0x91a   :  { %v1545_v26 = vadd.f32 %v3326_v38, %v1544_v39  ;;  %v1570_v21 = vadd.f32 %v1565_v49, %v1542_v3  ;;  %v3179_v39 = vld [vmem:[%s5181_s9 + $0x38] sm:$0xff] }
 0x91b   :  { %1821 = vmatpush.msrb.mxu3 %v3179_v39 }
 0x91c   :  { %v1575_v52 = vmul.f32 0.7978846, %v1570_v21  ;;  %v1556_v40 = vmul.f32 0.044715, %v1545_v26  ;;  %v1551_v0 = vmul.f32 0.5, %v1545_v26 }
 0x91e   :  { %3423 = vtanh.f32 %v1575_v52  ;;  %v1561_v34 = vmul.f32 %v1556_v40, %v1545_v26 }
 0x920   :  { %v1566_v55 = vmul.f32 %v1561_v34, %v1545_v26 }
 0x922   :  { %v1571_v25 = vadd.f32 %v1566_v55, %v1545_v26  ;;  %v3178_v55 = vld [vmem:[%s5181_s9 + $0x30] sm:$0xff] }
 0x923   :  { %1822 = vmatpush.msrb.mxu3 %v3178_v55 }
 0x924   :  { %v3424_v57 = vpop.eup %3423  ;;  %v1576_v58 = vmul.f32 0.7978846, %v1571_v25 }
 0x925   :  { %v1585_v54 = vadd.f32 1.0, %v3424_v57 }
 0x926   :  { %3425 = vtanh.f32 %v1576_v58  ;;  %v3177_v58 = vld [vmem:[%s5181_s9 + $0x28] sm:$0xff] }
 0x927   :  { %v1590_v32 = vmul.f32 %v1585_v54, %v1550_v35  ;;  %1823 = vmatpush.msrb.mxu3 %v3177_v58  ;;  %v3176_v54 = vld [vmem:[%s5181_s9 + $0x20] sm:$0xff] }
 0x929   :  { %1633 = vmatmul.f32.gmra.mxu2 %v1590_v32  ;;  %1824 = vmatpush.msrb.mxu3 %v3176_v54 }
 0x92c   :  { %v3426_v59 = vpop.eup %3425 }
 0x92d   :  { %v1586_v1 = vadd.f32 1.0, %v3426_v59 }
 0x92f   :  { %v1591_v28 = vmul.f32 %v1586_v1, %v1551_v0 }
 0x931   :  { %1636 = vmatmul.f32.gmra.mxu2 %v1591_v28 }
 0x970   :  { %v1625_v38 = vpop.f32.mrf.mxu2 }
 0x971   :  { %v1640_v45 = vadd.f32 %v1625_v38, %v4306_v53  ;;  %v4534_v38 = vld [vmem:[%s5222_s27 + $0x1] ss:$0 sm:$0xff] }
 0x973   :  { %v4462_v6 = vadd.f32 %v3327_v4, %v1640_v45 }
 0x975   :  { %v1658_v51 = vsel %vm142_vm2, %v4462_v6, 0.0 }
 0x976   :  { %1659 = vadd.xlane.f32.xlu2 %v1658_v51 }
 0x978   :  { %v1628_v61 = vpop.f32.mrf.mxu2 }
 0x979   :  { %v1641_v10 = vadd.f32 %v1628_v61, %v4311_v60  ;;  %v4539_v61 = vld [vmem:[%s5223_s29 + $0x1] ss:$0 sm:$0xff] }
 0x97b   :  { %v4467_v11 = vadd.f32 %v3327_v4, %v1641_v10 }
 0x97d   :  { %v1661_v7 = vsel %vm142_vm2, %v4467_v11, 0.0 }
 0x97e   :  { %1662 = vadd.xlane.f32.xlu0 %v1661_v7 }
 0x98c   :  { %v1631_v62 = vpop.f32.mrf.mxu2 }
 0x98d   :  { %v1642_v13 = vadd.f32 %v1631_v62, %v4316_v63 }
 0x98f   :  { %v4472_v15 = vadd.f32 %v3327_v4, %v1642_v13 }
 0x991   :  { %v1664_v53 = vsel %vm142_vm2, %v4472_v15, 0.0 }
 0x992   :  { %1665 = vadd.xlane.f32.xlu1 %v1664_v53 }
 0x9ac   :  { %v1634_v18 = vpop.f32.mrf.mxu2 }
 0x9ad   :  { %v1643_v56 = vadd.f32 %v1634_v18, %v4321_v5 }
 0x9af   :  { %v4477_v8 = vadd.f32 %v3327_v4, %v1643_v56 }
 0x9b1   :  { %v1667_v60 = vsel %vm142_vm2, %v4477_v8, 0.0 }
 0x9b2   :  { %1668 = vadd.xlane.f32.xlu2 %v1667_v60 }
 0x9b4   :  { %v1637_v12 = vpop.f32.mrf.mxu2 }
 0x9b5   :  { %v1644_v14 = vadd.f32 %v1637_v12, %v4326_v9 }
 0x9b7   :  { %v4482_v17 = vadd.f32 %v3327_v4, %v1644_v14 }
 0x9b9   :  { %v1670_v63 = vsel %vm155_vm3, %v4482_v17, 0.0 }
 0x9ba   :  { %1671 = vadd.xlane.f32.xlu0 %v1670_v63 }
 0x9e9   :  { %v1660_v19 = vpop.xlane.xlu2 %1659 }
 0x9ea   :  { %v1673_v23 = vmul.f32 %v1660_v19, %v3683_v33 }
 0x9ec   :  { %v1678_v5 = vsub.f32 %v4462_v6, %v1673_v23 }
 0x9ee   :  { %v1683_v22 = vmul.f32 %v1678_v5, %v1678_v5 }
 0x9f0   :  { %v1688_v24 = vsel %vm142_vm2, %v1683_v22, 0.0 }
 0x9f1   :  { %1689 = vadd.xlane.f32.xlu1 %v1688_v24  ;;  %v1663_v27 = vpop.xlane.xlu0 %1662 }
 0x9f2   :  { %v1674_v20 = vmul.f32 %v1663_v27, %v3683_v33 }
 0x9f4   :  { %v4491_v9 = vsub.f32 %v4467_v11, %v1674_v20 }
 0x9f6   :  { %v1684_v30 = vmul.f32 %v4491_v9, %v4491_v9 }
 0x9f8   :  { %v1691_v16 = vsel %vm142_vm2, %v1684_v30, 0.0 }
 0x9f9   :  { %1692 = vadd.xlane.f32.xlu2 %v1691_v16 }
 0xa05   :  { %v1666_v31 = vpop.xlane.xlu1 %1665 }
 0xa06   :  { %v1675_v36 = vmul.f32 %v1666_v31, %v3683_v33 }
 0xa08   :  { %v4498_v37 = vsub.f32 %v4472_v15, %v1675_v36 }
 0xa0a   :  { %v1685_v50 = vmul.f32 %v4498_v37, %v4498_v37 }
 0xa0c   :  { %v1694_v2 = vsel %vm142_vm2, %v1685_v50, 0.0 }
 0xa0d   :  { %1695 = vadd.xlane.f32.xlu0 %v1694_v2 }
 0xa25   :  { %v1669_v46 = vpop.xlane.xlu2 %1668 }
 0xa26   :  { %v1676_v29 = vmul.f32 %v1669_v46, %v3683_v33 }
 0xa28   :  { %v4505_v42 = vsub.f32 %v4477_v8, %v1676_v29 }
 0xa2a   :  { %v1686_v43 = vmul.f32 %v4505_v42, %v4505_v42 }
 0xa2c   :  { %v1697_v44 = vsel %vm142_vm2, %v1686_v43, 0.0 }
 0xa2d   :  { %1698 = vadd.xlane.f32.xlu1 %v1697_v44  ;;  %v1672_v41 = vpop.xlane.xlu0 %1671 }
 0xa2e   :  { %v1677_v3 = vmul.f32 %v1672_v41, %v3683_v33 }
 0xa30   :  { %v4512_v47 = vsub.f32 %v4482_v17, %v1677_v3 }
 0xa32   :  { %v1687_v48 = vmul.f32 %v4512_v47, %v4512_v47 }
 0xa34   :  { %v1700_v49 = vsel %vm155_vm3, %v1687_v48, 0.0 }
 0xa35   :  { %1701 = vadd.xlane.f32.xlu2 %v1700_v49 }
 0xa64   :  { %v1690_v26 = vpop.xlane.xlu1 %1689 }
 0xa65   :  { %v1703_v21 = vmul.f32 %v1690_v26, %v3683_v33 }
 0xa67   :  { %v1708_v52 = vadd.f32 1e-05, %v1703_v21 }
 0xa69   :  { %3427 = vrsqrt.f32 %v1708_v52  ;;  %vm1719_vm1 = vweird.f32 %v1708_v52 }
 0xa6c   :  { %v1693_v40 = vpop.xlane.xlu2 %1692 }
 0xa6d   :  { %v1704_v34 = vmul.f32 %v1693_v40, %v3683_v33 }
 0xa6f   :  { %v3428_v25 = vpop.eup %3427  ;;  %v1709_v57 = vadd.f32 1e-05, %v1704_v34 }
 0xa70   :  { %v1714_v35 = vmul.f32 %v3428_v25, %v1708_v52  ;;  %vm1720_vm0 = vweird.f32 %v3428_v25 }
 0xa71   :  { %3429 = vrsqrt.f32 %v1709_v57  ;;  %vm1721_vm4 = vmor %vm1719_vm1, %vm1720_vm0  ;;  %vm1729_vm6 = vweird.f32 %v1709_v57 }
 0xa72   :  { %v1715_v32 = vmul.f32 %v3428_v25, %v1714_v35 }
 0xa74   :  { %v1716_v59 = vmul.f32 0.5, %v1715_v32 }
 0xa76   :  { %v1717_v0 = vsub.f32 1.5, %v1716_v59 }
 0xa77   :  { %v3430_v1 = vpop.eup %3429 }
 0xa78   :  { %v1718_v28 = vmul.f32 %v3428_v25, %v1717_v0  ;;  %v1724_v4 = vmul.f32 %v3430_v1, %v1709_v57  ;;  %vm1730_vm5 = vweird.f32 %v3430_v1 }
 0xa79   :  { %vm1731_vm11 = vmor %vm1729_vm6, %vm1730_vm5 }
 0xa7a   :  { %v1722_v45 = vsel %vm1721_vm4, %v3428_v25, %v1718_v28  ;;  %v1725_v51 = vmul.f32 %v3430_v1, %v1724_v4 }
 0xa7b   :  { %v1763_v10 = vmul.f32 %v1722_v45, %v1678_v5 }
 0xa7c   :  { %v1726_v7 = vmul.f32 0.5, %v1725_v51 }
 0xa7d   :  { %v1771_v62 = vmul.f32 %v4534_v38, %v1763_v10 }
 0xa7e   :  { %v1727_v13 = vsub.f32 1.5, %v1726_v7 }
 0xa7f   :  { %v1779_v53 = vadd.f32 %v4539_v61, %v1771_v62 }
 0xa80   :  { %v1728_v18 = vmul.f32 %v3430_v1, %v1727_v13  ;;  %v1696_v56 = vpop.xlane.xlu0 %1695 }
 0xa81   :  { %v1705_v60 = vmul.f32 %v1696_v56, %v3683_v33  ;;  %3181 = vmatmul.msk.f32.vlgmr.msrb.gmra.mxu3 %vm142_vm2, %v1779_v53 }
 0xa82   :  { %v1732_v12 = vsel %vm1731_vm11, %v3430_v1, %v1728_v18 }
 0xa83   :  { %v1710_v14 = vadd.f32 1e-05, %v1705_v60  ;;  %v1764_v63 = vmul.f32 %v1732_v12, %v4491_v9 }
 0xa85   :  { %3431 = vrsqrt.f32 %v1710_v14  ;;  %v1772_v19 = vmul.f32 %v4534_v38, %v1764_v63  ;;  %vm1739_vm13 = vweird.f32 %v1710_v14 }
 0xa87   :  { %v1780_v23 = vadd.f32 %v4539_v61, %v1772_v19 }
 0xa89   :  { %3182 = vmatmul.msk.f32.gmra.mxu3 %vm142_vm2, %v1780_v23 }
 0xa8b   :  { %v3432_v5 = vpop.eup %3431 }
 0xa8c   :  { %v1734_v22 = vmul.f32 %v3432_v5, %v1710_v14  ;;  %vm1740_vm12 = vweird.f32 %v3432_v5 }
 0xa8d   :  { %vm1741_vm14 = vmor %vm1739_vm13, %vm1740_vm12 }
 0xa8e   :  { %v1735_v24 = vmul.f32 %v3432_v5, %v1734_v22 }
 0xa90   :  { %v1736_v27 = vmul.f32 0.5, %v1735_v24 }
 0xa92   :  { %v1737_v20 = vsub.f32 1.5, %v1736_v27 }
 0xa94   :  { %v1738_v30 = vmul.f32 %v3432_v5, %v1737_v20 }
 0xa96   :  { %v1742_v16 = vsel %vm1741_vm14, %v3432_v5, %v1738_v30 }
 0xa97   :  { %v1765_v31 = vmul.f32 %v1742_v16, %v4498_v37 }
 0xa99   :  { %v1773_v9 = vmul.f32 %v4534_v38, %v1765_v31 }
 0xa9b   :  { %v1781_v36 = vadd.f32 %v4539_v61, %v1773_v9 }
 0xa9d   :  { %3183 = vmatmul.msk.f32.gmra.mxu3 %vm142_vm2, %v1781_v36 }
 0xaa0   :  { %v1699_v50 = vpop.xlane.xlu1 %1698 }
 0xaa1   :  { %v1706_v2 = vmul.f32 %v1699_v50, %v3683_v33 }
 0xaa3   :  { %v1711_v46 = vadd.f32 1e-05, %v1706_v2 }
 0xaa5   :  { %3433 = vrsqrt.f32 %v1711_v46  ;;  %vm1749_vm0 = vweird.f32 %v1711_v46 }
 0xaa8   :  { %v1702_v29 = vpop.xlane.xlu2 %1701 }
 0xaa9   :  { %v1707_v43 = vmul.f32 %v1702_v29, %v3683_v33 }
 0xaab   :  { %v3434_v44 = vpop.eup %3433  ;;  %v1712_v41 = vadd.f32 1e-05, %v1707_v43 }
 0xaac   :  { %v1744_v3 = vmul.f32 %v3434_v44, %v1711_v46  ;;  %vm1750_vm15 = vweird.f32 %v3434_v44 }
 0xaad   :  { %3435 = vrsqrt.f32 %v1712_v41  ;;  %vm1751_vm1 = vmor %vm1749_vm0, %vm1750_vm15  ;;  %vm1759_vm5 = vweird.f32 %v1712_v41 }
 0xaae   :  { %v1745_v48 = vmul.f32 %v3434_v44, %v1744_v3 }
 0xab0   :  { %v1746_v37 = vmul.f32 0.5, %v1745_v48 }
 0xab2   :  { %v1747_v49 = vsub.f32 1.5, %v1746_v37 }
 0xab3   :  { %v3436_v39 = vpop.eup %3435 }
 0xab4   :  { %v1748_v26 = vmul.f32 %v3434_v44, %v1747_v49  ;;  %v1754_v21 = vmul.f32 %v3436_v39, %v1712_v41  ;;  %vm1760_vm4 = vweird.f32 %v3436_v39 }
 0xab5   :  { %vm1761_vm6 = vmor %vm1759_vm5, %vm1760_vm4 }
 0xab6   :  { %v1752_v52 = vsel %vm1751_vm1, %v3434_v44, %v1748_v26  ;;  %v1755_v40 = vmul.f32 %v3436_v39, %v1754_v21 }
 0xab7   :  { %v1766_v34 = vmul.f32 %v1752_v52, %v4505_v42  ;;  %v3328_v42 = vld [vmem:[%s5180_s10 + $0x1] ss:$0 sm:$0xff]  ;;  %s5224_s10 = smov 64  }
 0xab8   :  { %v1756_v55 = vmul.f32 0.5, %v1755_v40 }
 0xab9   :  { %v1774_v25 = vmul.f32 %v4534_v38, %v1766_v34 }
 0xaba   :  { %v1757_v57 = vsub.f32 1.5, %v1756_v55 }
 0xabb   :  { %v1782_v58 = vadd.f32 %v4539_v61, %v1774_v25 }
 0xabc   :  { %v1758_v35 = vmul.f32 %v3436_v39, %v1757_v57 }
 0xabd   :  { %3184 = vmatmul.msk.f32.gmra.mxu3 %vm142_vm2, %v1782_v58 }
 0xabe   :  { %v1762_v54 = vsel %vm1761_vm6, %v3436_v39, %v1758_v35 }
 0xabf   :  { %v1767_v32 = vmul.f32 %v1762_v54, %v4512_v47 }
 0xac1   :  { %v1775_v59 = vmul.f32 %v4534_v38, %v1767_v32 }
 0xac3   :  { %v1783_v0 = vadd.f32 %v4539_v61, %v1775_v59 }
 0xac5   :  { %3185 = vmatmul.msk.f32.gmra.mxu3 %vm142_vm2, %v1783_v0 }
 0xb04   :  { %v1826_v1 = vpop.f32.mrf.mxu3 }
 0xb05   :  { %v4566_v28 = vadd.f32 %v3328_v42, %v1826_v1 }
 0xb07   :  { %v4569_v4 = vrot.slane %v4566_v28, 2  ;;  %v4572_v45 = vrot.slane %v4566_v28, 4  ;;  %v4575_v47 = vrot.slane %v4566_v28, 6  ;;  %1859 = vst [vmem:[#allocation1] ss:$4 sm:$0xff] %v4566_v28 }
 0xb09   :  { %1861 = vst [vmem:[#allocation1 + $0x1] ss:$4 sm:$0xff] %v4569_v4 }
 0xb0a   :  { %1863 = vst [vmem:[#allocation1 + $0x2] ss:$4 sm:$0xff] %v4572_v45 }
 0xb0b   :  { %1865 = vst [vmem:[#allocation1 + $0x3] ss:$4 sm:$0xff] %v4575_v47 }
 0xb0c   :  { %v1829_v38 = vpop.f32.mrf.mxu3 }
 0xb0d   :  { %v4581_v51 = vadd.f32 %v3328_v42, %v1829_v38 }
 0xb0f   :  { %v4584_v61 = vrot.slane %v4581_v51, 2  ;;  %v4587_v10 = vrot.slane %v4581_v51, 4  ;;  %v4590_v7 = vrot.slane %v4581_v51, 6  ;;  %1867 = vst [vmem:[#allocation1 + $0x20] ss:$4 sm:$0xff] %v4581_v51 }
 0xb11   :  { %1869 = vst [vmem:[#allocation1 + $0x21] ss:$4 sm:$0xff] %v4584_v61 }
 0xb12   :  { %1871 = vst [vmem:[#allocation1 + $0x22] ss:$4 sm:$0xff] %v4587_v10  ;;  %v4604_v18 = vld.sshfl [vmem:[#allocation1] sm:$0xff pattern:$0x73625140] }
 0xb13   :  { %1873 = vst [vmem:[#allocation1 + $0x23] ss:$4 sm:$0xff] %v4590_v7 }
 0xb1a   :  { %v4596_v62 = vld.sshfl [vmem:[#allocation1 + $0x20] sm:$0xff pattern:$0x73625140] }
 0xb1b   :  { %1886 = vst [vmem:[#allocation1 + $0x20] ss:$4 sm:$0xff] %v4581_v51 }
 0xb1c   :  { %1888 = vst [vmem:[#allocation1 + $0x21] ss:$4 sm:$0xff] %v4584_v61 }
 0xb1d   :  { %1890 = vst [vmem:[#allocation1 + $0x22] ss:$4 sm:$0xff] %v4587_v10 }
 0xb1e   :  { %1892 = vst [vmem:[#allocation1 + $0x23] ss:$4 sm:$0xff] %v4590_v7 }
 0xb20   :  { %v1832_v13 = vpop.f32.mrf.mxu3 }
 0xb21   :  { %v4602_v53 = vadd.f32 %v3328_v42, %v1832_v13 }
 0xb23   :  { %1876 = vst [vmem:[#allocation1] ss:$4 sm:$0xff] %v4602_v53  ;;  %v4617_v14 = vrot.slane %v4602_v53, 2  ;;  %v4620_v63 = vrot.slane %v4602_v53, 4  ;;  %v4623_v23 = vrot.slane %v4602_v53, 6 }
 0xb25   :  { %v1894_v56 = vld.sshfl [vmem:[#allocation1 + $0x20] sm:$0xff pattern:$0x73625140] }
 0xb26   :  { %1899 = vrot.lane.b32.xlu1 %v1894_v56, %s3516_s5 }
 0xb2a   :  { %v4608_v60 = vld.sshfl [vmem:[#allocation1] sm:$0xff pattern:$0x73625140] }
 0xb2b   :  { %1878 = vst [vmem:[#allocation1] ss:$4 sm:$0xff] %v4566_v28 }
 0xb2c   :  { %1880 = vst [vmem:[#allocation1 + $0x1] ss:$4 sm:$0xff] %v4569_v4 }
 0xb2d   :  { %1882 = vst [vmem:[#allocation1 + $0x2] ss:$4 sm:$0xff] %v4572_v45 }
 0xb2e   :  { %1884 = vst [vmem:[#allocation1 + $0x3] ss:$4 sm:$0xff] %v4575_v47 }
 0xb35   :  { %v1893_v12 = vld.sshfl [vmem:[#allocation1] sm:$0xff pattern:$0x73625140] }
 0xb36   :  { %1895 = vst [vmem:[#allocation1] ss:$4 sm:$0xff] %v4602_v53  ;;  %1897 = vrot.lane.b32.xlu2 %v1893_v12, %s3516_s5 }
 0xb3d   :  { %v1896_v19 = vld.sshfl [vmem:[#allocation1] sm:$0xff pattern:$0x73625140] }
 0xb3e   :  { %1941 = vst [vmem:[#allocation1] ss:$4 sm:$0xff] %v4617_v14  ;;  %1901 = vrot.lane.b32.xlu0 %v1896_v19, %s3516_s5  ;;  %v3510_v19 = vld [vmem:[%s5182_s2 + $0x8] sm:$0xff] }
 0xb3f   :  { %1943 = vst [vmem:[#allocation1 + $0x1] ss:$4 sm:$0xff] %v4620_v63 }
 0xb40   :  { %1945 = vst [vmem:[#allocation1 + $0x2] ss:$4 sm:$0xff] %v4623_v23  ;;  %v1835_v5 = vpop.f32.mrf.mxu3 }
 0xb41   :  { %v4629_v22 = vadd.f32 %v3328_v42, %v1835_v5 }
 0xb43   :  { %v4632_v24 = vrot.slane %v4629_v22, 2  ;;  %v4635_v27 = vrot.slane %v4629_v22, 4  ;;  %v4638_v20 = vrot.slane %v4629_v22, 6  ;;  %1947 = vst [vmem:[#allocation1 + $0x3] ss:$4 sm:$0xff] %v4629_v22 }
 0xb45   :  { %1949 = vst [vmem:[#allocation1 + $0x20] ss:$4 sm:$0xff] %v4632_v24 }
 0xb46   :  { %1951 = vst [vmem:[#allocation1 + $0x21] ss:$4 sm:$0xff] %v4635_v27 }
 0xb47   :  { %1953 = vst [vmem:[#allocation1 + $0x22] ss:$4 sm:$0xff] %v4638_v20 }
 0xb48   :  { %v1838_v30 = vpop.f32.mrf.mxu3 }
 0xb49   :  { %v4644_v16 = vadd.f32 %v3328_v42, %v1838_v30 }
 0xb4a   :  { %v4650_v9 = vld.sshfl [vmem:[#allocation1] sm:$0xff pattern:$0x73625140] }
 0xb4b   :  { %v4647_v31 = vrot.slane %v4644_v16, 2  ;;  %1955 = vst [vmem:[#allocation1 + $0x23] ss:$4 sm:$0xff] %v4644_v16 }
 0xb4d   :  { %1958 = vst [vmem:[#allocation1] ss:$4 sm:$0xff] %v4647_v31 }
 0xb52   :  { %v4653_v36 = vld.sshfl [vmem:[#allocation1 + $0x20] sm:$0xff pattern:$0x73625140] }
 0xb53   :  { %1968 = vst [vmem:[#allocation1 + $0x20] ss:$4 sm:$0xff] %v4632_v24 }
 0xb54   :  { %v4656_v50 = vld.sshfl [vmem:[#allocation1] sm:$0xff pattern:$0x73625140]  ;;  %1970 = vst [vmem:[#allocation1 + $0x21] ss:$4 sm:$0xff] %v4635_v27 }
 0xb55   :  { %1960 = vst [vmem:[#allocation1] ss:$4 sm:$0xff] %v4617_v14 }
 0xb56   :  { %1962 = vst [vmem:[#allocation1 + $0x1] ss:$4 sm:$0xff] %v4620_v63 }
 0xb57   :  { %1964 = vst [vmem:[#allocation1 + $0x2] ss:$4 sm:$0xff] %v4623_v23 }
 0xb58   :  { %1966 = vst [vmem:[#allocation1 + $0x3] ss:$4 sm:$0xff] %v4629_v22 }
 0xb59   :  { %1972 = vst [vmem:[#allocation1 + $0x22] ss:$4 sm:$0xff] %v4638_v20 }
 0xb5a   :  { %1974 = vst [vmem:[#allocation1 + $0x23] ss:$4 sm:$0xff] %v4644_v16 }
 0xb5f   :  { %v4665_v2 = vld.sshfl [vmem:[#allocation1] sm:$0xff pattern:$0x73625140] }
 0xb60   :  { %1977 = vst [vmem:[#allocation1] ss:$4 sm:$0xff] %v4647_v31 }
 0xb61   :  { %v4668_v46 = vld.sshfl [vmem:[#allocation1 + $0x20] sm:$0xff pattern:$0x73625140] }
 0xb62   :  { %2097 = vst [vmem:[#allocation1 + $0x20] ss:$4 sm:$0xff] %v4581_v51 }
 0xb63   :  { %2099 = vst [vmem:[#allocation1 + $0x21] ss:$4 sm:$0xff] %v4584_v61 }
 0xb64   :  { %2101 = vst [vmem:[#allocation1 + $0x22] ss:$4 sm:$0xff] %v4587_v10 }
 0xb65   :  { %2103 = vst [vmem:[#allocation1 + $0x23] ss:$4 sm:$0xff] %v4590_v7 }
 0xb67   :  { %v1978_v29 = vld.sshfl [vmem:[#allocation1] sm:$0xff pattern:$0x73625140] }
 0xb68   :  { %2089 = vst [vmem:[#allocation1] ss:$4 sm:$0xff] %v4566_v28  ;;  %1983 = vrot.lane.b32.xlu2 %v1978_v29, %s3516_s5 }
 0xb69   :  { %2091 = vst [vmem:[#allocation1 + $0x1] ss:$4 sm:$0xff] %v4569_v4 }
 0xb6a   :  { %2093 = vst [vmem:[#allocation1 + $0x2] ss:$4 sm:$0xff] %v4572_v45 }
 0xb6b   :  { %2095 = vst [vmem:[#allocation1 + $0x3] ss:$4 sm:$0xff] %v4575_v47 }
 0xb6c   :  { %v4679_v43 = vld.sshfl [vmem:[#allocation1 + $0x20] sm:$0xff pattern:$0x73625140] }
 0xb6d   :  { %2161 = vst [vmem:[#allocation1 + $0x20] ss:$4 sm:$0xff] %v4632_v24 }
 0xb6e   :  { %2163 = vst [vmem:[#allocation1 + $0x21] ss:$4 sm:$0xff] %v4635_v27 }
 0xb6f   :  { %2165 = vst [vmem:[#allocation1 + $0x22] ss:$4 sm:$0xff] %v4638_v20 }
 0xb70   :  { %2167 = vst [vmem:[#allocation1 + $0x23] ss:$4 sm:$0xff] %v4644_v16 }
 0xb72   :  { %v4685_v44 = vld.sshfl [vmem:[#allocation1] sm:$0xff pattern:$0x73625140] }
 0xb73   :  { %2106 = vst [vmem:[#allocation1] ss:$4 sm:$0xff] %v4602_v53  ;;  %v3296_v0 = vpack.i.bf16 %v4685_v44, %v4679_v43 }
 0xb77   :  { %v4688_v41 = vld.sshfl [vmem:[#allocation1 + $0x20] sm:$0xff pattern:$0x73625140] }
 0xb78   :  { %2225 = vst [vmem:[#allocation1 + $0x20] ss:$4 sm:$0xff] %v4581_v51 }
 0xb79   :  { %2227 = vst [vmem:[#allocation1 + $0x21] ss:$4 sm:$0xff] %v4584_v61 }
 0xb7a   :  { %2229 = vst [vmem:[#allocation1 + $0x22] ss:$4 sm:$0xff] %v4587_v10  ;;  %v4693_v3 = vld.sshfl [vmem:[#allocation1] sm:$0xff pattern:$0x73625140] }
 0xb7b   :  { %2231 = vst [vmem:[#allocation1 + $0x23] ss:$4 sm:$0xff] %v4590_v7 }
 0xb7c   :  { %2153 = vst [vmem:[#allocation1] ss:$4 sm:$0xff] %v4617_v14 }
 0xb7d   :  { %2155 = vst [vmem:[#allocation1 + $0x1] ss:$4 sm:$0xff] %v4620_v63 }
 0xb7e   :  { %2157 = vst [vmem:[#allocation1 + $0x2] ss:$4 sm:$0xff] %v4623_v23 }
 0xb7f   :  { %2159 = vst [vmem:[#allocation1 + $0x3] ss:$4 sm:$0xff] %v4629_v22 }
 0xb82   :  { %v2233_v48 = vld.sshfl [vmem:[#allocation1 + $0x20] sm:$0xff pattern:$0x73625140] }
 0xb83   :  { %2250 = vst [vmem:[#allocation1 + $0x20] ss:$4 sm:$0xff] %v4581_v51 }
 0xb84   :  { %2252 = vst [vmem:[#allocation1 + $0x21] ss:$4 sm:$0xff] %v4584_v61 }
 0xb85   :  { %2254 = vst [vmem:[#allocation1 + $0x22] ss:$4 sm:$0xff] %v4587_v10 }
 0xb86   :  { %2256 = vst [vmem:[#allocation1 + $0x23] ss:$4 sm:$0xff] %v4590_v7  ;;  %v4704_v37 = vld.sshfl [vmem:[#allocation1] sm:$0xff pattern:$0x73625140] }
 0xb87   :  { %2170 = vst [vmem:[#allocation1] ss:$4 sm:$0xff] %v4647_v31 }
 0xb8d   :  { %v2258_v49 = vld.sshfl [vmem:[#allocation1 + $0x20] sm:$0xff pattern:$0x73625140] }
 0xb8e   :  { %2263 = vrot.lane.b32.xlu1 %v2258_v49, %s3517_s30  ;;  %2313 = vst [vmem:[#allocation1 + $0x20] ss:$4 sm:$0xff] %v4632_v24  ;;  %v4710_v39 = vld.sshfl [vmem:[#allocation1] sm:$0xff pattern:$0x73625140]  ;;  %v3512_v49 = vld [vmem:[%s5182_s2 + $0x18] sm:$0xff] }
 0xb8f   :  { %2315 = vst [vmem:[#allocation1 + $0x21] ss:$4 sm:$0xff] %v4635_v27 }
 0xb90   :  { %2317 = vst [vmem:[#allocation1 + $0x22] ss:$4 sm:$0xff] %v4638_v20  ;;  %v1898_v35 = vpop.permute.xlu2 %1897 }
 0xb91   :  { %2319 = vst [vmem:[#allocation1 + $0x23] ss:$4 sm:$0xff] %v4644_v16 }
 0xb92   :  { %2217 = vst [vmem:[#allocation1] ss:$4 sm:$0xff] %v4566_v28 }
 0xb93   :  { %2219 = vst [vmem:[#allocation1 + $0x1] ss:$4 sm:$0xff] %v4569_v4 }
 0xb94   :  { %2221 = vst [vmem:[#allocation1 + $0x2] ss:$4 sm:$0xff] %v4572_v45 }
 0xb95   :  { %2223 = vst [vmem:[#allocation1 + $0x3] ss:$4 sm:$0xff] %v4575_v47 }
 0xb98   :  { %v2321_v26 = vld.sshfl [vmem:[#allocation1 + $0x20] sm:$0xff pattern:$0x73625140]  ;;  %v1900_v57 = vpop.permute.xlu1 %1899 }
 0xb99   :  { %2338 = vst [vmem:[#allocation1 + $0x20] ss:$4 sm:$0xff] %v4632_v24 }
 0xb9a   :  { %2340 = vst [vmem:[#allocation1 + $0x21] ss:$4 sm:$0xff] %v4635_v27 }
 0xb9b   :  { %2342 = vst [vmem:[#allocation1 + $0x22] ss:$4 sm:$0xff] %v4638_v20 }
 0xb9c   :  { %v2232_v21 = vld.sshfl [vmem:[#allocation1] sm:$0xff pattern:$0x73625140]  ;;  %2344 = vst [vmem:[#allocation1 + $0x23] ss:$4 sm:$0xff] %v4644_v16 }
 0xb9d   :  { %2236 = vrot.lane.b32.xlu1 %v2232_v21, %s3518_s24  ;;  %2234 = vst [vmem:[#allocation1] ss:$4 sm:$0xff] %v4602_v53 }
 0xba3   :  { %v2346_v52 = vld.sshfl [vmem:[#allocation1 + $0x20] sm:$0xff pattern:$0x73625140] }
 0xba4   :  { %v2235_v40 = vld.sshfl [vmem:[#allocation1] sm:$0xff pattern:$0x73625140]  ;;  %2467 = vst [vmem:[#allocation1 + $0x20] ss:$4 sm:$0xff] %v4581_v51 }
 0xba5   :  { %2242 = vst [vmem:[#allocation1] ss:$4 sm:$0xff] %v4566_v28 }
 0xba6   :  { %2244 = vst [vmem:[#allocation1 + $0x1] ss:$4 sm:$0xff] %v4569_v4 }
 0xba7   :  { %2246 = vst [vmem:[#allocation1 + $0x2] ss:$4 sm:$0xff] %v4572_v45 }
 0xba8   :  { %2248 = vst [vmem:[#allocation1 + $0x3] ss:$4 sm:$0xff] %v4575_v47 }
 0xba9   :  { %2469 = vst [vmem:[#allocation1 + $0x21] ss:$4 sm:$0xff] %v4584_v61 }
 0xbaa   :  { %2471 = vst [vmem:[#allocation1 + $0x22] ss:$4 sm:$0xff] %v4587_v10 }
 0xbab   :  { %2473 = vst [vmem:[#allocation1 + $0x23] ss:$4 sm:$0xff] %v4590_v7 }
 0xbaf   :  { %v2257_v34 = vld.sshfl [vmem:[#allocation1] sm:$0xff pattern:$0x73625140] }
 0xbb0   :  { %2261 = vrot.lane.b32.xlu2 %v2257_v34, %s3517_s30  ;;  %2259 = vst [vmem:[#allocation1] ss:$4 sm:$0xff] %v4602_v53  ;;  %v1902_v55 = vpop.permute.xlu0 %1901  ;;  %v3513_v34 = vld [vmem:[%s5182_s2 + $0x20] sm:$0xff] }
 0xbb1   :  { %3186 = vmatpush.xpose.msk.msra.mxu0 %vm538_vm7, %v1902_v55 }
 0xbb2   :  { %v4735_v25 = vld.sshfl [vmem:[#allocation1 + $0x20] sm:$0xff pattern:$0x73625140] }
 0xbb3   :  { %2531 = vst [vmem:[#allocation1 + $0x20] ss:$4 sm:$0xff] %v4632_v24 }
 0xbb4   :  { %2533 = vst [vmem:[#allocation1 + $0x21] ss:$4 sm:$0xff] %v4635_v27 }
 0xbb5   :  { %3187 = vmatpush.xpose.msk.msra.mxu0 %vm538_vm7, %v1900_v57  ;;  %2535 = vst [vmem:[#allocation1 + $0x22] ss:$4 sm:$0xff] %v4638_v20  ;;  %v3511_v20 = vld [vmem:[%s5182_s2 + $0x10] sm:$0x3] }
 0xbb6   :  { %2537 = vst [vmem:[#allocation1 + $0x23] ss:$4 sm:$0xff] %v4644_v16 }
 0xbb7   :  { %v2260_v58 = vld.sshfl [vmem:[#allocation1] sm:$0xff pattern:$0x73625140] }
 0xbb8   :  { %2238 = vrot.lane.b32.xlu2 %v2233_v48, %s3518_s24  ;;  %2265 = vrot.lane.b32.xlu0 %v2260_v58, %s3517_s30  ;;  %2305 = vst [vmem:[#allocation1] ss:$4 sm:$0xff] %v4617_v14 }
 0xbb9   :  { %2307 = vst [vmem:[#allocation1 + $0x1] ss:$4 sm:$0xff] %v4620_v63  ;;  %3188 = vmatpush.xpose.msk.msra.mxu0 %vm538_vm7, %v1898_v35 }
 0xbba   :  { %2309 = vst [vmem:[#allocation1 + $0x2] ss:$4 sm:$0xff] %v4623_v23 }
 0xbbb   :  { %2311 = vst [vmem:[#allocation1 + $0x3] ss:$4 sm:$0xff] %v4629_v22 }
 0xbbc   :  { %3189 = vmatmul.msk.f32.vlgmr.msra.gmra.mxu0 %vm538_vm7, %v4604_v18  ;;  %v4807_v18 = vld [vmem:[%s5182_s2] sm:$0xff] }
 0xbc0   :  { %2351 = vrot.lane.b32.xlu2 %v2346_v52, %s3517_s30  ;;  %1981 = vrot.lane.b32.xlu0 %v4668_v46, %s3516_s5 }
 0xbc2   :  { %v1984_v54 = vpop.permute.xlu2 %1983  ;;  %v2320_v32 = vld.sshfl [vmem:[#allocation1] sm:$0xff pattern:$0x73625140] }
 0xbc3   :  { %3192 = vmatpush.xpose.msk.msrb.mxu1 %vm538_vm7, %v1984_v54  ;;  %2322 = vst [vmem:[#allocation1] ss:$4 sm:$0xff] %v4647_v31 }
 0xbc4   :  { %3190 = vmatmul.msk.f32.gmra.mxu0 %vm538_vm7, %v4596_v62 }
 0xbc8   :  { %2326 = vrot.lane.b32.xlu2 %v2321_v26, %s3518_s24  ;;  %1979 = vrot.lane.b32.xlu0 %v4665_v2, %s3516_s5 }
 0xbca   :  { %v2323_v59 = vld.sshfl [vmem:[#allocation1] sm:$0xff pattern:$0x73625140] }
 0xbcb   :  { %2330 = vst [vmem:[#allocation1] ss:$4 sm:$0xff] %v4617_v14 }
 0xbcc   :  { %2332 = vst [vmem:[#allocation1 + $0x1] ss:$4 sm:$0xff] %v4620_v63  ;;  %3191 = vmatmul.msk.f32.gmra.mxu0 %vm538_vm7, %v4608_v60 }
 0xbcd   :  { %2334 = vst [vmem:[#allocation1 + $0x2] ss:$4 sm:$0xff] %v4623_v23 }
 0xbce   :  { %2336 = vst [vmem:[#allocation1 + $0x3] ss:$4 sm:$0xff] %v4629_v22 }
 0xbd0   :  { %3297 = vrot.lane.b32.xlu2 %v3296_v0, %s5224_s10  ;;  %2240 = vrot.lane.b32.xlu0 %v2235_v40, %s3518_s24  ;;  %v3514_v0 = vld [vmem:[%s5182_s2 + $0x28] sm:$0x3]  ;;  %s5225_s2 = smov 48  }
 0xbd5   :  { %v2345_v42 = vld.sshfl [vmem:[#allocation1] sm:$0xff pattern:$0x73625140] }
 0xbd6   :  { %2347 = vst [vmem:[#allocation1] ss:$4 sm:$0xff] %v4647_v31 }
 0xbd8   :  { %2324 = vrot.lane.b32.xlu0 %v2320_v32, %s3518_s24 }
 0xbdd   :  { %v2348_v1 = vld.sshfl [vmem:[#allocation1] sm:$0xff pattern:$0x73625140] }
 0xbde   :  { %2353 = vrot.lane.b32.xlu1 %v2348_v1, %s3517_s30  ;;  %2459 = vst [vmem:[#allocation1] ss:$4 sm:$0xff] %v4566_v28 }
 0xbdf   :  { %2461 = vst [vmem:[#allocation1 + $0x1] ss:$4 sm:$0xff] %v4569_v4  ;;  %v3301_v4 = vpack.i.bf16 %v4704_v37, %v4688_v41 }
 0xbe0   :  { %2463 = vst [vmem:[#allocation1 + $0x2] ss:$4 sm:$0xff] %v4572_v45  ;;  %2112 = vrot.lane.b32.xlu0 %v4693_v3, %s5224_s10 }
 0xbe1   :  { %2465 = vst [vmem:[#allocation1 + $0x3] ss:$4 sm:$0xff] %v4575_v47 }
 0xbe6   :  { %2349 = vrot.lane.b32.xlu1 %v2345_v42, %s3517_s30 }
 0xbe8   :  { %v4781_v38 = vld.sshfl [vmem:[#allocation1] sm:$0xff pattern:$0x73625140] }
 0xbe9   :  { %2476 = vst [vmem:[#allocation1] ss:$4 sm:$0xff] %v4602_v53 }
 0xbee   :  { %2328 = vrot.lane.b32.xlu1 %v2323_v59, %s3518_s24 }
 0xbf0   :  { %v4785_v51 = vld.sshfl [vmem:[#allocation1] sm:$0xff pattern:$0x73625140] }
 0xbf1   :  { %2523 = vst [vmem:[#allocation1] ss:$4 sm:$0xff] %v4617_v14 }
 0xbf2   :  { %2525 = vst [vmem:[#allocation1 + $0x1] ss:$4 sm:$0xff] %v4620_v63 }
 0xbf3   :  { %2527 = vst [vmem:[#allocation1 + $0x2] ss:$4 sm:$0xff] %v4623_v23 }
 0xbf4   :  { %2529 = vst [vmem:[#allocation1 + $0x3] ss:$4 sm:$0xff] %v4629_v22 }
 0xbf6   :  { %2176 = vrot.lane.b32.xlu1 %v4710_v39, %s5224_s10 }
 0xbfb   :  { %v4793_v28 = vld.sshfl [vmem:[#allocation1] sm:$0xff pattern:$0x73625140] }
 0xbfc   :  { %2540 = vst [vmem:[#allocation1] ss:$4 sm:$0xff] %v4647_v31 }
 0xbfe   :  { %3302 = vrot.lane.b32.xlu1 %v3301_v4, %s5224_s10 }
 0xc00   :  { %v2264_v61 = vpop.permute.xlu1 %2263 }
 0xc0a   :  { %v2262_v45 = vpop.permute.xlu2 %2261 }
 0xc0f   :  { %v2237_v62 = vpop.permute.xlu1 %2236 }
 0xc12   :  { %v2239_v10 = vpop.permute.xlu2 %2238 }
 0xc1a   :  { %v2352_v60 = vpop.permute.xlu2 %2351 }
 0xc22   :  { %v2327_v22 = vpop.permute.xlu2 %2326 }
 0xc2a   :  { %v2266_v47 = vpop.permute.xlu0 %2265  ;;  %v3298_v31 = vpop.permute.xlu2 %3297 }
 0xc2b   :  { %3206 = vmatpush.xpose.msk.msra.mxu2 %vm538_vm7, %v2266_v47  ;;  %v3299_v2 = vunpack.i.l.bf16 %v3298_v31  ;;  %v3300_v46 = vunpack.i.h.bf16 %v3298_v31 }
 0xc2f   :  { %3207 = vmatpush.xpose.msk.msra.mxu2 %vm538_vm7, %v2264_v61 }
 0xc32   :  { %v1982_v7 = vpop.permute.xlu0 %1981 }
 0xc33   :  { %3193 = vmatpush.xpose.msk.msrb.mxu1 %vm538_vm7, %v1982_v7  ;;  %3208 = vmatpush.xpose.msk.msra.mxu2 %vm538_vm7, %v2262_v45 }
 0xc36   :  { %3209 = vmatmul.msk.f32.vlgmr.msra.gmra.mxu2 %vm538_vm7, %v2237_v62 }
 0xc39   :  { %v1932_v13 = vpop.f32.mrf.mxu0 }
 0xc3a   :  { %v1980_v53 = vpop.permute.xlu0 %1979  ;;  %v4810_v56 = vadd.f32 %v4807_v18, %v1932_v13 }
 0xc3b   :  { %3194 = vmatpush.xpose.msk.msrb.mxu1 %vm538_vm7, %v1980_v53 }
 0xc3c   :  { %v2023_v12 = vsel %vm659_vm9, %v4810_v56, -inf }
 0xc3d   :  { %2024 = vmax.xlane.f32.xlu0 %v2023_v12 }
 0xc3e   :  { %3195 = vmatmul.msk.f32.vlgmr.msrb.gmra.mxu1 %vm538_vm7, %v4650_v9  ;;  %3210 = vmatmul.msk.f32.gmra.mxu2 %vm538_vm7, %v2239_v10 }
 0xc41   :  { %v1935_v14 = vpop.f32.mrf.mxu0 }
 0xc42   :  { %v2241_v63 = vpop.permute.xlu0 %2240  ;;  %v4821_v23 = vadd.f32 %v3510_v19, %v1935_v14 }
 0xc44   :  { %v2026_v5 = vsel %vm659_vm9, %v4821_v23, -inf }
 0xc45   :  { %2027 = vmax.xlane.f32.xlu2 %v2026_v5 }
 0xc46   :  { %3196 = vmatmul.msk.f32.gmra.mxu1 %vm538_vm7, %v4653_v36  ;;  %3211 = vmatmul.msk.f32.gmra.mxu2 %vm538_vm7, %v2241_v63 }
 0xc49   :  { %v1938_v24 = vpop.f32.mrf.mxu0 }
 0xc4a   :  { %v2325_v27 = vpop.permute.xlu0 %2324  ;;  %v4831_v30 = vadd.f32 %v3511_v20, %v1938_v24 }
 0xc4c   :  { %v2029_v16 = vsel %vm666_vm10, %v4831_v30, -inf }
 0xc4d   :  { %2030 = vmax.xlane.f32.xlu1 %v2029_v16 }
 0xc4e   :  { %3197 = vmatmul.msk.f32.gmra.mxu1 %vm538_vm7, %v4656_v50 }
 0xc50   :  { %v2354_v9 = vpop.permute.xlu1 %2353 }
 0xc51   :  { %3212 = vmatpush.xpose.msk.msra.mxu1 %vm538_vm7, %v2354_v9 }
 0xc52   :  { %v2113_v36 = vpop.permute.xlu0 %2112 }
 0xc53   :  { %3198 = vmatpush.msk.msra.mxu3 %vm763_vm8, %v2113_v36 }
 0xc55   :  { %3213 = vmatpush.xpose.msk.msra.mxu1 %vm538_vm7, %v2352_v60  ;;  %2141 = vmatpush.msra.mxu3 %v3299_v2 }
 0xc57   :  { %2142 = vmatpush.msra.mxu3 %v3300_v46 }
 0xc58   :  { %v2350_v29 = vpop.permute.xlu1 %2349 }
 0xc59   :  { %3214 = vmatpush.xpose.msk.msra.mxu1 %vm538_vm7, %v2350_v29 }
 0xc5c   :  { %3215 = vmatmul.msk.f32.vlgmr.msra.gmra.mxu1 %vm538_vm7, %v2325_v27 }
 0xc60   :  { %v2329_v43 = vpop.permute.xlu1 %2328 }
 0xc64   :  { %3216 = vmatmul.msk.f32.gmra.mxu1 %vm538_vm7, %v2327_v22 }
 0xc68   :  { %v2177_v50 = vpop.permute.xlu1 %2176 }
 0xc69   :  { %3202 = vmatpush.msk.msrb.mxu0 %vm763_vm8, %v2177_v50 }
 0xc6c   :  { %3217 = vmatmul.msk.f32.gmra.mxu1 %vm538_vm7, %v2329_v43 }
 0xc70   :  { %v3303_v44 = vpop.permute.xlu1 %3302 }
 0xc71   :  { %v3304_v41 = vunpack.i.l.bf16 %v3303_v44  ;;  %v3305_v3 = vunpack.i.h.bf16 %v3303_v44 }
 0xc73   :  { %2205 = vmatpush.msrb.mxu0 %v3304_v41 }
 0xc75   :  { %2206 = vmatpush.msrb.mxu0 %v3305_v3 }
 0xcb0   :  { %v2025_v54 = vpop.xlane.xlu0 %2024 }
 0xcb1   :  { %v2041_v1 = vsub.f32 %v4810_v56, %v2025_v54 }
 0xcb3   :  { %v2047_v47 = vmul.f32 1.442695, %v2041_v1 }
 0xcb5   :  { %3437 = vpow2.f32 %v2047_v47 }
 0xcb8   :  { %v2028_v7 = vpop.xlane.xlu2 %2027 }
 0xcb9   :  { %v2296_v48 = vpop.f32.mrf.mxu2  ;;  %v2042_v56 = vsub.f32 %v4821_v23, %v2028_v7 }
 0xcba   :  { %v2297_v61 = vadd.f32 %v4807_v18, %v2296_v48 }
 0xcbb   :  { %v2014_v37 = vpop.f32.mrf.mxu1  ;;  %v4873_v53 = vpop.eup %3437  ;;  %v2049_v18 = vmul.f32 1.442695, %v2042_v56 }
 0xcbc   :  { %v2015_v39 = vadd.f32 %v3512_v49, %v2014_v37  ;;  %v2393_v10 = vsel %vm659_vm9, %v2297_v61, -inf  ;;  %v2059_v12 = vsel %vm659_vm9, %v4873_v53, 0.0 }
 0xcbd   :  { %3439 = vpow2.f32 %v2049_v18 }
 0xcbe   :  { %v2032_v26 = vsel %vm659_vm9, %v2015_v39, -inf }
 0xcbf   :  { %2033 = vmax.xlane.f32.xlu0 %v2032_v26 }
 0xcc1   :  { %v2299_v21 = vpop.f32.mrf.mxu2 }
 0xcc2   :  { %v4849_v52 = vadd.f32 %v3510_v19, %v2299_v21 }
 0xcc3   :  { %v2017_v40 = vpop.f32.mrf.mxu1  ;;  %v4884_v5 = vpop.eup %3439 }
 0xcc4   :  { %v2018_v55 = vadd.f32 %v3513_v34, %v2017_v40  ;;  %v2396_v57 = vsel %vm659_vm9, %v4849_v52, -inf  ;;  %v2062_v23 = vsel %vm659_vm9, %v4884_v5, 0.0 }
 0xcc6   :  { %v2035_v58 = vsel %vm659_vm9, %v2018_v55, -inf }
 0xcc7   :  { %2397 = vmax.xlane.f32.xlu0 %v2396_v57  ;;  %2036 = vmax.xlane.f32.xlu1 %v2035_v58 }
 0xcc9   :  { %v2302_v35 = vpop.f32.mrf.mxu2 }
 0xcca   :  { %v4857_v32 = vadd.f32 %v3511_v20, %v2302_v35  ;;  %v2031_v20 = vpop.xlane.xlu1 %2030 }
 0xccb   :  { %v2020_v59 = vpop.f32.mrf.mxu1  ;;  %v2043_v16 = vsub.f32 %v4831_v30, %v2031_v20 }
 0xccc   :  { %v4862_v42 = vadd.f32 %v3514_v0, %v2020_v59  ;;  %v2399_v45 = vsel %vm666_vm10, %v4857_v32, -inf }
 0xccd   :  { %v2051_v31 = vmul.f32 1.442695, %v2043_v16 }
 0xcce   :  { %v2038_v4 = vsel %vm666_vm10, %v4862_v42, -inf }
 0xccf   :  { %2039 = vmax.xlane.f32.xlu2 %v2038_v4  ;;  %2400 = vmax.xlane.f32.xlu1 %v2399_v45  ;;  %3441 = vpow2.f32 %v2051_v31 }
 0xcd5   :  { %v4895_v9 = vpop.eup %3441 }
 0xcd6   :  { %v2065_v36 = vsel %vm666_vm10, %v4895_v9, 0.0 }
 0xcd7   :  { %2394 = vmax.xlane.f32.xlu2 %v2393_v10 }
 0xcd9   :  { %v2384_v62 = vpop.f32.mrf.mxu1 }
 0xcda   :  { %v4871_v13 = vadd.f32 %v3512_v49, %v2384_v62 }
 0xcdc   :  { %v2402_v60 = vsel %vm659_vm9, %v4871_v13, -inf }
 0xcdd   :  { %2403 = vmax.xlane.f32.xlu0 %v2402_v60 }
 0xcdf   :  { %2060 = vadd.xlane.f32.xlu2 %v2059_v12 }
 0xce1   :  { %v2387_v14 = vpop.f32.mrf.mxu1 }
 0xce2   :  { %v4880_v63 = vadd.f32 %v3513_v34, %v2387_v14  ;;  %v2541_v14 = vld.sshfl [vmem:[#allocation1] sm:$0xff pattern:$0x73625140] }
 0xce4   :  { %v2405_v19 = vsel %vm659_vm9, %v4880_v63, -inf }
 0xce5   :  { %2406 = vmax.xlane.f32.xlu1 %v2405_v19 }
 0xce9   :  { %v2390_v22 = vpop.f32.mrf.mxu1 }
 0xcea   :  { %v4888_v24 = vadd.f32 %v3514_v0, %v2390_v22 }
 0xcec   :  { %v2408_v27 = vsel %vm666_vm10, %v4888_v24, -inf }
 0xced   :  { %2063 = vadd.xlane.f32.xlu1 %v2062_v23 }
 0xcf1   :  { %2482 = vrot.lane.b32.xlu0 %v4785_v51, %s5225_s2 }
 0xcf5   :  { %2409 = vmax.xlane.f32.xlu1 %v2408_v27 }
 0xd1b   :  { %2066 = vadd.xlane.f32.xlu0 %v2065_v36 }
 0xd32   :  { %v2034_v2 = vpop.xlane.xlu0 %2033 }
 0xd33   :  { %v2044_v46 = vsub.f32 %v2015_v39, %v2034_v2 }
 0xd35   :  { %v2053_v29 = vmul.f32 1.442695, %v2044_v46 }
 0xd37   :  { %3443 = vpow2.f32 %v2053_v29 }
 0xd3a   :  { %v2398_v51 = vpop.xlane.xlu0 %2397  ;;  %v2037_v43 = vpop.xlane.xlu1 %2036 }
 0xd3b   :  { %v2412_v50 = vsub.f32 %v4849_v52, %v2398_v51  ;;  %v2045_v44 = vsub.f32 %v2018_v55, %v2037_v43 }
 0xd3d   :  { %v4900_v41 = vpop.eup %3443  ;;  %v2419_v30 = vmul.f32 1.442695, %v2412_v50  ;;  %v2055_v3 = vmul.f32 1.442695, %v2045_v44 }
 0xd3e   :  { %v2068_v48 = vsel %vm659_vm9, %v4900_v41, 0.0 }
 0xd3f   :  { %3445 = vpow2.f32 %v2419_v30  ;;  %2069 = vadd.xlane.f32.xlu1 %v2068_v48 }
 0xd40   :  { %3447 = vpow2.f32 %v2055_v3 }
 0xd42   :  { %v2040_v37 = vpop.xlane.xlu2 %2039  ;;  %v2401_v49 = vpop.xlane.xlu1 %2400 }
 0xd43   :  { %v2413_v39 = vsub.f32 %v4857_v32, %v2401_v49  ;;  %v2046_v19 = vsub.f32 %v4862_v42, %v2040_v37 }
 0xd45   :  { %v4905_v26 = vpop.eup %3445  ;;  %v2421_v21 = vmul.f32 1.442695, %v2413_v39  ;;  %v2057_v23 = vmul.f32 1.442695, %v2046_v19 }
 0xd46   :  { %v4907_v40 = vpop.eup %3447  ;;  %v2432_v52 = vsel %vm659_vm9, %v4905_v26, 0.0 }
 0xd47   :  { %v2071_v34 = vsel %vm659_vm9, %v4907_v40, 0.0  ;;  %2433 = vadd.xlane.f32.xlu0 %v2432_v52  ;;  %3449 = vpow2.f32 %v2421_v21 }
 0xd48   :  { %2072 = vadd.xlane.f32.xlu1 %v2071_v34 }
 0xd4a   :  { %v2395_v55 = vpop.xlane.xlu2 %2394 }
 0xd4b   :  { %v2411_v57 = vsub.f32 %v2297_v61, %v2395_v55  ;;  %v2539_v61 = vld.sshfl [vmem:[#allocation1 + $0x20] sm:$0xff pattern:$0x73625140] }
 0xd4c   :  { %v3311_v7 = vpack.i.bf16 %v4793_v28, %v2539_v61 }
 0xd4d   :  { %v2417_v58 = vmul.f32 1.442695, %v2411_v57  ;;  %v4913_v35 = vpop.eup %3449 }
 0xd4e   :  { %v2435_v54 = vsel %vm666_vm10, %v4913_v35, 0.0 }
 0xd4f   :  { %3451 = vpow2.f32 %v2417_v58 }
 0xd50   :  { %v2404_v32 = vpop.xlane.xlu0 %2403  ;;  %2436 = vadd.xlane.f32.xlu1 %v2435_v54 }
 0xd51   :  { %v2414_v59 = vsub.f32 %v4871_v13, %v2404_v32 }
 0xd52   :  { %v2061_v0 = vpop.xlane.xlu2 %2060 }
 0xd53   :  { %v2423_v1 = vmul.f32 1.442695, %v2414_v59  ;;  %3453 = vrcp.f32 %v2061_v0 }
 0xd55   :  { %v4918_v4 = vpop.eup %3451  ;;  %3455 = vpow2.f32 %v2423_v1 }
 0xd56   :  { %v2429_v45 = vsel %vm659_vm9, %v4918_v4, 0.0 }
 0xd57   :  { %2430 = vadd.xlane.f32.xlu2 %v2429_v45 }
 0xd58   :  { %v2407_v47 = vpop.xlane.xlu1 %2406 }
 0xd59   :  { %v3454_v10 = vpop.eup %3453  ;;  %v2415_v22 = vsub.f32 %v4880_v63, %v2407_v47 }
 0xd5a   :  { %v2083_v62 = vmul.f32 %v3454_v10, %v4873_v53  ;;  %v3306_v53 = vpack.i.bf16 %v4781_v38, %v4735_v25 }
 0xd5b   :  { %v4924_v56 = vpop.eup %3455  ;;  %3312 = vrot.lane.b32.xlu0 %v3311_v7, %s5225_s2  ;;  %v2425_v20 = vmul.f32 1.442695, %v2415_v22 }
 0xd5c   :  { %v2438_v13 = vsel %vm659_vm9, %v4924_v56, 0.0  ;;  %3199 = vmatmul.msk.f32.vlgmr.msra.gmra.mxu3 %vm659_vm9, %v2083_v62 }
 0xd5d   :  { %2439 = vadd.xlane.f32.xlu1 %v2438_v13 }
 0xd60   :  { %v2064_v60 = vpop.xlane.xlu1 %2063 }
 0xd61   :  { %3457 = vrcp.f32 %v2064_v60 }
 0xd62   :  { %3459 = vpow2.f32 %v2057_v23 }
 0xd63   :  { %v2483_v12 = vpop.permute.xlu0 %2482 }
 0xd64   :  { %3218 = vmatpush.msk.msrb.mxu3 %vm763_vm8, %v2483_v12 }
 0xd67   :  { %v3458_v18 = vpop.eup %3457 }
 0xd68   :  { %v2084_v28 = vmul.f32 %v3458_v18, %v4884_v5  ;;  %v2410_v5 = vpop.xlane.xlu1 %2409  ;;  %v3460_v16 = vpop.eup %3459 }
 0xd69   :  { %v2416_v25 = vsub.f32 %v4888_v24, %v2410_v5  ;;  %v2074_v36 = vsel %vm666_vm10, %v3460_v16, 0.0  ;;  %v3228_v5 = vld [vmem:[%s5184_s11 + $0x30] sm:$0xff] }
 0xd6a   :  { %3200 = vmatmul.msk.f32.gmra.mxu3 %vm659_vm9, %v2084_v28 }
 0xd6b   :  { %v2427_v42 = vmul.f32 1.442695, %v2416_v25 }
 0xd6f   :  { %3307 = vrot.lane.b32.xlu2 %v3306_v53, %s5225_s2 }
 0xd76   :  { %2546 = vrot.lane.b32.xlu1 %v2541_v14, %s5225_s2 }
 0xd8e   :  { %v2067_v27 = vpop.xlane.xlu0 %2066 }
 0xd8f   :  { %3461 = vrcp.f32 %v2067_v27 }
 0xd90   :  { %3463 = vpow2.f32 %v2425_v20  ;;  %v3229_v20 = vld [vmem:[%s5184_s11 + $0x38] sm:$0xff] }
 0xd91   :  { %3465 = vpow2.f32 %v2427_v42  ;;  %2692 = vmatpush.msrb.mxu2 %v3229_v20 }
 0xd93   :  { %2693 = vmatpush.msrb.mxu2 %v3228_v5 }
 0xd95   :  { %v3462_v31 = vpop.eup %3461 }
 0xd96   :  { %v2085_v38 = vmul.f32 %v3462_v31, %v4895_v9  ;;  %v3464_v2 = vpop.eup %3463  ;;  %v3226_v31 = vld [vmem:[%s5184_s11 + $0x20] sm:$0xff] }
 0xd97   :  { %v2441_v63 = vsel %vm659_vm9, %v3464_v2, 0.0  ;;  %v3466_v46 = vpop.eup %3465 }
 0xd98   :  { %3201 = vmatmul.msk.f32.gmra.mxu3 %vm659_vm9, %v2085_v38  ;;  %2075 = vadd.xlane.f32.xlu2 %v2074_v36  ;;  %v2444_v29 = vsel %vm666_vm10, %v3466_v46, 0.0 }
 0xda0   :  { %2442 = vadd.xlane.f32.xlu2 %v2441_v63 }
 0xda8   :  { %2445 = vadd.xlane.f32.xlu2 %v2444_v29 }
 0xdb2   :  { %v2070_v51 = vpop.xlane.xlu1 %2069 }
 0xdb3   :  { %3467 = vrcp.f32 %v2070_v51 }
 0xdb9   :  { %v3468_v24 = vpop.eup %3467 }
 0xdba   :  { %v2086_v9 = vmul.f32 %v3468_v24, %v4900_v41  ;;  %v2434_v3 = vpop.xlane.xlu0 %2433 }
 0xdbb   :  { %v2073_v43 = vpop.xlane.xlu1 %2072 }
 0xdbc   :  { %3469 = vrcp.f32 %v2073_v43  ;;  %3203 = vmatmul.msk.f32.vlgmr.msrb.gmra.mxu0 %vm659_vm9, %v2086_v9 }
 0xdc2   :  { %v3470_v50 = vpop.eup %3469 }
 0xdc3   :  { %v2087_v44 = vmul.f32 %v3470_v50, %v4907_v40  ;;  %v2437_v21 = vpop.xlane.xlu1 %2436 }
 0xdc5   :  { %3204 = vmatmul.msk.f32.gmra.mxu0 %vm659_vm9, %v2087_v44 }
 0xdca   :  { %v2431_v30 = vpop.xlane.xlu2 %2430 }
 0xdcb   :  { %3471 = vrcp.f32 %v2431_v30 }
 0xdcc   :  { %3473 = vrcp.f32 %v2434_v3 }
 0xdcd   :  { %3475 = vrcp.f32 %v2437_v21  ;;  %v3313_v57 = vpop.permute.xlu0 %3312 }
 0xdce   :  { %v3314_v32 = vunpack.i.l.bf16 %v3313_v57  ;;  %v3315_v59 = vunpack.i.h.bf16 %v3313_v57 }
 0xdd0   :  { %v2440_v34 = vpop.xlane.xlu1 %2439 }
 0xdd1   :  { %v3472_v37 = vpop.eup %3471 }
 0xdd2   :  { %v3308_v48 = vpop.permute.xlu2 %3307  ;;  %v2453_v41 = vmul.f32 %v3472_v37, %v4918_v4  ;;  %v3474_v52 = vpop.eup %3473 }
 0xdd3   :  { %v3309_v49 = vunpack.i.l.bf16 %v3308_v48  ;;  %v3310_v39 = vunpack.i.h.bf16 %v3308_v48  ;;  %v2454_v40 = vmul.f32 %v3474_v52, %v4905_v26  ;;  %v3476_v55 = vpop.eup %3475 }
 0xdd4   :  { %v2455_v58 = vmul.f32 %v3476_v55, %v4913_v35 }
 0xdd5   :  { %2511 = vmatpush.msrb.mxu3 %v3309_v49 }
 0xdd7   :  { %2512 = vmatpush.msrb.mxu3 %v3310_v39 }
 0xdd8   :  { %3219 = vmatmul.msk.f32.vlgmr.msrb.gmra.mxu3 %vm659_vm9, %v2453_v41 }
 0xddf   :  { %v2144_v13 = vpop.f32.mrf.mxu3 }
 0xde0   :  { %3220 = vmatmul.msk.f32.gmra.mxu3 %vm659_vm9, %v2454_v40 }
 0xde8   :  { %v2547_v54 = vpop.permute.xlu1 %2546  ;;  %3221 = vmatmul.msk.f32.gmra.mxu3 %vm659_vm9, %v2455_v58 }
 0xde9   :  { %3222 = vmatpush.msk.msra.mxu0 %vm763_vm8, %v2547_v54 }
 0xdeb   :  { %2575 = vmatpush.msra.mxu0 %v3314_v32  ;;  %v3329_v32 = vld [vmem:[%s5183_s12 + $0x1] ss:$0 sm:$0xff] }
 0xded   :  { %2576 = vmatpush.msra.mxu0 %v3315_v59  ;;  %v2147_v60 = vpop.f32.mrf.mxu3 }
 0xe0b   :  { %v2076_v0 = vpop.xlane.xlu2 %2075 }
 0xe0c   :  { %3477 = vrcp.f32 %v2076_v0 }
 0xe0d   :  { %3479 = vrcp.f32 %v2440_v34 }
 0xe12   :  { %v3478_v1 = vpop.eup %3477 }
 0xe13   :  { %v2088_v26 = vmul.f32 %v3478_v1, %v3460_v16  ;;  %v2443_v4 = vpop.xlane.xlu2 %2442  ;;  %v3480_v45 = vpop.eup %3479  ;;  %v3227_v16 = vld [vmem:[%s5184_s11 + $0x28] sm:$0xff] }
 0xe14   :  { %3481 = vrcp.f32 %v2443_v4  ;;  %v2456_v35 = vmul.f32 %v3480_v45, %v4924_v56  ;;  %2694 = vmatpush.msrb.mxu2 %v3227_v16 }
 0xe15   :  { %3205 = vmatmul.msk.f32.gmra.mxu0 %vm659_vm9, %v2088_v26 }
 0xe16   :  { %2695 = vmatpush.msrb.mxu2 %v3226_v31 }
 0xe1a   :  { %v3482_v61 = vpop.eup %3481 }
 0xe1b   :  { %v2446_v47 = vpop.xlane.xlu2 %2445  ;;  %v2457_v10 = vmul.f32 %v3482_v61, %v3464_v2  ;;  %v2150_v12 = vpop.f32.mrf.mxu3 }
 0xe1c   :  { %3483 = vrcp.f32 %v2446_v47 }
 0xe1d   :  { %3223 = vmatmul.msk.f32.vlgmr.msra.gmra.mxu0 %vm659_vm9, %v2456_v35 }
 0xe22   :  { %v3484_v7 = vpop.eup %3483 }
 0xe23   :  { %v2458_v62 = vmul.f32 %v3484_v7, %v3466_v46 }
 0xe25   :  { %3224 = vmatmul.msk.f32.gmra.mxu0 %vm659_vm9, %v2457_v10 }
 0xe2d   :  { %3225 = vmatmul.msk.f32.gmra.mxu0 %vm659_vm9, %v2458_v62 }
 0xe39   :  { %v2208_v53 = vpop.f32.mrf.mxu0 }
 0xe42   :  { %v2211_v14 = vpop.f32.mrf.mxu0 }
 0xe5b   :  { %v2514_v18 = vpop.f32.mrf.mxu3 }
 0xe5c   :  { %2593 = vrot.lane.b32.xlu0 %v2514_v18, %s5226_s25 }
 0xe63   :  { %v2517_v28 = vpop.f32.mrf.mxu3 }
 0xe64   :  { %2595 = vrot.lane.b32.xlu1 %v2517_v28, %s5226_s25 }
 0xe6b   :  { %v2520_v56 = vpop.f32.mrf.mxu3 }
 0xe6c   :  { %2597 = vrot.lane.b32.xlu0 %v2520_v56, %s5226_s25 }
 0xe92   :  { %v2214_v19 = vpop.f32.mrf.mxu0 }
 0xe9a   :  { %v2578_v23 = vpop.f32.mrf.mxu0 }
 0xe9b   :  { %2599 = vrot.lane.b32.xlu2 %v2578_v23, %s5226_s25 }
 0xea2   :  { %v2581_v22 = vpop.f32.mrf.mxu0 }
 0xea3   :  { %2601 = vrot.lane.b32.xlu1 %v2581_v22, %s5226_s25 }
 0xeaa   :  { %v2584_v27 = vpop.f32.mrf.mxu0 }
 0xeab   :  { %2603 = vrot.lane.b32.xlu0 %v2584_v27, %s5226_s25 }
 0xece   :  { %v2594_v25 = vpop.permute.xlu0 %2593 }
 0xecf   :  { %v2611_v38 = vsel %vm538_vm7, %v2144_v13, %v2594_v25 }
 0xed0   :  { %v2623_v36 = vrot.slane %v2611_v38, 2  ;;  %v2624_v42 = vrot.slane %v2611_v38, 4  ;;  %v2625_v2 = vrot.slane %v2611_v38, 6  ;;  %2640 = vst [vmem:[#allocation1] ss:$4 sm:$0xff] %v2611_v38 }
 0xed2   :  { %2642 = vst [vmem:[#allocation1 + $0x1] ss:$4 sm:$0xff] %v2623_v36 }
 0xed3   :  { %2644 = vst [vmem:[#allocation1 + $0x2] ss:$4 sm:$0xff] %v2624_v42 }
 0xed4   :  { %2646 = vst [vmem:[#allocation1 + $0x3] ss:$4 sm:$0xff] %v2625_v2 }
 0xed6   :  { %v2596_v63 = vpop.permute.xlu1 %2595 }
 0xed7   :  { %v2612_v46 = vsel %vm538_vm7, %v2147_v60, %v2596_v63 }
 0xed8   :  { %v2626_v29 = vrot.slane %v2612_v46, 2  ;;  %v2627_v51 = vrot.slane %v2612_v46, 4  ;;  %v2628_v24 = vrot.slane %v2612_v46, 6  ;;  %2648 = vst [vmem:[#allocation1 + $0x20] ss:$4 sm:$0xff] %v2612_v46 }
 0xeda   :  { %2650 = vst [vmem:[#allocation1 + $0x21] ss:$4 sm:$0xff] %v2626_v29 }
 0xedb   :  { %2652 = vst [vmem:[#allocation1 + $0x22] ss:$4 sm:$0xff] %v2627_v51  ;;  %v2655_v9 = vld.sshfl [vmem:[#allocation1] sm:$0xff pattern:$0x73625140] }
 0xedc   :  { %2654 = vst [vmem:[#allocation1 + $0x23] ss:$4 sm:$0xff] %v2628_v24  ;;  %3230 = vmatmul.msk.f32.vlgmr.msrb.gmra.mxu2 %vm142_vm2, %v2655_v9 }
 0xede   :  { %v2598_v43 = vpop.permute.xlu0 %2597 }
 0xedf   :  { %v2613_v50 = vsel %vm538_vm7, %v2150_v12, %v2598_v43 }
 0xee0   :  { %2657 = vst [vmem:[#allocation1] ss:$4 sm:$0xff] %v2613_v50  ;;  %v3241_v50 = vld [vmem:[%s5188_s15 + $0x38] sm:$0xff] }
 0xee1   :  { %2894 = vmatpush.msrb.mxu1 %v3241_v50 }
 0xee3   :  { %v2656_v44 = vld.sshfl [vmem:[#allocation1 + $0x20] sm:$0xff pattern:$0x73625140] }
 0xee4   :  { %3231 = vmatmul.msk.f32.gmra.mxu2 %vm142_vm2, %v2656_v44  ;;  %v3240_v44 = vld [vmem:[%s5188_s15 + $0x30] sm:$0xff] }
 0xee5   :  { %2895 = vmatpush.msrb.mxu1 %v3240_v44 }
 0xef5   :  { %v2600_v30 = vpop.permute.xlu2 %2599 }
 0xef6   :  { %v2614_v3 = vsel %vm538_vm7, %v2208_v53, %v2600_v30 }
 0xef7   :  { %v2629_v48 = vrot.slane %v2614_v3, 2  ;;  %v2630_v37 = vrot.slane %v2614_v3, 4  ;;  %v2631_v49 = vrot.slane %v2614_v3, 6  ;;  %2658 = vst [vmem:[#allocation1 + $0x1] ss:$4 sm:$0xff] %v2614_v3  ;;  %v3239_v3 = vld [vmem:[%s5188_s15 + $0x28] sm:$0xff] }
 0xef8   :  { %2896 = vmatpush.msrb.mxu1 %v3239_v3 }
 0xef9   :  { %2659 = vst [vmem:[#allocation1 + $0x2] ss:$4 sm:$0xff] %v2629_v48 }
 0xefa   :  { %2660 = vst [vmem:[#allocation1 + $0x3] ss:$4 sm:$0xff] %v2630_v37  ;;  %v3238_v37 = vld [vmem:[%s5188_s15 + $0x20] sm:$0xff] }
 0xefb   :  { %2661 = vst [vmem:[#allocation1 + $0x20] ss:$4 sm:$0xff] %v2631_v49  ;;  %2897 = vmatpush.msrb.mxu1 %v3238_v37 }
 0xf01   :  { %v2665_v39 = vld.sshfl [vmem:[#allocation1] sm:$0xff pattern:$0x73625140] }
 0xf02   :  { %3232 = vmatmul.msk.f32.gmra.mxu2 %vm142_vm2, %v2665_v39 }
 0xf15   :  { %v2602_v21 = vpop.permute.xlu1 %2601 }
 0xf16   :  { %v2615_v41 = vsel %vm538_vm7, %v2211_v14, %v2602_v21 }
 0xf17   :  { %v2632_v52 = vrot.slane %v2615_v41, 2  ;;  %v2633_v40 = vrot.slane %v2615_v41, 4  ;;  %v2634_v34 = vrot.slane %v2615_v41, 6  ;;  %2662 = vst [vmem:[#allocation1 + $0x21] ss:$4 sm:$0xff] %v2615_v41 }
 0xf19   :  { %2663 = vst [vmem:[#allocation1 + $0x22] ss:$4 sm:$0xff] %v2632_v52 }
 0xf1a   :  { %2664 = vst [vmem:[#allocation1 + $0x23] ss:$4 sm:$0xff] %v2633_v40 }
 0xf1b   :  { %2667 = vst [vmem:[#allocation1] ss:$4 sm:$0xff] %v2634_v34 }
 0xf1d   :  { %v2604_v55 = vpop.permute.xlu0 %2603 }
 0xf1e   :  { %v2616_v57 = vsel %vm538_vm7, %v2214_v19, %v2604_v55 }
 0xf1f   :  { %2668 = vst [vmem:[#allocation1 + $0x1] ss:$4 sm:$0xff] %v2616_v57 }
 0xf21   :  { %v2666_v58 = vld.sshfl [vmem:[#allocation1 + $0x20] sm:$0xff pattern:$0x73625140] }
 0xf22   :  { %3233 = vmatmul.msk.f32.gmra.mxu2 %vm142_vm2, %v2666_v58 }
 0xf26   :  { %v2669_v54 = vld.sshfl [vmem:[#allocation1] sm:$0xff pattern:$0x73625140] }
 0xf2a   :  { %3234 = vmatmul.msk.f32.gmra.mxu2 %vm142_vm2, %v2669_v54 }
 0xf5f   :  { %v2697_v59 = vpop.f32.mrf.mxu2 }
 0xf60   :  { %v2712_v0 = vadd.f32 %v2697_v59, %v4462_v6  ;;  %v5054_v59 = vld [vmem:[%s5185_s13 + $0x1] ss:$0 sm:$0xff] }
 0xf62   :  { %v2722_v1 = vadd.f32 %v3329_v32, %v2712_v0 }
 0xf64   :  { %v2731_v26 = vsel %vm142_vm2, %v2722_v1, 0.0 }
 0xf65   :  { %2732 = vadd.xlane.f32.xlu1 %v2731_v26 }
 0xf67   :  { %v2700_v4 = vpop.f32.mrf.mxu2 }
 0xf68   :  { %v2713_v45 = vadd.f32 %v2700_v4, %v4467_v11  ;;  %v5059_v4 = vld [vmem:[%s5186_s14 + $0x1] ss:$0 sm:$0xff] }
 0xf6a   :  { %v2723_v35 = vadd.f32 %v3329_v32, %v2713_v45 }
 0xf6c   :  { %v2734_v47 = vsel %vm142_vm2, %v2723_v35, 0.0 }
 0xf6d   :  { %2735 = vadd.xlane.f32.xlu0 %v2734_v47 }
 0xf85   :  { %v2703_v61 = vpop.f32.mrf.mxu2 }
 0xf86   :  { %v2714_v10 = vadd.f32 %v2703_v61, %v4472_v15 }
 0xf88   :  { %v4998_v7 = vadd.f32 %v3329_v32, %v2714_v10 }
 0xf8a   :  { %v2737_v62 = vsel %vm142_vm2, %v4998_v7, 0.0 }
 0xf8b   :  { %2738 = vadd.xlane.f32.xlu2 %v2737_v62 }
 0xfa5   :  { %v2706_v6 = vpop.f32.mrf.mxu2 }
 0xfa6   :  { %v2715_v13 = vadd.f32 %v2706_v6, %v4477_v8 }
 0xfa8   :  { %v2725_v60 = vadd.f32 %v3329_v32, %v2715_v13 }
 0xfaa   :  { %v2740_v12 = vsel %vm142_vm2, %v2725_v60, 0.0 }
 0xfab   :  { %2741 = vadd.xlane.f32.xlu1 %v2740_v12 }
 0xfad   :  { %v2709_v11 = vpop.f32.mrf.mxu2 }
 0xfae   :  { %v2716_v18 = vadd.f32 %v2709_v11, %v4482_v17 }
 0xfb0   :  { %v5005_v28 = vadd.f32 %v3329_v32, %v2716_v18 }
 0xfb2   :  { %v2743_v15 = vsel %vm155_vm3, %v5005_v28, 0.0 }
 0xfb3   :  { %2744 = vadd.xlane.f32.xlu0 %v2743_v15 }
 0xfd8   :  { %v2733_v56 = vpop.xlane.xlu1 %2732 }
 0xfd9   :  { %v2746_v53 = vmul.f32 %v2733_v56, %v3683_v33 }
 0xfdb   :  { %v2751_v14 = vsub.f32 %v2722_v1, %v2746_v53 }
 0xfdd   :  { %v2756_v19 = vmul.f32 %v2751_v14, %v2751_v14 }
 0xfdf   :  { %v2761_v8 = vsel %vm142_vm2, %v2756_v19, 0.0 }
 0xfe0   :  { %v2736_v23 = vpop.xlane.xlu0 %2735  ;;  %2762 = vadd.xlane.f32.xlu1 %v2761_v8 }
 0xfe1   :  { %v2747_v22 = vmul.f32 %v2736_v23, %v3683_v33 }
 0xfe3   :  { %v5012_v27 = vsub.f32 %v2723_v35, %v2747_v22 }
 0xfe5   :  { %v2757_v17 = vmul.f32 %v5012_v27, %v5012_v27 }
 0xfe7   :  { %v2764_v20 = vsel %vm142_vm2, %v2757_v17, 0.0 }
 0xfe8   :  { %2765 = vadd.xlane.f32.xlu2 %v2764_v20 }
 0xffe   :  { %v2739_v5 = vpop.xlane.xlu2 %2738 }
 0xfff   :  { %v2748_v16 = vmul.f32 %v2739_v5, %v3683_v33 }
0x1001   :  { %v5019_v31 = vsub.f32 %v4998_v7, %v2748_v16 }
0x1003   :  { %v2758_v25 = vmul.f32 %v5019_v31, %v5019_v31 }
0x1005   :  { %v2767_v38 = vsel %vm142_vm2, %v2758_v25, 0.0  ;;  %v3263_v25 = vld [vmem:[%s5189_s17 + $0xf8] sm:$0xff] }
0x1006   :  { %2768 = vadd.xlane.f32.xlu0 %v2767_v38  ;;  %v3262_v38 = vld [vmem:[%s5189_s17 + $0xf0] sm:$0xff]  ;;  %2976 = vmatpush.msra.mxu3 %v3263_v25 }
0x1008   :  { %2977 = vmatpush.msra.mxu3 %v3262_v38 }
0x101e   :  { %v2742_v36 = vpop.xlane.xlu1 %2741 }
0x101f   :  { %v2749_v42 = vmul.f32 %v2742_v36, %v3683_v33 }
0x1021   :  { %v5025_v2 = vsub.f32 %v2725_v60, %v2749_v42 }
0x1023   :  { %v2759_v63 = vmul.f32 %v5025_v2, %v5025_v2 }
0x1025   :  { %v2770_v46 = vsel %vm142_vm2, %v2759_v63, 0.0  ;;  %v3260_v63 = vld [vmem:[%s5189_s17 + $0xe0] sm:$0xff] }
0x1026   :  { %2771 = vadd.xlane.f32.xlu1 %v2770_v46  ;;  %v2745_v29 = vpop.xlane.xlu0 %2744 }
0x1027   :  { %v2750_v51 = vmul.f32 %v2745_v29, %v3683_v33 }
0x1029   :  { %v5032_v24 = vsub.f32 %v5005_v28, %v2750_v51 }
0x102b   :  { %v2760_v9 = vmul.f32 %v5032_v24, %v5032_v24 }
0x102d   :  { %v2773_v43 = vsel %vm155_vm3, %v2760_v9, 0.0 }
0x102e   :  { %2774 = vadd.xlane.f32.xlu2 %v2773_v43 }
0x1053   :  { %v2763_v30 = vpop.xlane.xlu1 %2762 }
0x1054   :  { %v2776_v48 = vmul.f32 %v2763_v30, %v3683_v33 }
0x1056   :  { %v2781_v49 = vadd.f32 1e-05, %v2776_v48 }
0x1058   :  { %3485 = vrsqrt.f32 %v2781_v49  ;;  %vm2792_vm8 = vweird.f32 %v2781_v49 }
0x105b   :  { %v2766_v39 = vpop.xlane.xlu2 %2765 }
0x105c   :  { %v2777_v21 = vmul.f32 %v2766_v39, %v3683_v33 }
0x105e   :  { %v3486_v41 = vpop.eup %3485  ;;  %v2782_v52 = vadd.f32 1e-05, %v2777_v21 }
0x105f   :  { %v2787_v40 = vmul.f32 %v3486_v41, %v2781_v49  ;;  %vm2793_vm7 = vweird.f32 %v3486_v41 }
0x1060   :  { %3487 = vrsqrt.f32 %v2782_v52  ;;  %vm2794_vm9 = vmor %vm2792_vm8, %vm2793_vm7  ;;  %vm2802_vm11 = vweird.f32 %v2782_v52 }
0x1061   :  { %v2788_v34 = vmul.f32 %v3486_v41, %v2787_v40 }
0x1063   :  { %v2789_v55 = vmul.f32 0.5, %v2788_v34 }
0x1065   :  { %v2790_v57 = vsub.f32 1.5, %v2789_v55 }
0x1066   :  { %v3488_v58 = vpop.eup %3487 }
0x1067   :  { %v2791_v54 = vmul.f32 %v3486_v41, %v2790_v57  ;;  %v2797_v32 = vmul.f32 %v3488_v58, %v2782_v52  ;;  %vm2803_vm10 = vweird.f32 %v3488_v58 }
0x1068   :  { %vm2804_vm12 = vmor %vm2802_vm11, %vm2803_vm10 }
0x1069   :  { %v2795_v0 = vsel %vm2794_vm9, %v3486_v41, %v2791_v54  ;;  %v2798_v1 = vmul.f32 %v3488_v58, %v2797_v32  ;;  %v3258_v54 = vld [vmem:[%s5189_s17 + $0xd0] sm:$0xff]  ;;  %v3257_v32 = vld [vmem:[%s5189_s17 + $0xc8] sm:$0xff] }
0x106a   :  { %v2836_v26 = vmul.f32 %v2795_v0, %v2751_v14  ;;  %v3254_v0 = vld [vmem:[%s5189_s17 + $0xb0] sm:$0xff] }
0x106b   :  { %v2799_v45 = vmul.f32 0.5, %v2798_v1  ;;  %v3253_v1 = vld [vmem:[%s5189_s17 + $0xa8] sm:$0xff] }
0x106c   :  { %v2844_v35 = vmul.f32 %v5054_v59, %v2836_v26  ;;  %v3252_v26 = vld [vmem:[%s5189_s17 + $0xa0] sm:$0xff] }
0x106d   :  { %v2800_v47 = vsub.f32 1.5, %v2799_v45  ;;  %v3250_v45 = vld [vmem:[%s5189_s17 + $0x90] sm:$0xff] }
0x106e   :  { %v2852_v61 = vadd.f32 %v5059_v4, %v2844_v35  ;;  %v3249_v35 = vld [vmem:[%s5189_s17 + $0x88] sm:$0xff] }
0x106f   :  { %v2801_v10 = vmul.f32 %v3488_v58, %v2800_v47  ;;  %v3248_v47 = vld [vmem:[%s5189_s17 + $0x80] sm:$0xff] }
0x1070   :  { %3243 = vmatmul.msk.f32.vlgmr.msrb.gmra.mxu1 %vm142_vm2, %v2852_v61  ;;  %v3332_v61 = vld [vmem:[%s5187_s16 + $0x1] ss:$0 sm:$0xff] }
0x1071   :  { %v2805_v62 = vsel %vm2804_vm12, %v3488_v58, %v2801_v10 }
0x1072   :  { %v2837_v6 = vmul.f32 %v2805_v62, %v5012_v27 }
0x1074   :  { %v2845_v13 = vmul.f32 %v5054_v59, %v2837_v6 }
0x1076   :  { %v2853_v60 = vadd.f32 %v5059_v4, %v2845_v13 }
0x1078   :  { %3244 = vmatmul.msk.f32.gmra.mxu1 %vm142_vm2, %v2853_v60 }
0x1079   :  { %v2769_v12 = vpop.xlane.xlu0 %2768 }
0x107a   :  { %v2778_v11 = vmul.f32 %v2769_v12, %v3683_v33 }
0x107c   :  { %v2783_v18 = vadd.f32 1e-05, %v2778_v11 }
0x107e   :  { %3489 = vrsqrt.f32 %v2783_v18  ;;  %vm2812_vm14 = vweird.f32 %v2783_v18 }
0x1084   :  { %v3490_v15 = vpop.eup %3489 }
0x1085   :  { %v2807_v56 = vmul.f32 %v3490_v15, %v2783_v18  ;;  %vm2813_vm13 = vweird.f32 %v3490_v15 }
0x1086   :  { %vm2814_vm15 = vmor %vm2812_vm14, %vm2813_vm13  ;;  %vm3083_vm13 = vcmask 1041409   ;;  %vm3107_vm14 = vcmask 1024  }
0x1087   :  { %v2808_v53 = vmul.f32 %v3490_v15, %v2807_v56 }
0x1089   :  { %v2809_v14 = vmul.f32 0.5, %v2808_v53 }
0x108b   :  { %v2810_v19 = vsub.f32 1.5, %v2809_v14 }
0x108d   :  { %v2811_v8 = vmul.f32 %v3490_v15, %v2810_v19 }
0x108f   :  { %v2815_v23 = vsel %vm2814_vm15, %v3490_v15, %v2811_v8 }
0x1090   :  { %v2838_v22 = vmul.f32 %v2815_v23, %v5019_v31  ;;  %v3261_v31 = vld [vmem:[%s5189_s17 + $0xe8] sm:$0xff] }
0x1091   :  { %2978 = vmatpush.msra.mxu3 %v3261_v31 }
0x1092   :  { %v2846_v27 = vmul.f32 %v5054_v59, %v2838_v22 }
0x1093   :  { %2979 = vmatpush.msra.mxu3 %v3260_v63 }
0x1094   :  { %v2854_v17 = vadd.f32 %v5059_v4, %v2846_v27 }
0x1096   :  { %3245 = vmatmul.msk.f32.gmra.mxu1 %vm142_vm2, %v2854_v17 }
0x1099   :  { %v2772_v20 = vpop.xlane.xlu1 %2771 }
0x109a   :  { %v2779_v5 = vmul.f32 %v2772_v20, %v3683_v33 }
0x109c   :  { %v2784_v16 = vadd.f32 1e-05, %v2779_v5 }
0x109e   :  { %3491 = vrsqrt.f32 %v2784_v16  ;;  %vm2822_vm1 = vweird.f32 %v2784_v16 }
0x10a1   :  { %v2775_v36 = vpop.xlane.xlu2 %2774 }
0x10a2   :  { %v2780_v42 = vmul.f32 %v2775_v36, %v3683_v33 }
0x10a4   :  { %v3492_v46 = vpop.eup %3491  ;;  %v2785_v29 = vadd.f32 1e-05, %v2780_v42 }
0x10a5   :  { %v2817_v51 = vmul.f32 %v3492_v46, %v2784_v16  ;;  %vm2823_vm0 = vweird.f32 %v3492_v46 }
0x10a6   :  { %3493 = vrsqrt.f32 %v2785_v29  ;;  %vm2824_vm4 = vmor %vm2822_vm1, %vm2823_vm0  ;;  %vm2832_vm6 = vweird.f32 %v2785_v29 }
0x10a7   :  { %v2818_v9 = vmul.f32 %v3492_v46, %v2817_v51 }
0x10a9   :  { %v2819_v43 = vmul.f32 0.5, %v2818_v9 }
0x10ab   :  { %v2820_v50 = vsub.f32 1.5, %v2819_v43 }
0x10ac   :  { %v3494_v44 = vpop.eup %3493 }
0x10ad   :  { %v2821_v30 = vmul.f32 %v3492_v46, %v2820_v50  ;;  %v2827_v3 = vmul.f32 %v3494_v44, %v2785_v29  ;;  %vm2833_vm5 = vweird.f32 %v3494_v44 }
0x10ae   :  { %vm2834_vm7 = vmor %vm2832_vm6, %vm2833_vm5 }
0x10af   :  { %v2825_v48 = vsel %vm2824_vm4, %v3492_v46, %v2821_v30  ;;  %v2828_v37 = vmul.f32 %v3494_v44, %v2827_v3 }
0x10b0   :  { %v2839_v49 = vmul.f32 %v2825_v48, %v5025_v2  ;;  %v3259_v2 = vld [vmem:[%s5189_s17 + $0xd8] sm:$0xff] }
0x10b1   :  { %v2829_v39 = vmul.f32 0.5, %v2828_v37  ;;  %2980 = vmatpush.msra.mxu3 %v3259_v2 }
0x10b2   :  { %v2847_v21 = vmul.f32 %v5054_v59, %v2839_v49 }
0x10b3   :  { %v2830_v41 = vsub.f32 1.5, %v2829_v39  ;;  %2981 = vmatpush.msra.mxu3 %v3258_v54 }
0x10b4   :  { %v2855_v52 = vadd.f32 %v5059_v4, %v2847_v21 }
0x10b5   :  { %v2831_v40 = vmul.f32 %v3494_v44, %v2830_v41  ;;  %2982 = vmatpush.msra.mxu3 %v3257_v32 }
0x10b6   :  { %3246 = vmatmul.msk.f32.gmra.mxu1 %vm142_vm2, %v2855_v52 }
0x10b7   :  { %v2835_v34 = vsel %vm2834_vm7, %v3494_v44, %v2831_v40 }
0x10b8   :  { %v2840_v55 = vmul.f32 %v2835_v34, %v5032_v24  ;;  %v3256_v24 = vld [vmem:[%s5189_s17 + $0xc0] sm:$0xff] }
0x10b9   :  { %2983 = vmatpush.msra.mxu3 %v3256_v24 }
0x10ba   :  { %v2848_v57 = vmul.f32 %v5054_v59, %v2840_v55  ;;  %v3255_v59 = vld [vmem:[%s5189_s17 + $0xb8] sm:$0xff] }
0x10bb   :  { %2984 = vmatpush.msra.mxu3 %v3255_v59 }
0x10bc   :  { %v2856_v58 = vadd.f32 %v5059_v4, %v2848_v57  ;;  %v3251_v4 = vld [vmem:[%s5189_s17 + $0x98] sm:$0xff] }
0x10bd   :  { %2985 = vmatpush.msra.mxu3 %v3254_v0 }
0x10be   :  { %3247 = vmatmul.msk.f32.gmra.mxu1 %vm142_vm2, %v2856_v58 }
0x10bf   :  { %2986 = vmatpush.msra.mxu3 %v3253_v1 }
0x10c1   :  { %2987 = vmatpush.msra.mxu3 %v3252_v26 }
0x10c3   :  { %2988 = vmatpush.msra.mxu3 %v3251_v4 }
0x10c5   :  { %2989 = vmatpush.msra.mxu3 %v3250_v45  ;;  %v3333_v45 = vld [vmem:[%s5190_s18 + $0x1] ss:$0 sm:$0xff] }
0x10c7   :  { %2990 = vmatpush.msra.mxu3 %v3249_v35 }
0x10c9   :  { %2991 = vmatpush.msra.mxu3 %v3248_v47 }
0x10ed   :  { %v2899_v10 = vpop.f32.mrf.mxu1 }
0x10ee   :  { %v2900_v62 = vadd.f32 %v3332_v61, %v2899_v10 }
0x10f0   :  { %v2919_v6 = vmul.f32 0.044715, %v2900_v62  ;;  %v2914_v22 = vmul.f32 0.5, %v2900_v62 }
0x10f2   :  { %v2924_v13 = vmul.f32 %v2919_v6, %v2900_v62 }
0x10f4   :  { %v2929_v60 = vmul.f32 %v2924_v13, %v2900_v62 }
0x10f5   :  { %v2902_v12 = vpop.f32.mrf.mxu1 }
0x10f6   :  { %v2903_v11 = vadd.f32 %v3332_v61, %v2902_v12  ;;  %v2934_v18 = vadd.f32 %v2929_v60, %v2900_v62 }
0x10f8   :  { %v2939_v15 = vmul.f32 0.7978846, %v2934_v18  ;;  %v2920_v56 = vmul.f32 0.044715, %v2903_v11  ;;  %v2915_v5 = vmul.f32 0.5, %v2903_v11 }
0x10fa   :  { %3495 = vtanh.f32 %v2939_v15  ;;  %v2925_v53 = vmul.f32 %v2920_v56, %v2903_v11 }
0x10fc   :  { %v2930_v14 = vmul.f32 %v2925_v53, %v2903_v11 }
0x10fe   :  { %v2935_v19 = vadd.f32 %v2930_v14, %v2903_v11 }
0x1100   :  { %v3496_v8 = vpop.eup %3495  ;;  %v2940_v23 = vmul.f32 0.7978846, %v2935_v19 }
0x1101   :  { %v2949_v27 = vadd.f32 1.0, %v3496_v8 }
0x1102   :  { %3497 = vtanh.f32 %v2940_v23 }
0x1103   :  { %v2954_v17 = vmul.f32 %v2949_v27, %v2914_v22 }
0x1105   :  { %2992 = vmatmul.f32.vlgmr.msra.gmra.mxu3 %v2954_v17 }
0x1108   :  { %v3498_v20 = vpop.eup %3497 }
0x1109   :  { %v2950_v16 = vadd.f32 1.0, %v3498_v20  ;;  %v3076_v20 = vld [vmem:[%s5193_s21 + $0x18] sm:$0xff] }
0x110a   :  { %3099 = vmatpush.msrb.mxu0 %v3076_v20 }
0x110b   :  { %v2955_v25 = vmul.f32 %v2950_v16, %v2915_v5  ;;  %v3075_v5 = vld [vmem:[%s5193_s21 + $0x10] sm:$0xff] }
0x110c   :  { %3100 = vmatpush.msrb.mxu0 %v3075_v5 }
0x110d   :  { %2994 = vmatmul.f32.gmra.mxu3 %v2955_v25  ;;  %v3074_v25 = vld [vmem:[%s5193_s21 + $0x8] sm:$0xff] }
0x110e   :  { %3101 = vmatpush.msrb.mxu0 %v3074_v25 }
0x1113   :  { %v2905_v38 = vpop.f32.mrf.mxu1 }
0x1114   :  { %v2906_v31 = vadd.f32 %v3332_v61, %v2905_v38  ;;  %v3073_v38 = vld [vmem:[%s5193_s21] sm:$0xff] }
0x1115   :  { %3102 = vmatpush.msrb.mxu0 %v3073_v38 }
0x1116   :  { %v2921_v36 = vmul.f32 0.044715, %v2906_v31  ;;  %v2916_v9 = vmul.f32 0.5, %v2906_v31 }
0x1118   :  { %v2926_v42 = vmul.f32 %v2921_v36, %v2906_v31 }
0x111a   :  { %v2931_v63 = vmul.f32 %v2926_v42, %v2906_v31 }
0x111c   :  { %v2936_v46 = vadd.f32 %v2931_v63, %v2906_v31  ;;  %v28_v63 = vstv %s5194_s22 }
0x111d   :  { %29 = vst [vmem:[#allocation2] sm:$0x1] %v28_v63 }
0x111e   :  { %v2941_v29 = vmul.f32 0.7978846, %v2936_v46 }
0x1120   :  { %3499 = vtanh.f32 %v2941_v29 }
0x1126   :  { %v3500_v51 = vpop.eup %3499 }
0x1127   :  { %v2951_v43 = vadd.f32 1.0, %v3500_v51 }
0x1129   :  { %v2956_v50 = vmul.f32 %v2951_v43, %v2916_v9 }
0x112b   :  { %2996 = vmatmul.f32.gmra.mxu3 %v2956_v50 }
0x1133   :  { %v2908_v44 = vpop.f32.mrf.mxu1 }
0x1134   :  { %v2909_v30 = vadd.f32 %v3332_v61, %v2908_v44 }
0x1136   :  { %v2922_v3 = vmul.f32 0.044715, %v2909_v30  ;;  %v2917_v2 = vmul.f32 0.5, %v2909_v30 }
0x1138   :  { %v2927_v48 = vmul.f32 %v2922_v3, %v2909_v30 }
0x113a   :  { %v2932_v37 = vmul.f32 %v2927_v48, %v2909_v30  ;;  %v3334_v48 = vld [vmem:[%s5191_s19] ss:$0 sm:$0xff] }
0x113b   :  { %v2911_v49 = vpop.f32.mrf.mxu1 }
0x113c   :  { %v2912_v39 = vadd.f32 %v3332_v61, %v2911_v49  ;;  %v2937_v21 = vadd.f32 %v2932_v37, %v2909_v30 }
0x113e   :  { %v2942_v41 = vmul.f32 0.7978846, %v2937_v21  ;;  %v2923_v52 = vmul.f32 0.044715, %v2912_v39  ;;  %v2918_v59 = vmul.f32 0.5, %v2912_v39 }
0x1140   :  { %3501 = vtanh.f32 %v2942_v41  ;;  %v2928_v40 = vmul.f32 %v2923_v52, %v2912_v39  ;;  %v3335_v41 = vld [vmem:[%s5192_s20] ss:$0 sm:$0xff] }
0x1142   :  { %v2933_v34 = vmul.f32 %v2928_v40, %v2912_v39 }
0x1144   :  { %v2938_v55 = vadd.f32 %v2933_v34, %v2912_v39 }
0x1146   :  { %v3502_v57 = vpop.eup %3501  ;;  %v2943_v58 = vmul.f32 0.7978846, %v2938_v55 }
0x1147   :  { %v2952_v54 = vadd.f32 1.0, %v3502_v57 }
0x1148   :  { %3503 = vtanh.f32 %v2943_v58 }
0x1149   :  { %v2957_v32 = vmul.f32 %v2952_v54, %v2917_v2 }
0x114b   :  { %2999 = vmatmul.f32.gmra.mxu3 %v2957_v32  ;;  %v3336_v32 = vld [vmem:[#allocation2] ss:$0 sm:$0xff] }
0x114e   :  { %v3504_v24 = vpop.eup %3503 }
0x114f   :  { %v2953_v0 = vadd.f32 1.0, %v3504_v24 }
0x1151   :  { %v2958_v1 = vmul.f32 %v2953_v0, %v2918_v59 }
0x1153   :  { %3001 = vmatmul.f32.gmra.mxu3 %v2958_v1 }
0x1188   :  { %v2993_v26 = vpop.f32.mrf.mxu3 }
0x1190   :  { %v2995_v4 = vpop.f32.mrf.mxu3 }
0x11ae   :  { %v2997_v35 = vpop.f32.mrf.mxu3 }
0x11af   :  { %v3005_v47 = vadd.f32 %v2997_v35, %v4998_v7 }
0x11b1   :  { %v3012_v61 = vadd.f32 %v3333_v45, %v3005_v47 }
0x11b3   :  { %v3016_v10 = vsel %vm142_vm2, %v3012_v61, 0.0 }
0x11b4   :  { %3017 = vadd.xlane.f32.xlu1 %v3016_v10 }
0x11ce   :  { %v3000_v62 = vpop.f32.mrf.mxu3 }
0x11d6   :  { %v3002_v6 = vpop.f32.mrf.mxu3 }
0x11d7   :  { %v3006_v13 = vadd.f32 %v3002_v6, %v5005_v28 }
0x11d9   :  { %v3013_v60 = vadd.f32 %v3333_v45, %v3006_v13 }
0x11db   :  { %v3019_v12 = vsel %vm155_vm3, %v3013_v60, 0.0 }
0x11dc   :  { %3020 = vadd.xlane.f32.xlu0 %v3019_v12 }
0x1227   :  { %v3018_v11 = vpop.xlane.xlu1 %3017 }
0x1228   :  { %v3022_v18 = vmul.f32 %v3018_v11, %v3683_v33 }
0x122a   :  { %v3024_v15 = vsub.f32 %v3012_v61, %v3022_v18 }
0x122c   :  { %v3026_v56 = vmul.f32 %v3024_v15, %v3024_v15 }
0x122e   :  { %v3028_v53 = vsel %vm142_vm2, %v3026_v56, 0.0 }
0x122f   :  { %3029 = vadd.xlane.f32.xlu0 %v3028_v53 }
0x124f   :  { %v3021_v7 = vpop.xlane.xlu0 %3020 }
0x1250   :  { %v3023_v14 = vmul.f32 %v3021_v7, %v3683_v33 }
0x1252   :  { %v3025_v19 = vsub.f32 %v3013_v60, %v3023_v14 }
0x1254   :  { %v3027_v8 = vmul.f32 %v3025_v19, %v3025_v19 }
0x1256   :  { %v3031_v23 = vsel %vm155_vm3, %v3027_v8, 0.0 }
0x1257   :  { %3032 = vadd.xlane.f32.xlu2 %v3031_v23 }
0x12a2   :  { %v3030_v28 = vpop.xlane.xlu0 %3029 }
0x12a3   :  { %v3034_v22 = vmul.f32 %v3030_v28, %v3683_v33 }
0x12a5   :  { %v3036_v27 = vadd.f32 1e-05, %v3034_v22 }
0x12a7   :  { %3505 = vrsqrt.f32 %v3036_v27  ;;  %vm3044_vm8 = vweird.f32 %v3036_v27 }
0x12ad   :  { %v3506_v17 = vpop.eup %3505 }
0x12ae   :  { %v3039_v16 = vmul.f32 %v3506_v17, %v3036_v27  ;;  %vm3045_vm3 = vweird.f32 %v3506_v17 }
0x12af   :  { %vm3046_vm9 = vmor %vm3044_vm8, %vm3045_vm3 }
0x12b0   :  { %v3040_v31 = vmul.f32 %v3506_v17, %v3039_v16 }
0x12b2   :  { %v3041_v29 = vmul.f32 0.5, %v3040_v31 }
0x12b4   :  { %v3042_v51 = vsub.f32 1.5, %v3041_v29 }
0x12b6   :  { %v3043_v43 = vmul.f32 %v3506_v17, %v3042_v51 }
0x12b8   :  { %v3047_v30 = vsel %vm3046_vm9, %v3506_v17, %v3043_v43 }
0x12b9   :  { %v3058_v37 = vmul.f32 %v3047_v30, %v3024_v15 }
0x12bb   :  { %v3063_v21 = vmul.f32 %v3334_v48, %v3058_v37 }
0x12bd   :  { %v3068_v55 = vadd.f32 %v3335_v41, %v3063_v21 }
0x12bf   :  { %v3081_v58 = vperm.slane %v3068_v55, 0 }
0x12ca   :  { %v3033_v36 = vpop.xlane.xlu2 %3032 }
0x12cb   :  { %v3035_v42 = vmul.f32 %v3033_v36, %v3683_v33 }
0x12cd   :  { %v3037_v46 = vadd.f32 1e-05, %v3035_v42 }
0x12cf   :  { %3507 = vrsqrt.f32 %v3037_v46  ;;  %vm3054_vm11 = vweird.f32 %v3037_v46 }
0x12d5   :  { %v3508_v9 = vpop.eup %3507 }
0x12d6   :  { %v3049_v50 = vmul.f32 %v3508_v9, %v3037_v46  ;;  %vm3055_vm10 = vweird.f32 %v3508_v9 }
0x12d7   :  { %vm3056_vm12 = vmor %vm3054_vm11, %vm3055_vm10 }
0x12d8   :  { %v3050_v44 = vmul.f32 %v3508_v9, %v3049_v50 }
0x12da   :  { %v3051_v3 = vmul.f32 0.5, %v3050_v44 }
0x12dc   :  { %v3052_v33 = vsub.f32 1.5, %v3051_v3 }
0x12de   :  { %v3053_v49 = vmul.f32 %v3508_v9, %v3052_v33 }
0x12e0   :  { %v3057_v39 = vsel %vm3056_vm12, %v3508_v9, %v3053_v49 }
0x12e1   :  { %v3059_v52 = vmul.f32 %v3057_v39, %v3025_v19 }
0x12e3   :  { %v3064_v40 = vmul.f32 %v3334_v48, %v3059_v52 }
0x12e5   :  { %v3069_v34 = vadd.f32 %v3335_v41, %v3064_v40 }
0x12e7   :  { %v3072_v57 = vrot.slane %v3069_v34, 2 }
0x12e9   :  { %v3082_v2 = vperm.slane %v3072_v57, 0 }
0x12eb   :  { %v3084_v54 = vsel %vm3083_vm13, %v3082_v2, %v3081_v58 }
0x12ec   :  { %3265 = vmatmul.msk.f32.vlgmr.msrb.gmra.mxu0 %vm142_vm2, %v3084_v54 }
0x1369   :  { %v3104_v24 = vpop.f32.mrf.mxu0 }
0x136a   :  { %v3105_v59 = vadd.f32 %v3336_v32, %v3104_v24 }
0x136c   :  { %3108 = vst.msk [vmem:[%s5195_s23] sm:$0x3] %vm3107_vm14, %v3105_v59 }

</bundles_post_ra>
